<compile_context>
chip_gen: v7x
topology: tpu7x:2x2x1
jax: 0.10.0
libtpu: 0.0.40
codegen_flags: <defaults>
</compile_context>

<pallas_src>
import jax
import jax.numpy as jnp
from jax.experimental import pallas as pl
from jax.experimental.pallas import tpu as pltpu

C = 32   # channel count fixed by the module
K = 3    # kernel size


def _make_kernel(h, nbh, wc):
    """Kernel over one row-block holding nb whole images (nbh = nb*h rows, wc = W*C lanes)."""

    def kernel(x_ref, a1_ref, b1_ref, a2_ref, b2_ref, out_ref):
        # x_ref  : (nbh, wc)   f32    nb images, h rows each, channels fastest (lane dense)
        # a*_ref : (3*wc, wc)  bf16   stacked block-Toeplitz conv weights (dy taps stacked on K)
        # b*_ref : (1, wc)     f32    bias tiled over W
        # out_ref: (nbh, wc)   f32
        row_in_img = jax.lax.broadcasted_iota(jnp.int32, (nbh, wc), 0) % h
        up_ok = row_in_img != 0          # row y-1 exists inside the same image
        dn_ok = row_in_img != (h - 1)    # row y+1 exists inside the same image

        def conv3x3(inp, a_ref, b_ref):
            # Vertical taps: sublane roll (XLU) + boundary mask (VPU) == zero H-padding.
            # Horizontal taps + zero W-padding are folded into the block-Toeplitz weight,
            # so one MXU matmul (K = 3*wc) does the whole 3x3 conv for this row block.
            up = jnp.where(up_ok, pltpu.roll(inp, 1, 0), 0.0)          # in[y-1]
            dn = jnp.where(dn_ok, pltpu.roll(inp, nbh - 1, 0), 0.0)    # in[y+1]
            slab = jnp.concatenate([up, inp, dn], axis=-1).astype(jnp.bfloat16)
            acc = jnp.dot(slab, a_ref[...], preferred_element_type=jnp.float32)
            return acc + b_ref[...]                                     # (1, wc) broadcast

        h1 = conv3x3(x_ref[...], a1_ref, b1_ref)
        r1 = jnp.maximum(h1, 0.0)                      # ReLU in f32 (v5e has no bf16 VPU)
        h2 = conv3x3(r1, a2_ref, b2_ref)
        # Residual: re-read x from the resident VMEM block instead of keeping it live.
        out_ref[...] = (x_ref[...] + h2).astype(out_ref.dtype)

    return kernel


def _build_row_weights(w_hwio, width, dtype):
    """Fold dx taps + zero W-padding into a stacked (3*W*C, W*C) block-Toeplitz matrix.

    Block dy: A_dy[(w+dx-1)*C + ci, w*C + co] = w_hwio[dy, dx, ci, co] for valid w+dx-1.
    Stacked along the contraction dim in dy order to match the [up | center | down] slab.
    """
    kh, kw, cin, cout = w_hwio.shape
    cols = jnp.arange(width)
    mats = []
    for dy in range(kh):
        a = jnp.zeros((width * cin, width * cout), jnp.float32)
        for dx in range(kw):
            ox = dx - 1
            sel = (cols[:, None] == cols[None, :] + ox).astype(jnp.float32)
            a = a + jnp.kron(sel, w_hwio[dy, dx].astype(jnp.float32))
        mats.append(a)
    return jnp.concatenate(mats, axis=0).astype(dtype)   # (3*W*C, W*C)


def _pick_block_batch(n, h, target_rows=512):
    """Images per grid step.

    Keeps the grid length >= 2 whenever n >= 2 (so both v7x TensorCores get work) and
    otherwise grows the row block toward ~target_rows to feed the 256-wide MXU on
    v6e/v7x.  Candidates must give a multiple-of-8 row block; fall back to one
    full-array block (exempt from the (8,128) block-shape rule) if none exists.
    """
    nb_cap = n if n < 2 else n // 2
    cands = [nb for nb in range(1, nb_cap + 1)
             if n % nb == 0 and nb * h <= max(target_rows, h) and (nb * h) % 8 == 0]
    if cands:
        return max(cands)
    return n


@jax.jit
def resblock_pallas(x_nchw, w1, b1, w2, b2):
    """x_nchw: (N, 32, H, W) f32; w*: (3,3,32,32) HWIO; b*: (32,). Returns NCHW."""
    n, c, h, w = x_nchw.shape
    assert c == C
    wc = w * C
    nb = _pick_block_batch(n, h)
    nbh = nb * h
    grid = (n // nb,)

    # NCHW -> lane-dense rows (N*H, W*C); single layout shuffle, done once in HBM.
    x_rows = jnp.transpose(x_nchw, (0, 2, 3, 1)).reshape(n * h, wc)

    a1 = _build_row_weights(w1, w, jnp.bfloat16)      # (3*WC, WC)
    a2 = _build_row_weights(w2, w, jnp.bfloat16)
    b1r = jnp.tile(b1.astype(jnp.float32), w).reshape(1, wc)
    b2r = jnp.tile(b2.astype(jnp.float32), w).reshape(1, wc)

    # Shape-derived VMEM budget: in/out blocks double-buffered, weights single-buffered.
    xblk = nbh * wc * 4
    wbytes = 2 * (3 * wc) * wc * 2
    bbytes = 2 * wc * 4
    needed = 4 * xblk + wbytes + 2 * bbytes + (4 << 20)     # + slack for temporaries
    vmem_limit = int(min(max(needed, 32 << 20), 96 << 20))

    out_rows = pl.pallas_call(
        _make_kernel(h, nbh, wc),
        out_shape=jax.ShapeDtypeStruct((n * h, wc), x_rows.dtype),
        grid_spec=pltpu.PrefetchScalarGridSpec(
            num_scalar_prefetch=0,
            grid=grid,
            in_specs=[
                pl.BlockSpec((nbh, wc), lambda i: (i, 0)),                 # x rows
                pl.BlockSpec((3 * wc, wc), lambda i: (0, 0),               # conv1 weights
                             pipeline_mode=pl.Buffered(1)),
                pl.BlockSpec((1, wc), lambda i: (0, 0),                    # conv1 bias
                             pipeline_mode=pl.Buffered(1)),
                pl.BlockSpec((3 * wc, wc), lambda i: (0, 0),               # conv2 weights
                             pipeline_mode=pl.Buffered(1)),
                pl.BlockSpec((1, wc), lambda i: (0, 0),                    # conv2 bias
                             pipeline_mode=pl.Buffered(1)),
            ],
            out_specs=pl.BlockSpec((nbh, wc), lambda i: (i, 0)),
        ),
        compiler_params=pltpu.CompilerParams(
            dimension_semantics=("parallel",),
            vmem_limit_bytes=vmem_limit),
    )(x_rows, a1, b1r, a2, b2r)

    return jnp.transpose(out_rows.reshape(n, h, w, C), (0, 3, 1, 2))   # back to NCHW


def resblock_ref(x_nchw, w1, b1, w2, b2):
    """Pure-JAX f32 reference (lax conv), NCHW in/out, for correctness check."""
    x = jnp.transpose(x_nchw, (0, 2, 3, 1))
    dn = jax.lax.conv_dimension_numbers(x.shape, w1.shape, ('NHWC', 'HWIO', 'NHWC'))
    c1 = jax.lax.conv_general_dilated(x, w1, (1, 1), 'SAME', dimension_numbers=dn) + b1
    r1 = jnp.maximum(c1, 0.0)
    c2 = jax.lax.conv_general_dilated(r1, w2, (1, 1), 'SAME', dimension_numbers=dn) + b2
    return jnp.transpose(x + c2, (0, 3, 1, 2))


if __name__ == "__main__":
    key = jax.random.PRNGKey(0)
    k_x, k_w1, k_b1, k_w2, k_b2 = jax.random.split(key, 5)

    N, H, W = 2, 16, 16
    x = jax.random.normal(k_x, (N, C, H, W), jnp.float32)           # NCHW input
    # Synthetic parameters (HWIO), same shapes as Conv2d(32, 32, 3, padding=1).
    w1 = jax.random.normal(k_w1, (K, K, C, C), jnp.float32) * 0.05
    b1 = jax.random.normal(k_b1, (C,), jnp.float32) * 0.05
    w2 = jax.random.normal(k_w2, (K, K, C, C), jnp.float32) * 0.05
    b2 = jax.random.normal(k_b2, (C,), jnp.float32) * 0.05

    out = jax.block_until_ready(resblock_pallas(x, w1, b1, w2, b2))
    ref = jax.block_until_ready(resblock_ref(x, w1, b1, w2, b2))

    assert out.shape == (N, C, H, W)
    # bf16 matmul operands (f32 accumulation) -> intentionally relaxed tolerance.
    max_err = jnp.max(jnp.abs(out - ref))
    assert jnp.allclose(out, ref, atol=2e-2, rtol=2e-2), f"max abs err {max_err}"
    print("KERNEL_OK")
</pallas_src>

<mosaic_0001>
module attributes {stable_mosaic.version = 11 : i64} {
  func.func @kernel(%arg0: i32, %arg1: memref<16x512xf32, #tpu.memory_space<vmem>>, %arg2: memref<1536x512xbf16, #tpu.memory_space<vmem>>, %arg3: memref<1x512xf32, #tpu.memory_space<vmem>>, %arg4: memref<1536x512xbf16, #tpu.memory_space<vmem>>, %arg5: memref<1x512xf32, #tpu.memory_space<vmem>>, %arg6: memref<16x512xf32, #tpu.memory_space<vmem>>) attributes {dimension_semantics = [#tpu.dimension_semantics<parallel>], iteration_bounds = array<i64: 2>, scalar_prefetch = 0 : i64, scratch_operands = 0 : i64, tpu.core_type = #tpu.core_type<tc>, window_params = [{transform_indices = @transform_0, window_bounds = array<i64: 16, 512>}, {pipeline_mode = #tpu.pipeline_mode<synchronous>, transform_indices = @transform_1, window_bounds = array<i64: 1536, 512>}, {pipeline_mode = #tpu.pipeline_mode<synchronous>, transform_indices = @transform_2, window_bounds = array<i64: 1, 512>}, {pipeline_mode = #tpu.pipeline_mode<synchronous>, transform_indices = @transform_3, window_bounds = array<i64: 1536, 512>}, {pipeline_mode = #tpu.pipeline_mode<synchronous>, transform_indices = @transform_4, window_bounds = array<i64: 1, 512>}, {transform_indices = @transform_5, window_bounds = array<i64: 16, 512>}]} {
    %0 = tpu.iota {dimensions = array<i32: 0>} : vector<16x512xi32>
    %c16_i32 = arith.constant 16 : i32
    %c0_i32 = arith.constant 0 : i32
    %1 = arith.cmpi eq, %c16_i32, %c0_i32 : i32
    %c1_i32 = arith.constant 1 : i32
    %2 = arith.select %1, %c1_i32, %c16_i32 : i32
    %3 = vector.broadcast %2 : i32 to vector<16x512xi32>
    %4 = arith.remsi %0, %3 : vector<16x512xi32>
    %c0_i32_0 = arith.constant 0 : i32
    %5 = vector.broadcast %c0_i32_0 : i32 to vector<16x512xi32>
    %6 = arith.cmpi ne, %4, %5 : vector<16x512xi32>
    %c0_i32_1 = arith.constant 0 : i32
    %7 = vector.broadcast %c0_i32_1 : i32 to vector<16x512xi32>
    %8 = arith.cmpi slt, %4, %7 : vector<16x512xi32>
    %c0_i32_2 = arith.constant 0 : i32
    %9 = arith.cmpi slt, %2, %c0_i32_2 : i32
    %10 = vector.broadcast %9 : i1 to vector<16x512xi1>
    %11 = vector.broadcast %10 : vector<16x512xi1> to vector<16x512xi1>
    %12 = arith.xori %8, %11 : vector<16x512xi1>
    %13 = arith.andi %12, %6 : vector<16x512xi1>
    %14 = vector.broadcast %2 : i32 to vector<16x512xi32>
    %15 = arith.addi %4, %14 : vector<16x512xi32>
    %16 = arith.select %13, %15, %4 : vector<16x512xi1>, vector<16x512xi32>
    %c0_i32_3 = arith.constant 0 : i32
    %17 = vector.broadcast %c0_i32_3 : i32 to vector<16x512xi32>
    %18 = arith.cmpi ne, %16, %17 : vector<16x512xi32>
    %c15_i32 = arith.constant 15 : i32
    %19 = vector.broadcast %c15_i32 : i32 to vector<16x512xi32>
    %20 = arith.cmpi ne, %16, %19 : vector<16x512xi32>
    %c0 = arith.constant 0 : index
    %c0_4 = arith.constant 0 : index
    %21 = vector.load %arg1[%c0, %c0_4] : memref<16x512xf32, #tpu.memory_space<vmem>>, vector<16x512xf32>
    %c1_i32_5 = arith.constant 1 : i32
    %22 = tpu.dynamic_rotate %21 by %c1_i32_5 dim 0 : vector<16x512xf32>, i32 -> vector<16x512xf32>
    %cst = arith.constant 0.000000e+00 : f32
    %23 = vector.broadcast %cst : f32 to vector<16x512xf32>
    %24 = arith.select %18, %22, %23 : vector<16x512xi1>, vector<16x512xf32>
    %c15_i32_6 = arith.constant 15 : i32
    %25 = tpu.dynamic_rotate %21 by %c15_i32_6 dim 0 : vector<16x512xf32>, i32 -> vector<16x512xf32>
    %cst_7 = arith.constant 0.000000e+00 : f32
    %26 = vector.broadcast %cst_7 : f32 to vector<16x512xf32>
    %27 = arith.select %20, %25, %26 : vector<16x512xi1>, vector<16x512xf32>
    %28 = tpu.concatenate %24, %21, %27 in 1 : vector<16x512xf32>, vector<16x512xf32>, vector<16x512xf32> -> vector<16x1536xf32>
    %29 = arith.truncf %28 : vector<16x1536xf32> to vector<16x1536xbf16>
    %c0_8 = arith.constant 0 : index
    %c0_9 = arith.constant 0 : index
    %30 = vector.load %arg2[%c0_8, %c0_9] : memref<1536x512xbf16, #tpu.memory_space<vmem>>, vector<1536x512xbf16>
    %cst_10 = arith.constant dense<0.000000e+00> : vector<16x512xf32>
    %31 = tpu.matmul %29, %30, %cst_10 {dimension_numbers = #tpu.dot_dimension_numbers<[1], [0], [0], [1], [0, 0, 1, 1], [], []>} : vector<16x1536xbf16>, vector<1536x512xbf16>, vector<16x512xf32> -> vector<16x512xf32>
    %c0_11 = arith.constant 0 : index
    %c0_12 = arith.constant 0 : index
    %32 = vector.load %arg3[%c0_11, %c0_12] : memref<1x512xf32, #tpu.memory_space<vmem>>, vector<1x512xf32>
    %33 = vector.broadcast %32 : vector<1x512xf32> to vector<16x512xf32>
    %34 = arith.addf %31, %33 : vector<16x512xf32>
    %cst_13 = arith.constant 0.000000e+00 : f32
    %35 = vector.broadcast %cst_13 : f32 to vector<16x512xf32>
    %36 = arith.maximumf %34, %35 : vector<16x512xf32>
    %c1_i32_14 = arith.constant 1 : i32
    %37 = tpu.dynamic_rotate %36 by %c1_i32_14 dim 0 : vector<16x512xf32>, i32 -> vector<16x512xf32>
    %cst_15 = arith.constant 0.000000e+00 : f32
    %38 = vector.broadcast %cst_15 : f32 to vector<16x512xf32>
    %39 = arith.select %18, %37, %38 : vector<16x512xi1>, vector<16x512xf32>
    %c15_i32_16 = arith.constant 15 : i32
    %40 = tpu.dynamic_rotate %36 by %c15_i32_16 dim 0 : vector<16x512xf32>, i32 -> vector<16x512xf32>
    %cst_17 = arith.constant 0.000000e+00 : f32
    %41 = vector.broadcast %cst_17 : f32 to vector<16x512xf32>
    %42 = arith.select %20, %40, %41 : vector<16x512xi1>, vector<16x512xf32>
    %43 = tpu.concatenate %39, %36, %42 in 1 : vector<16x512xf32>, vector<16x512xf32>, vector<16x512xf32> -> vector<16x1536xf32>
    %44 = arith.truncf %43 : vector<16x1536xf32> to vector<16x1536xbf16>
    %c0_18 = arith.constant 0 : index
    %c0_19 = arith.constant 0 : index
    %45 = vector.load %arg4[%c0_18, %c0_19] : memref<1536x512xbf16, #tpu.memory_space<vmem>>, vector<1536x512xbf16>
    %cst_20 = arith.constant dense<0.000000e+00> : vector<16x512xf32>
    %46 = tpu.matmul %44, %45, %cst_20 {dimension_numbers = #tpu.dot_dimension_numbers<[1], [0], [0], [1], [0, 0, 1, 1], [], []>} : vector<16x1536xbf16>, vector<1536x512xbf16>, vector<16x512xf32> -> vector<16x512xf32>
    %c0_21 = arith.constant 0 : index
    %c0_22 = arith.constant 0 : index
    %47 = vector.load %arg5[%c0_21, %c0_22] : memref<1x512xf32, #tpu.memory_space<vmem>>, vector<1x512xf32>
    %48 = vector.broadcast %47 : vector<1x512xf32> to vector<16x512xf32>
    %49 = arith.addf %46, %48 : vector<16x512xf32>
    %c0_23 = arith.constant 0 : index
    %c0_24 = arith.constant 0 : index
    %50 = vector.load %arg1[%c0_23, %c0_24] : memref<16x512xf32, #tpu.memory_space<vmem>>, vector<16x512xf32>
    %51 = arith.addf %50, %49 : vector<16x512xf32>
    %c0_25 = arith.constant 0 : index
    %c0_26 = arith.constant 0 : index
    %52 = vector.load %arg6[%c0_25, %c0_26] : memref<16x512xf32, #tpu.memory_space<vmem>>, vector<16x512xf32>
    tpu.vector_store %arg6[%c0_25, %c0_26], %51 {strides = array<i32>} : memref<16x512xf32, #tpu.memory_space<vmem>>, vector<16x512xf32>,
    return
  }
  func.func @transform_0(%arg0: i32) -> (i32, i32) {
    %c0_i32 = arith.constant 0 : i32
    %c0_i32_0 = arith.constant 0 : i32
    return %arg0, %c0_i32 : i32, i32
  }
  func.func @transform_1(%arg0: i32) -> (i32, i32) {
    %c0_i32 = arith.constant 0 : i32
    %c0_i32_0 = arith.constant 0 : i32
    %c0_i32_1 = arith.constant 0 : i32
    return %c0_i32, %c0_i32_0 : i32, i32
  }
  func.func @transform_2(%arg0: i32) -> (i32, i32) {
    %c0_i32 = arith.constant 0 : i32
    %c0_i32_0 = arith.constant 0 : i32
    %c0_i32_1 = arith.constant 0 : i32
    return %c0_i32, %c0_i32_0 : i32, i32
  }
  func.func @transform_3(%arg0: i32) -> (i32, i32) {
    %c0_i32 = arith.constant 0 : i32
    %c0_i32_0 = arith.constant 0 : i32
    %c0_i32_1 = arith.constant 0 : i32
    return %c0_i32, %c0_i32_0 : i32, i32
  }
  func.func @transform_4(%arg0: i32) -> (i32, i32) {
    %c0_i32 = arith.constant 0 : i32
    %c0_i32_0 = arith.constant 0 : i32
    %c0_i32_1 = arith.constant 0 : i32
    return %c0_i32, %c0_i32_0 : i32, i32
  }
  func.func @transform_5(%arg0: i32) -> (i32, i32) {
    %c0_i32 = arith.constant 0 : i32
    %c0_i32_0 = arith.constant 0 : i32
    return %arg0, %c0_i32 : i32, i32
  }
}

</mosaic_0001>

<bundles_post_ra>
// kernel: tile.13
= control target key start
LH: loop header
LB: loop body
LE: loop exit
PB: predicated region body
PF: predicated region fallthrough
CT: control target
= control target key end

     0   :  { %s28_s0 = inlined_call_operand.vmem [shape: f32[32], index: 0, kind: input, shape index: {}]   ;;  %s29_s1 = inlined_call_operand.vmem [shape: f32[16,32], index: 1, kind: output, shape index: {}]  }
   0x1   :  { %v4_v0 = vld [vmem:[%s28_s0] ss:$0 sm:$0xff] }
   0x2   :  { %5 = vst [vmem:[%s29_s1] sm:$0xff] %v4_v0  ;;  %8 = vst [vmem:[%s29_s1 + $0x8] sm:$0xff] %v4_v0 }

// kernel: tile.14
= control target key start
LH: loop header
LB: loop body
LE: loop exit
PB: predicated region body
PF: predicated region fallthrough
CT: control target
= control target key end

     0   :  { %s57_s8 = smov 96   ;;  %vm3_vm0 = vcmask 261120   ;;  %s59_s15 = smov 64   ;;  %vm9_vm1 = vcmask 1048320   ;;  %vm15_vm2 = vcmask 785920   ;;  %vm21_vm3 = vcmask 523520   ;;  %s94_s0 = inlined_call_operand.vmem [shape: f32[16,32], index: 0, kind: input, shape index: {}]   ;;  %s95_s1 = inlined_call_operand.vmem [shape: f32[1,512], index: 1, kind: output, shape index: {}]  }
   0x1   :  { %v48_v0 = vld [vmem:[%s94_s0 + $0x3] ss:$4 sm:$0xf]   ;;  %v49_v1 = vld [vmem:[%s94_s0 + $0x2] ss:$4 sm:$0xf]  }
   0x2   :  { %7 = vrot.lane.b32.xlu0 %v48_v0, %s57_s8  ;;  %v50_v2 = vld [vmem:[%s94_s0 + $0x1] ss:$4 sm:$0xf]   ;;  %v2_v3 = vld [vmem:[%s94_s0] ss:$4 sm:$0xf]  }
   0x3   :  { %s58_s0 = smov 32   ;;  %4 = vst.msk [vmem:[#allocation0] ss:$8 sm:$0xf] %vm3_vm0, %v2_v3  }
   0x4   :  { %19 = vrot.lane.b32.xlu1 %v50_v2, %s58_s0 }
   0x6   :  { %13 = vrot.lane.b32.xlu0 %v49_v1, %s59_s15 }
  0x74   :  { %v8_v4 = vpop.permute.xlu0 %7  }
  0x75   :  { %10 = vst.msk [vmem:[#allocation0] ss:$8 sm:$0xf] %vm9_vm1, %v8_v4  }
  0x76   :  { %v20_v5 = vpop.permute.xlu1 %19  }
  0x78   :  { %v14_v6 = vpop.permute.xlu0 %13  }
  0x79   :  { %16 = vst.msk [vmem:[#allocation0] ss:$8 sm:$0xf] %vm15_vm2, %v14_v6  }
  0x7a   :  { %22 = vst.msk [vmem:[#allocation0] ss:$8 sm:$0xf] %vm21_vm3, %v20_v5  }
  0x81   :  { %v26_v7 = vld [vmem:[#allocation0] sm:$0x1]  ;;  %v30_v8 = vld [vmem:[#allocation0 + $0x8] sm:$0x1]  ;;  %v35_v9 = vld [vmem:[#allocation0 + $0x10] sm:$0x1] }
  0x82   :  { %28 = vst [vmem:[%s95_s1] sm:$0x1] %v26_v7  ;;  %51 = vst [vmem:[%s95_s1 + $0x1] sm:$0x1] %v30_v8  ;;  %v41_v10 = vld [vmem:[#allocation0 + $0x18] sm:$0x1] }
  0x83   :  { %52 = vst [vmem:[%s95_s1 + $0x2] sm:$0x1] %v35_v9  ;;  %53 = vst [vmem:[%s95_s1 + $0x3] sm:$0x1] %v41_v10 }

// kernel: resblock_pallas.1
= control target key start
LH: loop header
LB: loop body
LE: loop exit
PB: predicated region body
PF: predicated region fallthrough
CT: control target
= control target key end

     0   :  { %s8351_s18 = smov 0   ;;  %s10961_s0 = inlined_call_operand.vmem [shape: f32[32,512], index: 0, kind: input, shape index: {}]   ;;  %s10962_s1 = inlined_call_operand.vmem [shape: bf16[1536,512], index: 1, kind: input, shape index: {}]   ;;  %s10963_s2 = inlined_call_operand.vmem [shape: f32[1,512], index: 2, kind: input, shape index: {}]   ;;  %s10964_s3 = inlined_call_operand.vmem [shape: bf16[1536,512], index: 3, kind: input, shape index: {}]   ;;  %s10965_s4 = inlined_call_operand.vmem [shape: f32[1,512], index: 4, kind: input, shape index: {}]   ;;  %s10966_s5 = inlined_call_operand.vmem [shape: f32[32,512], index: 5, kind: output, shape index: {}]  }
   0x1 LB: > { %s6160_s19 = sadd.s32 4294967295, %s8318_s18   ;;  %p6164_p0 = scmp.ge.s32.totalorder %s8318_s18, 1  ;;  %s8318_s18 = sphi %s8351_s18, %s15_s18  }
   0x2   : > { %p189_p1 = scmp.lt.s32.totalorder %s8318_s18, 3 }
   0x4   : > { %p190_p2 = pnand %p6164_p0, %p189_p1 }
   0x5   : > { %v7144_v0 = vld [vmem:[%s10962_s1 + $0x4] ss:$16 sps:$4 sm:$0xff] (!%p190_p2)   ;;  %v7146_v1 = vld [vmem:[%s10962_s1 + $0xc] ss:$16 sps:$4 sm:$0xff] (!%p190_p2)   ;;  %v7148_v2 = vld [vmem:[%s10962_s1] ss:$16 sps:$4 sm:$0xff] (!%p190_p2)   ;;  %v233_v36 = vlaneseq (!%p190_p2) }
   0x6   : > { %193 = sbr.rel (%p190_p2) target bundleno = 1159 (0x487), region = 40  ;;  %2660 = vmatprep.subr.bf16.mxu0 (!%p190_p2), %v7144_v0  ;;  %v7149_v3 = vld [vmem:[%s10962_s1 + $0x8] ss:$16 sps:$4 sm:$0xff] (!%p190_p2)   ;;  %2918 = vmatprep.subr.bf16.mxu1 (!%p190_p2), %v7146_v1  ;;  %v7150_v4 = vld [vmem:[%s10962_s1 + $0x24] ss:$16 sps:$4 sm:$0xff] (!%p190_p2)   ;;  %s6165_s9 = sshll.u32 (!%p190_p2), %s6160_s19, 1 }
   0x7   : > { %2661 = vmatpush1.bf16.msra.mxu0 (!%p190_p2), %v7148_v2  ;;  %2919 = vmatpush1.bf16.msra.mxu1 (!%p190_p2), %v7149_v3  ;;  %v7152_v5 = vld [vmem:[%s10962_s1 + $0x2c] ss:$16 sps:$4 sm:$0xff] (!%p190_p2)   ;;  %v7154_v6 = vld [vmem:[%s10962_s1 + $0x20] ss:$16 sps:$4 sm:$0xff] (!%p190_p2)   ;;  %v7155_v7 = vld [vmem:[%s10962_s1 + $0x28] ss:$16 sps:$4 sm:$0xff] (!%p190_p2)  }
   0x8   : > { %2662 = vmatprep.subr.bf16.mxu0 (!%p190_p2), %v7150_v4  ;;  %2920 = vmatprep.subr.bf16.mxu1 (!%p190_p2), %v7152_v5  ;;  %v7156_v8 = vld [vmem:[%s10962_s1 + $0x44] ss:$16 sps:$4 sm:$0xff] (!%p190_p2)   ;;  %v7158_v9 = vld [vmem:[%s10962_s1 + $0x4c] ss:$16 sps:$4 sm:$0xff] (!%p190_p2)   ;;  %v7160_v10 = vld [vmem:[%s10962_s1 + $0x40] ss:$16 sps:$4 sm:$0xff] (!%p190_p2)  }
   0x9   : > { %v7161_v11 = vld [vmem:[%s10962_s1 + $0x48] ss:$16 sps:$4 sm:$0xff] (!%p190_p2)   ;;  %v7162_v12 = vld [vmem:[%s10962_s1 + $0x64] ss:$16 sps:$4 sm:$0xff] (!%p190_p2)   ;;  %v7164_v13 = vld [vmem:[%s10962_s1 + $0x6c] ss:$16 sps:$4 sm:$0xff] (!%p190_p2)  }
   0xa   : > { %v7166_v14 = vld [vmem:[%s10962_s1 + $0x60] ss:$16 sps:$4 sm:$0xff] (!%p190_p2)   ;;  %v7167_v15 = vld [vmem:[%s10962_s1 + $0x68] ss:$16 sps:$4 sm:$0xff] (!%p190_p2)   ;;  %v7168_v16 = vld [vmem:[%s10962_s1 + $0x84] ss:$16 sps:$4 sm:$0xff] (!%p190_p2)  }
   0xb   : > { %2663 = vmatpush1.bf16.msra.mxu0 (!%p190_p2), %v7154_v6  ;;  %2921 = vmatpush1.bf16.msra.mxu1 (!%p190_p2), %v7155_v7  ;;  %v7170_v17 = vld [vmem:[%s10962_s1 + $0x8c] ss:$16 sps:$4 sm:$0xff] (!%p190_p2)   ;;  %v7172_v18 = vld [vmem:[%s10962_s1 + $0x80] ss:$16 sps:$4 sm:$0xff] (!%p190_p2)   ;;  %v7173_v19 = vld [vmem:[%s10962_s1 + $0x88] ss:$16 sps:$4 sm:$0xff] (!%p190_p2)  }
   0xc   : > { %2664 = vmatprep.subr.bf16.mxu0 (!%p190_p2), %v7156_v8  ;;  %2922 = vmatprep.subr.bf16.mxu1 (!%p190_p2), %v7158_v9  ;;  %v7174_v20 = vld [vmem:[%s10962_s1 + $0xa4] ss:$16 sps:$4 sm:$0xff] (!%p190_p2)   ;;  %v7176_v21 = vld [vmem:[%s10962_s1 + $0xac] ss:$16 sps:$4 sm:$0xff] (!%p190_p2)   ;;  %v7178_v22 = vld [vmem:[%s10962_s1 + $0xa0] ss:$16 sps:$4 sm:$0xff] (!%p190_p2)  }
   0xd   : > { %v7179_v23 = vld [vmem:[%s10962_s1 + $0xa8] ss:$16 sps:$4 sm:$0xff]   ;;  %v7180_v24 = vld [vmem:[%s10962_s1 + $0xc4] ss:$16 sps:$4 sm:$0xff]   ;;  %v7182_v25 = vld [vmem:[%s10962_s1 + $0xcc] ss:$16 sps:$4 sm:$0xff]  }
   0xe   : > { %v7184_v26 = vld [vmem:[%s10962_s1 + $0xc0] ss:$16 sps:$4 sm:$0xff]   ;;  %v7185_v27 = vld [vmem:[%s10962_s1 + $0xc8] ss:$16 sps:$4 sm:$0xff]   ;;  %v7186_v28 = vld [vmem:[%s10962_s1 + $0xe4] ss:$16 sps:$4 sm:$0xff]  }
   0xf   : > { %2665 = vmatpush1.bf16.msra.mxu0 %v7160_v10  ;;  %2923 = vmatpush1.bf16.msra.mxu1 %v7161_v11  ;;  %v7188_v29 = vld [vmem:[%s10962_s1 + $0xec] ss:$16 sps:$4 sm:$0xff]   ;;  %v7190_v30 = vld [vmem:[%s10962_s1 + $0xe0] ss:$16 sps:$4 sm:$0xff]   ;;  %v7191_v31 = vld [vmem:[%s10962_s1 + $0xe8] ss:$16 sps:$4 sm:$0xff]  }
  0x10   : > { %2666 = vmatprep.subr.bf16.mxu0 %v7162_v12  ;;  %2924 = vmatprep.subr.bf16.mxu1 %v7164_v13  ;;  %v7192_v32 = vld [vmem:[%s10962_s1 + $0x104] ss:$16 sps:$4 sm:$0xff]   ;;  %p220_p3 = scmp.lt.s32.totalorder %s6165_s9, 3  ;;  %v7194_v33 = vld [vmem:[%s10962_s1 + $0x10c] ss:$16 sps:$4 sm:$0xff]   ;;  %v8480_v40 = vshrl.u32 %v233_v36, 7 }
  0x11   : > { %v7196_v34 = vld [vmem:[%s10962_s1 + $0x100] ss:$16 sps:$4 sm:$0xff]   ;;  %v7197_v35 = vld [vmem:[%s10962_s1 + $0x108] ss:$16 sps:$4 sm:$0xff]   ;;  %v7198_v37 = vld [vmem:[%s10962_s1 + $0x124] ss:$16 sps:$4 sm:$0xff]  }
  0x12   : > { %s10974_s9 = smov (!%p220_p3, %s6165_s9), 3  ;;  %v7200_v38 = vld [vmem:[%s10962_s1 + $0x12c] ss:$16 sps:$4 sm:$0xff]   ;;  %v7202_v39 = vld [vmem:[%s10962_s1 + $0x120] ss:$16 sps:$4 sm:$0xff]   ;;  %v240_v46 = vand.u32 15, %v8480_v40 }
  0x13   : > { %2667 = vmatpush1.bf16.msra.mxu0 %v7166_v14  ;;  %2925 = vmatpush1.bf16.msra.mxu1 %v7167_v15  ;;  %v7203_v41 = vld [vmem:[%s10962_s1 + $0x128] ss:$16 sps:$4 sm:$0xff]   ;;  %v7204_v42 = vld [vmem:[%s10962_s1 + $0x144] ss:$16 sps:$4 sm:$0xff]   ;;  %s7037_s8 = sshll.u32 %s10974_s9, 5  ;;  %vm280_vm0 = vcmp.lt.s32.totalorder %v8480_v40, 1 }
  0x14   : > { %2668 = vmatprep.subr.bf16.mxu0 %v7168_v16  ;;  %2926 = vmatprep.subr.bf16.mxu1 %v7170_v17  ;;  %v7206_v43 = vld [vmem:[%s10962_s1 + $0x14c] ss:$16 sps:$4 sm:$0xff]   ;;  %v7208_v44 = vld [vmem:[%s10962_s1 + $0x140] ss:$16 sps:$4 sm:$0xff]   ;;  %v7209_v45 = vld [vmem:[%s10962_s1 + $0x148] ss:$16 sps:$4 sm:$0xff]   ;;  %s8503_s19 = scalar_lea.vmem %s10961_s0, %s7037_s8  ;;  %s10940_s25 = scalar_lea.vmem %s10966_s5, %s7037_s8 }
  0x15   : > { %v7210_v47 = vld [vmem:[%s10962_s1 + $0x164] ss:$16 sps:$4 sm:$0xff]   ;;  %v7212_v48 = vld [vmem:[%s10962_s1 + $0x16c] ss:$16 sps:$4 sm:$0xff]   ;;  %v7214_v50 = vld [vmem:[%s10962_s1 + $0x160] ss:$16 sps:$4 sm:$0xff]  }
  0x16   : > { %v8513_v49 = vld [vmem:[%s8503_s19 + $0x8] sm:$0xff]  ;;  %vm8519_vm1 = vcmp.ne.s32.totalorder %v240_v46, 0  ;;  %v7216_v55 = vld [vmem:[%s10962_s1 + $0x184] ss:$16 sps:$4 sm:$0xff]   ;;  %v7220_v58 = vld [vmem:[%s10962_s1 + $0x180] ss:$16 sps:$4 sm:$0xff]  }
  0x17   : > { %2669 = vmatpush1.bf16.msra.mxu0 %v7172_v18  ;;  %2927 = vmatpush1.bf16.msra.mxu1 %v7173_v19  ;;  %v8524_v52 = vld [vmem:[%s8503_s19 + $0x28] sm:$0xff]  ;;  %v273_v53 = vrot.slane %v8513_v49, 7  ;;  %vm8320_vm2 = vmmov 1   ;;  %v7222_v0 = vld [vmem:[%s10962_s1 + $0x1a4] ss:$16 sps:$4 sm:$0xff]   ;;  %vm305_vm4 = vcmp.lt.s32.totalorder %v8480_v40, 7 }
  0x18   : > { %2670 = vmatprep.subr.bf16.mxu0 %v7174_v20  ;;  %2928 = vmatprep.subr.bf16.mxu1 %v7176_v21  ;;  %v7215_v54 = vld [vmem:[%s10962_s1 + $0x168] ss:$16 sps:$4 sm:$0xff]   ;;  %v277_v56 = vrot.slane %v8524_v52, 7  ;;  %v7218_v57 = vld [vmem:[%s10962_s1 + $0x18c] ss:$16 sps:$4 sm:$0xff]   ;;  %vm8547_vm3 = vmpackc.low %vm8320_vm2, %vm8519_vm1 }
  0x19   : > { %v7221_v63 = vld [vmem:[%s10962_s1 + $0x188] ss:$16 sps:$4 sm:$0xff]   ;;  %v7224_v1 = vld [vmem:[%s10962_s1 + $0x1ac] ss:$16 sps:$4 sm:$0xff]   ;;  %v7226_v2 = vld [vmem:[%s10962_s1 + $0x1a0] ss:$16 sps:$4 sm:$0xff]  }
  0x1a   : > { %v282_v59 = vsel %vm280_vm0, %v273_v53, %v277_v56  ;;  %v286_v60 = vsel %vm280_vm0, %v277_v56, %v273_v53  ;;  %v7227_v3 = vld [vmem:[%s10962_s1 + $0x1a8] ss:$16 sps:$4 sm:$0xff]   ;;  %v7228_v4 = vld [vmem:[%s10962_s1 + $0x1c4] ss:$16 sps:$4 sm:$0xff]   ;;  %v7230_v5 = vld [vmem:[%s10962_s1 + $0x1cc] ss:$16 sps:$4 sm:$0xff]  }
  0x1b   : > { %2671 = vmatpush1.bf16.msra.mxu0 %v7178_v22  ;;  %2929 = vmatpush1.bf16.msra.mxu1 %v7179_v23  ;;  %v6556_v62 = vpack.c.bf16 %v282_v59, %v286_v60  ;;  %v8577_v6 = vld [vmem:[%s8503_s19] sm:$0xff]  ;;  %v7233_v9 = vld [vmem:[%s10962_s1 + $0x1c8] ss:$16 sps:$4 sm:$0xff]   ;;  %v7236_v13 = vld [vmem:[%s10962_s1 + $0x1ec] ss:$16 sps:$4 sm:$0xff]  }
  0x1c   : > { %2672 = vmatprep.subr.bf16.mxu0 %v7180_v24  ;;  %2930 = vmatprep.subr.bf16.mxu1 %v7182_v25  ;;  %v8580_v7 = vld [vmem:[%s8503_s19 + $0x20] sm:$0xff]  ;;  %v272_v10 = vrot.slane %v8577_v6, 7  ;;  %v7239_v15 = vld [vmem:[%s10962_s1 + $0x1e8] ss:$16 sps:$4 sm:$0xff]   ;;  %v7245_v19 = vld [vmem:[%s10962_s1 + $0x20c] ss:$16 sps:$4 sm:$0xff]  }
  0x1d   : > { %6557 = vmatprep.mubr.msk.bf16.mxu0 %vm8547_vm3, %v6556_v62  ;;  %6581 = vmatprep.mubr.msk.bf16.mxu1 %vm8547_vm3, %v6556_v62  ;;  %v7232_v8 = vld [vmem:[%s10962_s1 + $0x1c0] ss:$16 sps:$4 sm:$0xff]   ;;  %v276_v11 = vrot.slane %v8580_v7, 7  ;;  %v7234_v12 = vld [vmem:[%s10962_s1 + $0x1e4] ss:$16 sps:$4 sm:$0xff]  }
  0x1e   : > { %v7238_v14 = vld [vmem:[%s10962_s1 + $0x1e0] ss:$16 sps:$4 sm:$0xff]   ;;  %v7242_v18 = vld [vmem:[%s10962_s1 + $0x204] ss:$16 sps:$4 sm:$0xff]   ;;  %v7243_v22 = vld [vmem:[%s10962_s1 + $0x208] ss:$16 sps:$4 sm:$0xff]  }
  0x1f   : > { %2673 = vmatpush1.bf16.msra.mxu0 %v7184_v26  ;;  %2931 = vmatpush1.bf16.msra.mxu1 %v7185_v27  ;;  %v281_v16 = vsel %vm280_vm0, %v272_v10, %v276_v11  ;;  %v285_v17 = vsel %vm280_vm0, %v276_v11, %v272_v10  ;;  %v7240_v20 = vld [vmem:[%s10962_s1 + $0x200] ss:$16 sps:$4 sm:$0xff]   ;;  %v7248_v23 = vld [vmem:[%s10962_s1 + $0x224] ss:$16 sps:$4 sm:$0xff]   ;;  %v7251_v24 = vld [vmem:[%s10962_s1 + $0x22c] ss:$16 sps:$4 sm:$0xff]  }
  0x20   : > { %2674 = vmatprep.subr.bf16.mxu0 %v7186_v28  ;;  %2932 = vmatprep.subr.bf16.mxu1 %v7188_v29  ;;  %v6559_v21 = vpack.c.bf16 %v281_v16, %v285_v17  ;;  %v7246_v25 = vld [vmem:[%s10962_s1 + $0x220] ss:$16 sps:$4 sm:$0xff]   ;;  %v7249_v26 = vld [vmem:[%s10962_s1 + $0x228] ss:$16 sps:$4 sm:$0xff]   ;;  %v7254_v27 = vld [vmem:[%s10962_s1 + $0x244] ss:$16 sps:$4 sm:$0xff]  }
  0x21   : > { %v7257_v28 = vld [vmem:[%s10962_s1 + $0x24c] ss:$16 sps:$4 sm:$0xff]   ;;  %v7252_v29 = vld [vmem:[%s10962_s1 + $0x240] ss:$16 sps:$4 sm:$0xff]   ;;  %v7285_v60 = vld [vmem:[%s10962_s1 + $0x2e8] ss:$16 sps:$4 sm:$0xff]  }
  0x22   : > { %v7269_v36 = vld [vmem:[%s10962_s1 + $0x28c] ss:$16 sps:$4 sm:$0xff]   ;;  %v7276_v46 = vld [vmem:[%s10962_s1 + $0x2c0] ss:$16 sps:$4 sm:$0xff]   ;;  %v7290_v62 = vld [vmem:[%s10962_s1 + $0x304] ss:$16 sps:$4 sm:$0xff]  }
  0x23   : > { %2675 = vmatpush1.bf16.msra.mxu0 %v7190_v30  ;;  %2933 = vmatpush1.bf16.msra.mxu1 %v7191_v31  ;;  %v7255_v30 = vld [vmem:[%s10962_s1 + $0x248] ss:$16 sps:$4 sm:$0xff]   ;;  %v7260_v31 = vld [vmem:[%s10962_s1 + $0x264] ss:$16 sps:$4 sm:$0xff]   ;;  %v7300_v10 = vld [vmem:[%s10962_s1 + $0x340] ss:$16 sps:$4 sm:$0xff]  }
  0x24   : > { %2676 = vmatprep.subr.bf16.mxu0 %v7192_v32  ;;  %2934 = vmatprep.subr.bf16.mxu1 %v7194_v33  ;;  %v7263_v32 = vld [vmem:[%s10962_s1 + $0x26c] ss:$16 sps:$4 sm:$0xff]   ;;  %v7258_v33 = vld [vmem:[%s10962_s1 + $0x260] ss:$16 sps:$4 sm:$0xff]   ;;  %v7303_v11 = vld [vmem:[%s10962_s1 + $0x348] ss:$16 sps:$4 sm:$0xff]  }
  0x25   : > { %v7314_v16 = vld [vmem:[%s10962_s1 + $0x384] ss:$16 sps:$4 sm:$0xff]   ;;  %v7317_v17 = vld [vmem:[%s10962_s1 + $0x38c] ss:$16 sps:$4 sm:$0xff]  }
  0x26   : > { %v7929_v61 = vld [vmem:[%s10964_s3 + $0x44c] ss:$16 sps:$4 sm:$0xff]  }
  0x27   : > { %2677 = vmatpush1.bf16.msra.mxu0 %v7196_v34  ;;  %2935 = vmatpush1.bf16.msra.mxu1 %v7197_v35  ;;  %v7261_v34 = vld [vmem:[%s10962_s1 + $0x268] ss:$16 sps:$4 sm:$0xff]   ;;  %v7266_v35 = vld [vmem:[%s10962_s1 + $0x284] ss:$16 sps:$4 sm:$0xff]  }
  0x28   : > { %2678 = vmatprep.subr.bf16.mxu0 %v7198_v37  ;;  %2936 = vmatprep.subr.bf16.mxu1 %v7200_v38  ;;  %v7264_v37 = vld [vmem:[%s10962_s1 + $0x280] ss:$16 sps:$4 sm:$0xff]   ;;  %v7267_v38 = vld [vmem:[%s10962_s1 + $0x288] ss:$16 sps:$4 sm:$0xff]  }
  0x2b   : > { %2679 = vmatpush1.bf16.msra.mxu0 %v7202_v39  ;;  %2937 = vmatpush1.bf16.msra.mxu1 %v7203_v41  ;;  %v7272_v39 = vld [vmem:[%s10962_s1 + $0x2a4] ss:$16 sps:$4 sm:$0xff]   ;;  %v7275_v41 = vld [vmem:[%s10962_s1 + $0x2ac] ss:$16 sps:$4 sm:$0xff]  }
  0x2c   : > { %2680 = vmatprep.subr.bf16.mxu0 %v7204_v42  ;;  %2938 = vmatprep.subr.bf16.mxu1 %v7206_v43  ;;  %v7270_v42 = vld [vmem:[%s10962_s1 + $0x2a0] ss:$16 sps:$4 sm:$0xff]   ;;  %v7273_v43 = vld [vmem:[%s10962_s1 + $0x2a8] ss:$16 sps:$4 sm:$0xff]  }
  0x2f   : > { %2681 = vmatpush1.bf16.msra.mxu0 %v7208_v44  ;;  %2939 = vmatpush1.bf16.msra.mxu1 %v7209_v45  ;;  %v7278_v44 = vld [vmem:[%s10962_s1 + $0x2c4] ss:$16 sps:$4 sm:$0xff]   ;;  %v7281_v45 = vld [vmem:[%s10962_s1 + $0x2cc] ss:$16 sps:$4 sm:$0xff]  }
  0x30   : > { %2682 = vmatprep.subr.bf16.mxu0 %v7210_v47  ;;  %2940 = vmatprep.subr.bf16.mxu1 %v7212_v48  ;;  %v8692_v47 = vld [vmem:[%s8503_s19 + $0x18] sm:$0xff] }
  0x31   : > { %v8695_v48 = vld [vmem:[%s8503_s19 + $0x38] sm:$0xff]  ;;  %v275_v51 = vrot.slane %v8692_v47, 7 }
  0x32   : > { %v279_v53 = vrot.slane %v8695_v48, 7 }
  0x33   : > { %2683 = vmatpush1.bf16.msra.mxu0 %v7214_v50  ;;  %2941 = vmatpush1.bf16.msra.mxu1 %v7215_v54  ;;  %v7279_v50 = vld [vmem:[%s10962_s1 + $0x2c8] ss:$16 sps:$4 sm:$0xff]   ;;  %v7284_v54 = vld [vmem:[%s10962_s1 + $0x2e4] ss:$16 sps:$4 sm:$0xff]  }
  0x34   : > { %2684 = vmatprep.subr.bf16.mxu0 %v7216_v55  ;;  %2942 = vmatprep.subr.bf16.mxu1 %v7218_v57  ;;  %v7287_v55 = vld [vmem:[%s10962_s1 + $0x2ec] ss:$16 sps:$4 sm:$0xff]   ;;  %v284_v56 = vsel %vm280_vm0, %v275_v51, %v279_v53  ;;  %v288_v57 = vsel %vm280_vm0, %v279_v53, %v275_v51  ;;  %v7345_v51 = vld [vmem:[%s10962_s1 + $0x428] ss:$16 sps:$4 sm:$0xff]   ;;  %v7348_v53 = vld [vmem:[%s10962_s1 + $0x440] ss:$16 sps:$4 sm:$0xff]  }
  0x35   : > { %v6562_v59 = vpack.c.bf16 %v284_v56, %v288_v57  ;;  %v7359_v56 = vld [vmem:[%s10962_s1 + $0x46c] ss:$16 sps:$4 sm:$0xff]   ;;  %v7354_v57 = vld [vmem:[%s10962_s1 + $0x460] ss:$16 sps:$4 sm:$0xff]  }
  0x37   : > { %2685 = vmatpush1.bf16.msra.mxu0 %v7220_v58  ;;  %2943 = vmatpush1.bf16.msra.mxu1 %v7221_v63  ;;  %v7282_v58 = vld [vmem:[%s10962_s1 + $0x2e0] ss:$16 sps:$4 sm:$0xff]   ;;  %v7293_v63 = vld [vmem:[%s10962_s1 + $0x30c] ss:$16 sps:$4 sm:$0xff]  }
  0x38   : > { %2686 = vmatprep.subr.bf16.mxu0 %v7222_v0  ;;  %2944 = vmatprep.subr.bf16.mxu1 %v7224_v1  ;;  %v7288_v0 = vld [vmem:[%s10962_s1 + $0x300] ss:$16 sps:$4 sm:$0xff]   ;;  %v7291_v1 = vld [vmem:[%s10962_s1 + $0x308] ss:$16 sps:$4 sm:$0xff]  }
  0x3b   : > { %2687 = vmatpush1.bf16.msra.mxu0 %v7226_v2  ;;  %2945 = vmatpush1.bf16.msra.mxu1 %v7227_v3  ;;  %v7296_v2 = vld [vmem:[%s10962_s1 + $0x324] ss:$16 sps:$4 sm:$0xff]   ;;  %v7299_v3 = vld [vmem:[%s10962_s1 + $0x32c] ss:$16 sps:$4 sm:$0xff]  }
  0x3c   : > { %2688 = vmatprep.subr.bf16.mxu0 %v7228_v4  ;;  %2946 = vmatprep.subr.bf16.mxu1 %v7230_v5  ;;  %v7294_v4 = vld [vmem:[%s10962_s1 + $0x320] ss:$16 sps:$4 sm:$0xff]   ;;  %v7297_v5 = vld [vmem:[%s10962_s1 + $0x328] ss:$16 sps:$4 sm:$0xff]  }
  0x3f   : > { %2689 = vmatpush1.bf16.msra.mxu0 %v7232_v8  ;;  %2947 = vmatpush1.bf16.msra.mxu1 %v7233_v9  ;;  %v7302_v8 = vld [vmem:[%s10962_s1 + $0x344] ss:$16 sps:$4 sm:$0xff]   ;;  %v7305_v9 = vld [vmem:[%s10962_s1 + $0x34c] ss:$16 sps:$4 sm:$0xff]  }
  0x40   : > { %2690 = vmatprep.subr.bf16.mxu0 %v7234_v12  ;;  %2948 = vmatprep.subr.bf16.mxu1 %v7236_v13  ;;  %v7308_v12 = vld [vmem:[%s10962_s1 + $0x364] ss:$16 sps:$4 sm:$0xff]   ;;  %v7311_v13 = vld [vmem:[%s10962_s1 + $0x36c] ss:$16 sps:$4 sm:$0xff]  }
  0x43   : > { %2691 = vmatpush1.bf16.msra.mxu0 %v7238_v14  ;;  %2949 = vmatpush1.bf16.msra.mxu1 %v7239_v15  ;;  %v7306_v14 = vld [vmem:[%s10962_s1 + $0x360] ss:$16 sps:$4 sm:$0xff]   ;;  %v7309_v15 = vld [vmem:[%s10962_s1 + $0x368] ss:$16 sps:$4 sm:$0xff]  }
  0x44   : > { %2703 = vmatprep.subr.bf16.mxu0 %v7242_v18  ;;  %2961 = vmatprep.subr.bf16.mxu1 %v7245_v19  ;;  %v7312_v18 = vld [vmem:[%s10962_s1 + $0x380] ss:$16 sps:$4 sm:$0xff]   ;;  %v7315_v19 = vld [vmem:[%s10962_s1 + $0x388] ss:$16 sps:$4 sm:$0xff]  }
  0x46   : > { %6560 = vmatmul.mubr.msk.bf16.vlgmr.msra.gmra.mrb[0].mxu0 %vm8547_vm3, %v6559_v21  ;;  %6584 = vmatmul.mubr.msk.bf16.vlgmr.msra.gmra.mrb[0].mxu1 %vm8547_vm3, %v6559_v21  ;;  %v7323_v21 = vld [vmem:[%s10962_s1 + $0x3ac] ss:$16 sps:$4 sm:$0xff]  }
  0x47   : > { %2704 = vmatpush1.bf16.msra.mxu0 %v7240_v20  ;;  %2962 = vmatpush1.bf16.msra.mxu1 %v7243_v22  ;;  %v7320_v20 = vld [vmem:[%s10962_s1 + $0x3a4] ss:$16 sps:$4 sm:$0xff]   ;;  %v7318_v22 = vld [vmem:[%s10962_s1 + $0x3a0] ss:$16 sps:$4 sm:$0xff]  }
  0x48   : > { %2705 = vmatprep.subr.bf16.mxu0 %v7248_v23  ;;  %2963 = vmatprep.subr.bf16.mxu1 %v7251_v24  ;;  %v7321_v23 = vld [vmem:[%s10962_s1 + $0x3a8] ss:$16 sps:$4 sm:$0xff]   ;;  %v7326_v24 = vld [vmem:[%s10962_s1 + $0x3c4] ss:$16 sps:$4 sm:$0xff]  }
  0x49   : > { %6563 = vmatprep.mubr.msk.bf16.mxu0 %vm8547_vm3, %v6562_v59  ;;  %6587 = vmatprep.mubr.msk.bf16.mxu1 %vm8547_vm3, %v6562_v59  ;;  %v7362_v59 = vld [vmem:[%s10962_s1 + $0x484] ss:$16 sps:$4 sm:$0xff]  }
  0x4b   : > { %2706 = vmatpush1.bf16.msra.mxu0 %v7246_v25  ;;  %2964 = vmatpush1.bf16.msra.mxu1 %v7249_v26  ;;  %v7329_v25 = vld [vmem:[%s10962_s1 + $0x3cc] ss:$16 sps:$4 sm:$0xff]   ;;  %v8801_v26 = vld [vmem:[%s8503_s19 + $0x10] sm:$0xff] }
  0x4c   : > { %2707 = vmatprep.subr.bf16.mxu0 %v7254_v27  ;;  %2965 = vmatprep.subr.bf16.mxu1 %v7257_v28  ;;  %v8804_v27 = vld [vmem:[%s8503_s19 + $0x30] sm:$0xff] }
  0x4d   : > { %v7324_v28 = vld [vmem:[%s10962_s1 + $0x3c0] ss:$16 sps:$4 sm:$0xff]  }
  0x4f   : > { %2708 = vmatpush1.bf16.msra.mxu0 %v7252_v29  ;;  %2966 = vmatpush1.bf16.msra.mxu1 %v7255_v30  ;;  %v7327_v29 = vld [vmem:[%s10962_s1 + $0x3c8] ss:$16 sps:$4 sm:$0xff]   ;;  %v274_v30 = vrot.slane %v8801_v26, 7 }
  0x50   : > { %2709 = vmatprep.subr.bf16.mxu0 %v7260_v31  ;;  %2967 = vmatprep.subr.bf16.mxu1 %v7263_v32  ;;  %v278_v31 = vrot.slane %v8804_v27, 7  ;;  %v7332_v32 = vld [vmem:[%s10962_s1 + $0x3e4] ss:$16 sps:$4 sm:$0xff]  }
  0x53   : > { %2710 = vmatpush1.bf16.msra.mxu0 %v7258_v33  ;;  %2968 = vmatpush1.bf16.msra.mxu1 %v7261_v34  ;;  %v7335_v33 = vld [vmem:[%s10962_s1 + $0x3ec] ss:$16 sps:$4 sm:$0xff]   ;;  %v7330_v34 = vld [vmem:[%s10962_s1 + $0x3e0] ss:$16 sps:$4 sm:$0xff]  }
  0x54   : > { %2711 = vmatprep.subr.bf16.mxu0 %v7266_v35  ;;  %2969 = vmatprep.subr.bf16.mxu1 %v7269_v36  ;;  %v7333_v35 = vld [vmem:[%s10962_s1 + $0x3e8] ss:$16 sps:$4 sm:$0xff]   ;;  %v283_v36 = vsel %vm280_vm0, %v274_v30, %v278_v31 }
  0x57   : > { %2712 = vmatpush1.bf16.msra.mxu0 %v7264_v37  ;;  %2970 = vmatpush1.bf16.msra.mxu1 %v7267_v38  ;;  %v287_v37 = vsel %vm280_vm0, %v278_v31, %v274_v30  ;;  %v7338_v38 = vld [vmem:[%s10962_s1 + $0x404] ss:$16 sps:$4 sm:$0xff]   ;;  %v7402_v30 = vld [vmem:[%s10962_s1 + $0x560] ss:$16 sps:$4 sm:$0xff]   ;;  %v7405_v31 = vld [vmem:[%s10962_s1 + $0x568] ss:$16 sps:$4 sm:$0xff]  }
  0x58   : > { %2713 = vmatprep.subr.bf16.mxu0 %v7272_v39  ;;  %2971 = vmatprep.subr.bf16.mxu1 %v7275_v41  ;;  %v7341_v39 = vld [vmem:[%s10962_s1 + $0x40c] ss:$16 sps:$4 sm:$0xff]   ;;  %v7336_v41 = vld [vmem:[%s10962_s1 + $0x400] ss:$16 sps:$4 sm:$0xff]  }
  0x5b   : > { %2714 = vmatpush1.bf16.msra.mxu0 %v7270_v42  ;;  %2972 = vmatpush1.bf16.msra.mxu1 %v7273_v43  ;;  %v6565_v42 = vpack.c.bf16 %v283_v36, %v287_v37  ;;  %v7339_v43 = vld [vmem:[%s10962_s1 + $0x408] ss:$16 sps:$4 sm:$0xff]   ;;  %v7416_v36 = vld [vmem:[%s10962_s1 + $0x5a4] ss:$16 sps:$4 sm:$0xff]   ;;  %v7419_v37 = vld [vmem:[%s10962_s1 + $0x5ac] ss:$16 sps:$4 sm:$0xff]  }
  0x5c   : > { %2715 = vmatprep.subr.bf16.mxu0 %v7278_v44  ;;  %2973 = vmatprep.subr.bf16.mxu1 %v7281_v45  ;;  %v7344_v44 = vld [vmem:[%s10962_s1 + $0x424] ss:$16 sps:$4 sm:$0xff]   ;;  %v7347_v45 = vld [vmem:[%s10962_s1 + $0x42c] ss:$16 sps:$4 sm:$0xff]  }
  0x5f   : > { %2716 = vmatpush1.bf16.msra.mxu0 %v7276_v46  ;;  %2974 = vmatpush1.bf16.msra.mxu1 %v7279_v50  ;;  %v327_v46 = vpack.c.bf16 %v8524_v52, %v8513_v49  ;;  %v7342_v50 = vld [vmem:[%s10962_s1 + $0x420] ss:$16 sps:$4 sm:$0xff]   ;;  %v7350_v49 = vld [vmem:[%s10962_s1 + $0x444] ss:$16 sps:$4 sm:$0xff]   ;;  %v7353_v52 = vld [vmem:[%s10962_s1 + $0x44c] ss:$16 sps:$4 sm:$0xff]  }
  0x60   : > { %2717 = vmatprep.subr.bf16.mxu0 %v7284_v54  ;;  %2975 = vmatprep.subr.bf16.mxu1 %v7287_v55  ;;  %v7351_v54 = vld [vmem:[%s10962_s1 + $0x448] ss:$16 sps:$4 sm:$0xff]   ;;  %v7356_v55 = vld [vmem:[%s10962_s1 + $0x464] ss:$16 sps:$4 sm:$0xff]  }
  0x63   : > { %2718 = vmatpush1.bf16.msra.mxu0 %v7282_v58  ;;  %2976 = vmatpush1.bf16.msra.mxu1 %v7285_v60  ;;  %v7357_v58 = vld [vmem:[%s10962_s1 + $0x468] ss:$16 sps:$4 sm:$0xff]   ;;  %v7365_v60 = vld [vmem:[%s10962_s1 + $0x48c] ss:$16 sps:$4 sm:$0xff]  }
  0x64   : > { %2719 = vmatprep.subr.bf16.mxu0 %v7290_v62  ;;  %2977 = vmatprep.subr.bf16.mxu1 %v7293_v63  ;;  %v7360_v62 = vld [vmem:[%s10962_s1 + $0x480] ss:$16 sps:$4 sm:$0xff]   ;;  %v7363_v63 = vld [vmem:[%s10962_s1 + $0x488] ss:$16 sps:$4 sm:$0xff]  }
  0x67   : > { %2720 = vmatpush1.bf16.msra.mxu0 %v7288_v0  ;;  %2978 = vmatpush1.bf16.msra.mxu1 %v7291_v1  ;;  %v7368_v0 = vld [vmem:[%s10962_s1 + $0x4a4] ss:$16 sps:$4 sm:$0xff]   ;;  %v7371_v1 = vld [vmem:[%s10962_s1 + $0x4ac] ss:$16 sps:$4 sm:$0xff]  }
  0x68   : > { %2721 = vmatprep.subr.bf16.mxu0 %v7296_v2  ;;  %2979 = vmatprep.subr.bf16.mxu1 %v7299_v3  ;;  %v7366_v2 = vld [vmem:[%s10962_s1 + $0x4a0] ss:$16 sps:$4 sm:$0xff]   ;;  %v7369_v3 = vld [vmem:[%s10962_s1 + $0x4a8] ss:$16 sps:$4 sm:$0xff]  }
  0x6b   : > { %2722 = vmatpush1.bf16.msra.mxu0 %v7294_v4  ;;  %2980 = vmatpush1.bf16.msra.mxu1 %v7297_v5  ;;  %v7374_v4 = vld [vmem:[%s10962_s1 + $0x4c4] ss:$16 sps:$4 sm:$0xff]   ;;  %v7377_v5 = vld [vmem:[%s10962_s1 + $0x4cc] ss:$16 sps:$4 sm:$0xff]  }
  0x6c   : > { %2723 = vmatprep.subr.bf16.mxu0 %v7302_v8  ;;  %2981 = vmatprep.subr.bf16.mxu1 %v7305_v9  ;;  %v7372_v8 = vld [vmem:[%s10962_s1 + $0x4c0] ss:$16 sps:$4 sm:$0xff]   ;;  %v7375_v9 = vld [vmem:[%s10962_s1 + $0x4c8] ss:$16 sps:$4 sm:$0xff]  }
  0x6f   : > { %2724 = vmatpush1.bf16.msra.mxu0 %v7300_v10  ;;  %2982 = vmatpush1.bf16.msra.mxu1 %v7303_v11  ;;  %v7380_v10 = vld [vmem:[%s10962_s1 + $0x4e4] ss:$16 sps:$4 sm:$0xff]   ;;  %v7383_v11 = vld [vmem:[%s10962_s1 + $0x4ec] ss:$16 sps:$4 sm:$0xff]  }
  0x70   : > { %2725 = vmatprep.subr.bf16.mxu0 %v7308_v12  ;;  %2983 = vmatprep.subr.bf16.mxu1 %v7311_v13  ;;  %v7378_v12 = vld [vmem:[%s10962_s1 + $0x4e0] ss:$16 sps:$4 sm:$0xff]   ;;  %v7381_v13 = vld [vmem:[%s10962_s1 + $0x4e8] ss:$16 sps:$4 sm:$0xff]  }
  0x73   : > { %2726 = vmatpush1.bf16.msra.mxu0 %v7306_v14  ;;  %2984 = vmatpush1.bf16.msra.mxu1 %v7309_v15  ;;  %v7386_v14 = vld [vmem:[%s10962_s1 + $0x504] ss:$16 sps:$4 sm:$0xff]   ;;  %v7389_v15 = vld [vmem:[%s10962_s1 + $0x50c] ss:$16 sps:$4 sm:$0xff]  }
  0x74   : > { %2727 = vmatprep.subr.bf16.mxu0 %v7314_v16  ;;  %2985 = vmatprep.subr.bf16.mxu1 %v7317_v17  ;;  %v7384_v16 = vld [vmem:[%s10962_s1 + $0x500] ss:$16 sps:$4 sm:$0xff]   ;;  %v7387_v17 = vld [vmem:[%s10962_s1 + $0x508] ss:$16 sps:$4 sm:$0xff]  }
  0x77   : > { %2728 = vmatpush1.bf16.msra.mxu0 %v7312_v18  ;;  %2986 = vmatpush1.bf16.msra.mxu1 %v7315_v19  ;;  %v7392_v18 = vld [vmem:[%s10962_s1 + $0x524] ss:$16 sps:$4 sm:$0xff]   ;;  %v7395_v19 = vld [vmem:[%s10962_s1 + $0x52c] ss:$16 sps:$4 sm:$0xff]  }
  0x78   : > { %2729 = vmatprep.subr.bf16.mxu0 %v7320_v20  ;;  %2987 = vmatprep.subr.bf16.mxu1 %v7323_v21  ;;  %v7390_v20 = vld [vmem:[%s10962_s1 + $0x520] ss:$16 sps:$4 sm:$0xff]   ;;  %v7393_v21 = vld [vmem:[%s10962_s1 + $0x528] ss:$16 sps:$4 sm:$0xff]  }
  0x7b   : > { %2730 = vmatpush1.bf16.msra.mxu0 %v7318_v22  ;;  %2988 = vmatpush1.bf16.msra.mxu1 %v7321_v23  ;;  %v7398_v22 = vld [vmem:[%s10962_s1 + $0x544] ss:$16 sps:$4 sm:$0xff]   ;;  %v7401_v23 = vld [vmem:[%s10962_s1 + $0x54c] ss:$16 sps:$4 sm:$0xff]  }
  0x7c   : > { %2731 = vmatprep.subr.bf16.mxu0 %v7326_v24  ;;  %2989 = vmatprep.subr.bf16.mxu1 %v7329_v25  ;;  %v7396_v24 = vld [vmem:[%s10962_s1 + $0x540] ss:$16 sps:$4 sm:$0xff]   ;;  %v7399_v25 = vld [vmem:[%s10962_s1 + $0x548] ss:$16 sps:$4 sm:$0xff]  }
  0x7f   : > { %2732 = vmatpush1.bf16.msra.mxu0 %v7324_v28  ;;  %2990 = vmatpush1.bf16.msra.mxu1 %v7327_v29  ;;  %v7404_v28 = vld [vmem:[%s10962_s1 + $0x564] ss:$16 sps:$4 sm:$0xff]   ;;  %v7407_v29 = vld [vmem:[%s10962_s1 + $0x56c] ss:$16 sps:$4 sm:$0xff]  }
  0x80   : > { %2733 = vmatprep.subr.bf16.mxu0 %v7332_v32  ;;  %2991 = vmatprep.subr.bf16.mxu1 %v7335_v33  ;;  %v7410_v32 = vld [vmem:[%s10962_s1 + $0x584] ss:$16 sps:$4 sm:$0xff]   ;;  %v7413_v33 = vld [vmem:[%s10962_s1 + $0x58c] ss:$16 sps:$4 sm:$0xff]  }
  0x83   : > { %2734 = vmatpush1.bf16.msra.mxu0 %v7330_v34  ;;  %2992 = vmatpush1.bf16.msra.mxu1 %v7333_v35  ;;  %v7408_v34 = vld [vmem:[%s10962_s1 + $0x580] ss:$16 sps:$4 sm:$0xff]   ;;  %v7411_v35 = vld [vmem:[%s10962_s1 + $0x588] ss:$16 sps:$4 sm:$0xff]  }
  0x84   : > { %2746 = vmatprep.subr.bf16.mxu0 %v7338_v38  ;;  %3004 = vmatprep.subr.bf16.mxu1 %v7341_v39  ;;  %v7414_v38 = vld [vmem:[%s10962_s1 + $0x5a0] ss:$16 sps:$4 sm:$0xff]   ;;  %v7417_v39 = vld [vmem:[%s10962_s1 + $0x5a8] ss:$16 sps:$4 sm:$0xff]  }
  0x86   : > { %6566 = vmatmul.mubr.msk.bf16.vlgmr.msra.gmra.mrb[0].mxu0 %vm8547_vm3, %v6565_v42  ;;  %6590 = vmatmul.mubr.msk.bf16.vlgmr.msra.gmra.mrb[0].mxu1 %vm8547_vm3, %v6565_v42  ;;  %v7425_v42 = vld [vmem:[%s10962_s1 + $0x5cc] ss:$16 sps:$4 sm:$0xff]  }
  0x87   : > { %2747 = vmatpush1.bf16.msra.mxu0 %v7336_v41  ;;  %3005 = vmatpush1.bf16.msra.mxu1 %v7339_v43  ;;  %v7422_v41 = vld [vmem:[%s10962_s1 + $0x5c4] ss:$16 sps:$4 sm:$0xff]   ;;  %v7420_v43 = vld [vmem:[%s10962_s1 + $0x5c0] ss:$16 sps:$4 sm:$0xff]  }
  0x88   : > { %2748 = vmatprep.subr.bf16.mxu0 %v7344_v44  ;;  %3006 = vmatprep.subr.bf16.mxu1 %v7347_v45  ;;  %v7423_v44 = vld [vmem:[%s10962_s1 + $0x5c8] ss:$16 sps:$4 sm:$0xff]   ;;  %v7428_v45 = vld [vmem:[%s10962_s1 + $0x5e4] ss:$16 sps:$4 sm:$0xff]  }
  0x89   : > { %2778 = vmatprep.mubr.bf16.mxu0 %v327_v46  ;;  %3036 = vmatprep.mubr.bf16.mxu1 %v327_v46  ;;  %v7431_v46 = vld [vmem:[%s10962_s1 + $0x5ec] ss:$16 sps:$4 sm:$0xff]  }
  0x8b   : > { %2749 = vmatpush1.bf16.msra.mxu0 %v7342_v50  ;;  %3007 = vmatpush1.bf16.msra.mxu1 %v7345_v51  ;;  %v7426_v50 = vld [vmem:[%s10962_s1 + $0x5e0] ss:$16 sps:$4 sm:$0xff]   ;;  %v7429_v51 = vld [vmem:[%s10962_s1 + $0x5e8] ss:$16 sps:$4 sm:$0xff]  }
  0x8c   : > { %2750 = vmatprep.subr.bf16.mxu0 %v7350_v49  ;;  %3008 = vmatprep.subr.bf16.mxu1 %v7353_v52  ;;  %v7434_v49 = vld [vmem:[%s10962_s1 + $0x604] ss:$16 sps:$4 sm:$0xff]   ;;  %v7437_v52 = vld [vmem:[%s10962_s1 + $0x60c] ss:$16 sps:$4 sm:$0xff]  }
  0x8f   : > { %2751 = vmatpush1.bf16.msra.mxu0 %v7348_v53  ;;  %3009 = vmatpush1.bf16.msra.mxu1 %v7351_v54  ;;  %v7432_v53 = vld [vmem:[%s10962_s1 + $0x600] ss:$16 sps:$4 sm:$0xff]   ;;  %v326_v54 = vpack.c.bf16 %v8580_v7, %v8577_v6  ;;  %v7441_v7 = vld [vmem:[%s10962_s1 + $0x628] ss:$16 sps:$4 sm:$0xff]  }
  0x90   : > { %2752 = vmatprep.subr.bf16.mxu0 %v7356_v55  ;;  %3010 = vmatprep.subr.bf16.mxu1 %v7359_v56  ;;  %v7435_v55 = vld [vmem:[%s10962_s1 + $0x608] ss:$16 sps:$4 sm:$0xff]   ;;  %v7440_v56 = vld [vmem:[%s10962_s1 + $0x624] ss:$16 sps:$4 sm:$0xff]   ;;  %v7438_v6 = vld [vmem:[%s10962_s1 + $0x620] ss:$16 sps:$4 sm:$0xff]  }
  0x93   : > { %2753 = vmatpush1.bf16.msra.mxu0 %v7354_v57  ;;  %3011 = vmatpush1.bf16.msra.mxu1 %v7357_v58  ;;  %v7443_v57 = vld [vmem:[%s10962_s1 + $0x62c] ss:$16 sps:$4 sm:$0xff]   ;;  %v329_v58 = vpack.c.bf16 %v8695_v48, %v8692_v47  ;;  %v7444_v48 = vld [vmem:[%s10962_s1 + $0x640] ss:$16 sps:$4 sm:$0xff]  }
  0x94   : > { %2754 = vmatprep.subr.bf16.mxu0 %v7362_v59  ;;  %3012 = vmatprep.subr.bf16.mxu1 %v7365_v60  ;;  %v7446_v59 = vld [vmem:[%s10962_s1 + $0x644] ss:$16 sps:$4 sm:$0xff]   ;;  %v7449_v47 = vld [vmem:[%s10962_s1 + $0x64c] ss:$16 sps:$4 sm:$0xff]   ;;  %v7447_v60 = vld [vmem:[%s10962_s1 + $0x648] ss:$16 sps:$4 sm:$0xff]  }
  0x97   : > { %2755 = vmatpush1.bf16.msra.mxu0 %v7360_v62  ;;  %3013 = vmatpush1.bf16.msra.mxu1 %v7363_v63  ;;  %v7452_v62 = vld [vmem:[%s10962_s1 + $0x664] ss:$16 sps:$4 sm:$0xff]   ;;  %v7455_v63 = vld [vmem:[%s10962_s1 + $0x66c] ss:$16 sps:$4 sm:$0xff]  }
  0x98   : > { %2756 = vmatprep.subr.bf16.mxu0 %v7368_v0  ;;  %3014 = vmatprep.subr.bf16.mxu1 %v7371_v1  ;;  %v7450_v0 = vld [vmem:[%s10962_s1 + $0x660] ss:$16 sps:$4 sm:$0xff]   ;;  %v7453_v1 = vld [vmem:[%s10962_s1 + $0x668] ss:$16 sps:$4 sm:$0xff]  }
  0x9b   : > { %2757 = vmatpush1.bf16.msra.mxu0 %v7366_v2  ;;  %3015 = vmatpush1.bf16.msra.mxu1 %v7369_v3  ;;  %v7458_v2 = vld [vmem:[%s10962_s1 + $0x684] ss:$16 sps:$4 sm:$0xff]   ;;  %v7461_v3 = vld [vmem:[%s10962_s1 + $0x68c] ss:$16 sps:$4 sm:$0xff]  }
  0x9c   : > { %2758 = vmatprep.subr.bf16.mxu0 %v7374_v4  ;;  %3016 = vmatprep.subr.bf16.mxu1 %v7377_v5  ;;  %v7456_v4 = vld [vmem:[%s10962_s1 + $0x680] ss:$16 sps:$4 sm:$0xff]   ;;  %v7459_v5 = vld [vmem:[%s10962_s1 + $0x688] ss:$16 sps:$4 sm:$0xff]  }
  0x9f   : > { %2759 = vmatpush1.bf16.msra.mxu0 %v7372_v8  ;;  %3017 = vmatpush1.bf16.msra.mxu1 %v7375_v9  ;;  %v7464_v8 = vld [vmem:[%s10962_s1 + $0x6a4] ss:$16 sps:$4 sm:$0xff]   ;;  %v7467_v9 = vld [vmem:[%s10962_s1 + $0x6ac] ss:$16 sps:$4 sm:$0xff]  }
  0xa0   : > { %2760 = vmatprep.subr.bf16.mxu0 %v7380_v10  ;;  %3018 = vmatprep.subr.bf16.mxu1 %v7383_v11  ;;  %v7462_v10 = vld [vmem:[%s10962_s1 + $0x6a0] ss:$16 sps:$4 sm:$0xff]   ;;  %v7465_v11 = vld [vmem:[%s10962_s1 + $0x6a8] ss:$16 sps:$4 sm:$0xff]  }
  0xa3   : > { %2761 = vmatpush1.bf16.msra.mxu0 %v7378_v12  ;;  %3019 = vmatpush1.bf16.msra.mxu1 %v7381_v13  ;;  %v7470_v12 = vld [vmem:[%s10962_s1 + $0x6c4] ss:$16 sps:$4 sm:$0xff]   ;;  %v7473_v13 = vld [vmem:[%s10962_s1 + $0x6cc] ss:$16 sps:$4 sm:$0xff]  }
  0xa4   : > { %2762 = vmatprep.subr.bf16.mxu0 %v7386_v14  ;;  %3020 = vmatprep.subr.bf16.mxu1 %v7389_v15  ;;  %v7468_v14 = vld [vmem:[%s10962_s1 + $0x6c0] ss:$16 sps:$4 sm:$0xff]   ;;  %v7471_v15 = vld [vmem:[%s10962_s1 + $0x6c8] ss:$16 sps:$4 sm:$0xff]  }
  0xa7   : > { %2763 = vmatpush1.bf16.msra.mxu0 %v7384_v16  ;;  %3021 = vmatpush1.bf16.msra.mxu1 %v7387_v17  ;;  %v7476_v16 = vld [vmem:[%s10962_s1 + $0x6e4] ss:$16 sps:$4 sm:$0xff]   ;;  %v7479_v17 = vld [vmem:[%s10962_s1 + $0x6ec] ss:$16 sps:$4 sm:$0xff]  }
  0xa8   : > { %2764 = vmatprep.subr.bf16.mxu0 %v7392_v18  ;;  %3022 = vmatprep.subr.bf16.mxu1 %v7395_v19  ;;  %v7474_v18 = vld [vmem:[%s10962_s1 + $0x6e0] ss:$16 sps:$4 sm:$0xff]   ;;  %v7477_v19 = vld [vmem:[%s10962_s1 + $0x6e8] ss:$16 sps:$4 sm:$0xff]  }
  0xab   : > { %2765 = vmatpush1.bf16.msra.mxu0 %v7390_v20  ;;  %3023 = vmatpush1.bf16.msra.mxu1 %v7393_v21  ;;  %v7482_v20 = vld [vmem:[%s10962_s1 + $0x704] ss:$16 sps:$4 sm:$0xff]   ;;  %v7485_v21 = vld [vmem:[%s10962_s1 + $0x70c] ss:$16 sps:$4 sm:$0xff]  }
  0xac   : > { %2766 = vmatprep.subr.bf16.mxu0 %v7398_v22  ;;  %3024 = vmatprep.subr.bf16.mxu1 %v7401_v23  ;;  %v7480_v22 = vld [vmem:[%s10962_s1 + $0x700] ss:$16 sps:$4 sm:$0xff]   ;;  %v7483_v23 = vld [vmem:[%s10962_s1 + $0x708] ss:$16 sps:$4 sm:$0xff]  }
  0xaf   : > { %2767 = vmatpush1.bf16.msra.mxu0 %v7396_v24  ;;  %3025 = vmatpush1.bf16.msra.mxu1 %v7399_v25  ;;  %v7488_v24 = vld [vmem:[%s10962_s1 + $0x724] ss:$16 sps:$4 sm:$0xff]   ;;  %v7491_v25 = vld [vmem:[%s10962_s1 + $0x72c] ss:$16 sps:$4 sm:$0xff]  }
  0xb0   : > { %2768 = vmatprep.subr.bf16.mxu0 %v7404_v28  ;;  %3026 = vmatprep.subr.bf16.mxu1 %v7407_v29  ;;  %v7486_v28 = vld [vmem:[%s10962_s1 + $0x720] ss:$16 sps:$4 sm:$0xff]   ;;  %v7489_v29 = vld [vmem:[%s10962_s1 + $0x728] ss:$16 sps:$4 sm:$0xff]  }
  0xb3   : > { %2769 = vmatpush1.bf16.msra.mxu0 %v7402_v30  ;;  %3027 = vmatpush1.bf16.msra.mxu1 %v7405_v31  ;;  %v7494_v30 = vld [vmem:[%s10962_s1 + $0x744] ss:$16 sps:$4 sm:$0xff]   ;;  %v7497_v31 = vld [vmem:[%s10962_s1 + $0x74c] ss:$16 sps:$4 sm:$0xff]  }
  0xb4   : > { %2770 = vmatprep.subr.bf16.mxu0 %v7410_v32  ;;  %3028 = vmatprep.subr.bf16.mxu1 %v7413_v33  ;;  %v7492_v32 = vld [vmem:[%s10962_s1 + $0x740] ss:$16 sps:$4 sm:$0xff]   ;;  %v7495_v33 = vld [vmem:[%s10962_s1 + $0x748] ss:$16 sps:$4 sm:$0xff]  }
  0xb7   : > { %2771 = vmatpush1.bf16.msra.mxu0 %v7408_v34  ;;  %3029 = vmatpush1.bf16.msra.mxu1 %v7411_v35  ;;  %v7500_v34 = vld [vmem:[%s10962_s1 + $0x764] ss:$16 sps:$4 sm:$0xff]   ;;  %v7503_v35 = vld [vmem:[%s10962_s1 + $0x76c] ss:$16 sps:$4 sm:$0xff]  }
  0xb8   : > { %2772 = vmatprep.subr.bf16.mxu0 %v7416_v36  ;;  %3030 = vmatprep.subr.bf16.mxu1 %v7419_v37  ;;  %v7498_v36 = vld [vmem:[%s10962_s1 + $0x760] ss:$16 sps:$4 sm:$0xff]   ;;  %v7501_v37 = vld [vmem:[%s10962_s1 + $0x768] ss:$16 sps:$4 sm:$0xff]  }
  0xbb   : > { %2773 = vmatpush1.bf16.msra.mxu0 %v7414_v38  ;;  %3031 = vmatpush1.bf16.msra.mxu1 %v7417_v39  ;;  %v7506_v38 = vld [vmem:[%s10962_s1 + $0x784] ss:$16 sps:$4 sm:$0xff]   ;;  %v7509_v39 = vld [vmem:[%s10962_s1 + $0x78c] ss:$16 sps:$4 sm:$0xff]  }
  0xbc   : > { %2774 = vmatprep.subr.bf16.mxu0 %v7422_v41  ;;  %3032 = vmatprep.subr.bf16.mxu1 %v7425_v42  ;;  %v7504_v41 = vld [vmem:[%s10962_s1 + $0x780] ss:$16 sps:$4 sm:$0xff]   ;;  %v7507_v42 = vld [vmem:[%s10962_s1 + $0x788] ss:$16 sps:$4 sm:$0xff]  }
  0xbf   : > { %2775 = vmatpush1.bf16.msra.mxu0 %v7420_v43  ;;  %3033 = vmatpush1.bf16.msra.mxu1 %v7423_v44  ;;  %v7512_v43 = vld [vmem:[%s10962_s1 + $0x7a4] ss:$16 sps:$4 sm:$0xff]   ;;  %v7515_v44 = vld [vmem:[%s10962_s1 + $0x7ac] ss:$16 sps:$4 sm:$0xff]  }
  0xc0   : > { %2776 = vmatprep.subr.bf16.mxu0 %v7428_v45  ;;  %3034 = vmatprep.subr.bf16.mxu1 %v7431_v46  ;;  %v7510_v45 = vld [vmem:[%s10962_s1 + $0x7a0] ss:$16 sps:$4 sm:$0xff]   ;;  %v7513_v46 = vld [vmem:[%s10962_s1 + $0x7a8] ss:$16 sps:$4 sm:$0xff]  }
  0xc3   : > { %2777 = vmatpush1.bf16.msra.mxu0 %v7426_v50  ;;  %3035 = vmatpush1.bf16.msra.mxu1 %v7429_v51  ;;  %v7518_v50 = vld [vmem:[%s10962_s1 + $0x7c4] ss:$16 sps:$4 sm:$0xff]   ;;  %v7521_v51 = vld [vmem:[%s10962_s1 + $0x7cc] ss:$16 sps:$4 sm:$0xff]  }
  0xc4   : > { %2789 = vmatprep.subr.bf16.mxu0 %v7434_v49  ;;  %3047 = vmatprep.subr.bf16.mxu1 %v7437_v52  ;;  %v7516_v49 = vld [vmem:[%s10962_s1 + $0x7c0] ss:$16 sps:$4 sm:$0xff]   ;;  %v7519_v52 = vld [vmem:[%s10962_s1 + $0x7c8] ss:$16 sps:$4 sm:$0xff]  }
  0xc6   : > { %2779 = vmatmul.mubr.bf16.vlgmr.msra.gmra.mrb[0].mxu0 %v326_v54  ;;  %3037 = vmatmul.mubr.bf16.vlgmr.msra.gmra.mrb[0].mxu1 %v326_v54  ;;  %v7524_v54 = vld [vmem:[%s10962_s1 + $0x7e4] ss:$16 sps:$4 sm:$0xff]  }
  0xc7   : > { %2790 = vmatpush1.bf16.msra.mxu0 %v7432_v53  ;;  %3048 = vmatpush1.bf16.msra.mxu1 %v7435_v55  ;;  %v235_v53 = vadd.s32 8, %v8480_v40  ;;  %v7527_v55 = vld [vmem:[%s10962_s1 + $0x7ec] ss:$16 sps:$4 sm:$0xff]  }
  0xc8   : > { %2791 = vmatprep.subr.bf16.mxu0 %v7440_v56  ;;  %3049 = vmatprep.subr.bf16.mxu1 %v7443_v57  ;;  %v7522_v56 = vld [vmem:[%s10962_s1 + $0x7e0] ss:$16 sps:$4 sm:$0xff]   ;;  %v8296_v57 = vld [vmem:[%s8503_s19 + $0x8] sm:$0xff] }
  0xc9   : > { %2821 = vmatprep.mubr.bf16.mxu0 %v329_v58  ;;  %3079 = vmatprep.mubr.bf16.mxu1 %v329_v58  ;;  %v298_v58 = vrot.slane %v8296_v57, 1  ;;  %v7603_v57 = vld [vmem:[%s10962_s1 + $0x988] ss:$16 sps:$4 sm:$0xff]  }
  0xcb   : > { %2792 = vmatpush1.bf16.msra.mxu0 %v7438_v6  ;;  %3050 = vmatpush1.bf16.msra.mxu1 %v7441_v7  ;;  %v8297_v6 = vld [vmem:[%s8503_s19 + $0x28] sm:$0xff] }
  0xcc   : > { %2793 = vmatprep.subr.bf16.mxu0 %v7446_v59  ;;  %3051 = vmatprep.subr.bf16.mxu1 %v7449_v47  ;;  %v302_v7 = vrot.slane %v8297_v6, 1  ;;  %v7525_v59 = vld [vmem:[%s10962_s1 + $0x7e8] ss:$16 sps:$4 sm:$0xff]   ;;  %v247_v47 = vand.u32 15, %v235_v53  ;;  %v7611_v6 = vld [vmem:[%s10962_s1 + $0x9ac] ss:$16 sps:$4 sm:$0xff]  }
  0xcd   : > { %v7597_v53 = vld [vmem:[%s10962_s1 + $0x968] ss:$16 sps:$4 sm:$0xff]  }
  0xce   : > { %vm263_vm5 = vcmp.ne.s32.totalorder %v247_v47, 15  ;;  %v7614_v47 = vld [vmem:[%s10962_s1 + $0x9c4] ss:$16 sps:$4 sm:$0xff]  }
  0xcf   : > { %2794 = vmatpush1.bf16.msra.mxu0 %v7444_v48  ;;  %3052 = vmatpush1.bf16.msra.mxu1 %v7447_v60  ;;  %v7530_v48 = vld [vmem:[%s10962_s1 + $0x804] ss:$16 sps:$4 sm:$0xff]   ;;  %v7533_v60 = vld [vmem:[%s10962_s1 + $0x80c] ss:$16 sps:$4 sm:$0xff]   ;;  %vm9253_vm6 = vmpackc.low %vm263_vm5, %vm8320_vm2 }
  0xd0   : > { %2795 = vmatprep.subr.bf16.mxu0 %v7452_v62  ;;  %3053 = vmatprep.subr.bf16.mxu1 %v7455_v63  ;;  %v328_v62 = vpack.c.bf16 %v8804_v27, %v8801_v26  ;;  %v307_v63 = vsel %vm305_vm4, %v298_v58, %v302_v7  ;;  %v7536_v26 = vld [vmem:[%s10962_s1 + $0x824] ss:$16 sps:$4 sm:$0xff]   ;;  %v7539_v27 = vld [vmem:[%s10962_s1 + $0x82c] ss:$16 sps:$4 sm:$0xff]  }
  0xd3   : > { %2796 = vmatpush1.bf16.msra.mxu0 %v7450_v0  ;;  %3054 = vmatpush1.bf16.msra.mxu1 %v7453_v1  ;;  %v311_v0 = vsel %vm305_vm4, %v302_v7, %v298_v58  ;;  %v7528_v1 = vld [vmem:[%s10962_s1 + $0x800] ss:$16 sps:$4 sm:$0xff]   ;;  %v7608_v58 = vld [vmem:[%s10962_s1 + $0x9a4] ss:$16 sps:$4 sm:$0xff]  }
  0xd4   : > { %2797 = vmatprep.subr.bf16.mxu0 %v7458_v2  ;;  %3055 = vmatprep.subr.bf16.mxu1 %v7461_v3  ;;  %v7531_v2 = vld [vmem:[%s10962_s1 + $0x808] ss:$16 sps:$4 sm:$0xff]   ;;  %v6568_v3 = vpack.c.bf16 %v311_v0, %v307_v63  ;;  %v7606_v7 = vld [vmem:[%s10962_s1 + $0x9a0] ss:$16 sps:$4 sm:$0xff]   ;;  %v7620_v63 = vld [vmem:[%s10962_s1 + $0x9e4] ss:$16 sps:$4 sm:$0xff]  }
  0xd5   : > { %v7623_v0 = vld [vmem:[%s10962_s1 + $0x9ec] ss:$16 sps:$4 sm:$0xff]  }
  0xd7   : > { %2798 = vmatpush1.bf16.msra.mxu0 %v7456_v4  ;;  %3056 = vmatpush1.bf16.msra.mxu1 %v7459_v5  ;;  %v7534_v5 = vld [vmem:[%s10962_s1 + $0x820] ss:$16 sps:$4 sm:$0xff]  }
  0xd8   : > { %2799 = vmatprep.subr.bf16.mxu0 %v7464_v8  ;;  %3057 = vmatprep.subr.bf16.mxu1 %v7467_v9  ;;  %v7537_v8 = vld [vmem:[%s10962_s1 + $0x828] ss:$16 sps:$4 sm:$0xff]   ;;  %v7542_v9 = vld [vmem:[%s10962_s1 + $0x844] ss:$16 sps:$4 sm:$0xff]  }
  0xdb   : > { %2800 = vmatpush1.bf16.msra.mxu0 %v7462_v10  ;;  %3058 = vmatpush1.bf16.msra.mxu1 %v7465_v11  ;;  %v7545_v10 = vld [vmem:[%s10962_s1 + $0x84c] ss:$16 sps:$4 sm:$0xff]   ;;  %v7540_v11 = vld [vmem:[%s10962_s1 + $0x840] ss:$16 sps:$4 sm:$0xff]  }
  0xdc   : > { %2801 = vmatprep.subr.bf16.mxu0 %v7470_v12  ;;  %3059 = vmatprep.subr.bf16.mxu1 %v7473_v13  ;;  %v7543_v12 = vld [vmem:[%s10962_s1 + $0x848] ss:$16 sps:$4 sm:$0xff]   ;;  %v7548_v13 = vld [vmem:[%s10962_s1 + $0x864] ss:$16 sps:$4 sm:$0xff]  }
  0xdf   : > { %2802 = vmatpush1.bf16.msra.mxu0 %v7468_v14  ;;  %3060 = vmatpush1.bf16.msra.mxu1 %v7471_v15  ;;  %v7551_v14 = vld [vmem:[%s10962_s1 + $0x86c] ss:$16 sps:$4 sm:$0xff]   ;;  %v7546_v15 = vld [vmem:[%s10962_s1 + $0x860] ss:$16 sps:$4 sm:$0xff]  }
  0xe0   : > { %2803 = vmatprep.subr.bf16.mxu0 %v7476_v16  ;;  %3061 = vmatprep.subr.bf16.mxu1 %v7479_v17  ;;  %v7549_v16 = vld [vmem:[%s10962_s1 + $0x868] ss:$16 sps:$4 sm:$0xff]   ;;  %v7554_v17 = vld [vmem:[%s10962_s1 + $0x884] ss:$16 sps:$4 sm:$0xff]  }
  0xe3   : > { %2804 = vmatpush1.bf16.msra.mxu0 %v7474_v18  ;;  %3062 = vmatpush1.bf16.msra.mxu1 %v7477_v19  ;;  %v7557_v18 = vld [vmem:[%s10962_s1 + $0x88c] ss:$16 sps:$4 sm:$0xff]   ;;  %v7552_v19 = vld [vmem:[%s10962_s1 + $0x880] ss:$16 sps:$4 sm:$0xff]  }
  0xe4   : > { %2805 = vmatprep.subr.bf16.mxu0 %v7482_v20  ;;  %3063 = vmatprep.subr.bf16.mxu1 %v7485_v21  ;;  %v7555_v20 = vld [vmem:[%s10962_s1 + $0x888] ss:$16 sps:$4 sm:$0xff]   ;;  %v7560_v21 = vld [vmem:[%s10962_s1 + $0x8a4] ss:$16 sps:$4 sm:$0xff]  }
  0xe7   : > { %2806 = vmatpush1.bf16.msra.mxu0 %v7480_v22  ;;  %3064 = vmatpush1.bf16.msra.mxu1 %v7483_v23  ;;  %v7563_v22 = vld [vmem:[%s10962_s1 + $0x8ac] ss:$16 sps:$4 sm:$0xff]   ;;  %v7558_v23 = vld [vmem:[%s10962_s1 + $0x8a0] ss:$16 sps:$4 sm:$0xff]  }
  0xe8   : > { %2807 = vmatprep.subr.bf16.mxu0 %v7488_v24  ;;  %3065 = vmatprep.subr.bf16.mxu1 %v7491_v25  ;;  %v7561_v24 = vld [vmem:[%s10962_s1 + $0x8a8] ss:$16 sps:$4 sm:$0xff]   ;;  %v7566_v25 = vld [vmem:[%s10962_s1 + $0x8c4] ss:$16 sps:$4 sm:$0xff]  }
  0xeb   : > { %2808 = vmatpush1.bf16.msra.mxu0 %v7486_v28  ;;  %3066 = vmatpush1.bf16.msra.mxu1 %v7489_v29  ;;  %v7569_v28 = vld [vmem:[%s10962_s1 + $0x8cc] ss:$16 sps:$4 sm:$0xff]   ;;  %v7564_v29 = vld [vmem:[%s10962_s1 + $0x8c0] ss:$16 sps:$4 sm:$0xff]  }
  0xec   : > { %2809 = vmatprep.subr.bf16.mxu0 %v7494_v30  ;;  %3067 = vmatprep.subr.bf16.mxu1 %v7497_v31  ;;  %v7567_v30 = vld [vmem:[%s10962_s1 + $0x8c8] ss:$16 sps:$4 sm:$0xff]   ;;  %v7572_v31 = vld [vmem:[%s10962_s1 + $0x8e4] ss:$16 sps:$4 sm:$0xff]  }
  0xef   : > { %2810 = vmatpush1.bf16.msra.mxu0 %v7492_v32  ;;  %3068 = vmatpush1.bf16.msra.mxu1 %v7495_v33  ;;  %v7575_v32 = vld [vmem:[%s10962_s1 + $0x8ec] ss:$16 sps:$4 sm:$0xff]   ;;  %v7570_v33 = vld [vmem:[%s10962_s1 + $0x8e0] ss:$16 sps:$4 sm:$0xff]  }
  0xf0   : > { %2811 = vmatprep.subr.bf16.mxu0 %v7500_v34  ;;  %3069 = vmatprep.subr.bf16.mxu1 %v7503_v35  ;;  %v7573_v34 = vld [vmem:[%s10962_s1 + $0x8e8] ss:$16 sps:$4 sm:$0xff]   ;;  %v7578_v35 = vld [vmem:[%s10962_s1 + $0x904] ss:$16 sps:$4 sm:$0xff]  }
  0xf3   : > { %2812 = vmatpush1.bf16.msra.mxu0 %v7498_v36  ;;  %3070 = vmatpush1.bf16.msra.mxu1 %v7501_v37  ;;  %v7581_v36 = vld [vmem:[%s10962_s1 + $0x90c] ss:$16 sps:$4 sm:$0xff]   ;;  %v7576_v37 = vld [vmem:[%s10962_s1 + $0x900] ss:$16 sps:$4 sm:$0xff]  }
  0xf4   : > { %2813 = vmatprep.subr.bf16.mxu0 %v7506_v38  ;;  %3071 = vmatprep.subr.bf16.mxu1 %v7509_v39  ;;  %v7579_v38 = vld [vmem:[%s10962_s1 + $0x908] ss:$16 sps:$4 sm:$0xff]   ;;  %v7584_v39 = vld [vmem:[%s10962_s1 + $0x924] ss:$16 sps:$4 sm:$0xff]  }
  0xf7   : > { %2814 = vmatpush1.bf16.msra.mxu0 %v7504_v41  ;;  %3072 = vmatpush1.bf16.msra.mxu1 %v7507_v42  ;;  %v7587_v41 = vld [vmem:[%s10962_s1 + $0x92c] ss:$16 sps:$4 sm:$0xff]   ;;  %v7582_v42 = vld [vmem:[%s10962_s1 + $0x920] ss:$16 sps:$4 sm:$0xff]  }
  0xf8   : > { %2815 = vmatprep.subr.bf16.mxu0 %v7512_v43  ;;  %3073 = vmatprep.subr.bf16.mxu1 %v7515_v44  ;;  %v7585_v43 = vld [vmem:[%s10962_s1 + $0x928] ss:$16 sps:$4 sm:$0xff]   ;;  %v7590_v44 = vld [vmem:[%s10962_s1 + $0x944] ss:$16 sps:$4 sm:$0xff]  }
  0xfb   : > { %2816 = vmatpush1.bf16.msra.mxu0 %v7510_v45  ;;  %3074 = vmatpush1.bf16.msra.mxu1 %v7513_v46  ;;  %v7593_v45 = vld [vmem:[%s10962_s1 + $0x94c] ss:$16 sps:$4 sm:$0xff]   ;;  %v7588_v46 = vld [vmem:[%s10962_s1 + $0x940] ss:$16 sps:$4 sm:$0xff]  }
  0xfc   : > { %2817 = vmatprep.subr.bf16.mxu0 %v7518_v50  ;;  %3075 = vmatprep.subr.bf16.mxu1 %v7521_v51  ;;  %v7591_v50 = vld [vmem:[%s10962_s1 + $0x948] ss:$16 sps:$4 sm:$0xff]   ;;  %v7596_v51 = vld [vmem:[%s10962_s1 + $0x964] ss:$16 sps:$4 sm:$0xff]  }
  0xff   : > { %2818 = vmatpush1.bf16.msra.mxu0 %v7516_v49  ;;  %3076 = vmatpush1.bf16.msra.mxu1 %v7519_v52  ;;  %v7599_v49 = vld [vmem:[%s10962_s1 + $0x96c] ss:$16 sps:$4 sm:$0xff]   ;;  %v7594_v52 = vld [vmem:[%s10962_s1 + $0x960] ss:$16 sps:$4 sm:$0xff]  }
 0x100   : > { %2819 = vmatprep.subr.bf16.mxu0 %v7524_v54  ;;  %3077 = vmatprep.subr.bf16.mxu1 %v7527_v55  ;;  %v7602_v54 = vld [vmem:[%s10962_s1 + $0x984] ss:$16 sps:$4 sm:$0xff]   ;;  %v7605_v55 = vld [vmem:[%s10962_s1 + $0x98c] ss:$16 sps:$4 sm:$0xff]  }
 0x103   : > { %2820 = vmatpush1.bf16.msra.mxu0 %v7522_v56  ;;  %3078 = vmatpush1.bf16.msra.mxu1 %v7525_v59  ;;  %v7600_v56 = vld [vmem:[%s10962_s1 + $0x980] ss:$16 sps:$4 sm:$0xff]   ;;  %v7609_v59 = vld [vmem:[%s10962_s1 + $0x9a8] ss:$16 sps:$4 sm:$0xff]  }
 0x104   : > { %2832 = vmatprep.subr.bf16.mxu0 %v7530_v48  ;;  %3090 = vmatprep.subr.bf16.mxu1 %v7533_v60  ;;  %v7617_v48 = vld [vmem:[%s10962_s1 + $0x9cc] ss:$16 sps:$4 sm:$0xff]   ;;  %v7612_v60 = vld [vmem:[%s10962_s1 + $0x9c0] ss:$16 sps:$4 sm:$0xff]  }
 0x106   : > { %2822 = vmatmul.mubr.bf16.vlgmr.msra.gmra.mrb[0].mxu0 %v328_v62  ;;  %3080 = vmatmul.mubr.bf16.vlgmr.msra.gmra.mrb[0].mxu1 %v328_v62  ;;  %v7615_v62 = vld [vmem:[%s10962_s1 + $0x9c8] ss:$16 sps:$4 sm:$0xff]  }
 0x107   : > { %2833 = vmatpush1.bf16.msra.mxu0 %v7528_v1  ;;  %3091 = vmatpush1.bf16.msra.mxu1 %v7531_v2  ;;  %v8298_v1 = vld [vmem:[%s8503_s19] sm:$0xff] }
 0x108   : > { %2834 = vmatprep.subr.bf16.mxu0 %v7536_v26  ;;  %3092 = vmatprep.subr.bf16.mxu1 %v7539_v27  ;;  %v297_v2 = vrot.slane %v8298_v1, 1  ;;  %v8299_v26 = vld [vmem:[%s8503_s19 + $0x20] sm:$0xff]  ;;  %v7695_v1 = vld [vmem:[%s10962_s1 + $0xb6c] ss:$16 sps:$4 sm:$0xff]  }
 0x109   : > { %6569 = vmatprep.mubr.msk.bf16.mxu0 %vm9253_vm6, %v6568_v3  ;;  %6593 = vmatprep.mubr.msk.bf16.mxu1 %vm9253_vm6, %v6568_v3  ;;  %v301_v27 = vrot.slane %v8299_v26, 1  ;;  %v7618_v3 = vld [vmem:[%s10962_s1 + $0x9e0] ss:$16 sps:$4 sm:$0xff]   ;;  %v7693_v26 = vld [vmem:[%s10962_s1 + $0xb68] ss:$16 sps:$4 sm:$0xff]  }
 0x10b   : > { %2835 = vmatpush1.bf16.msra.mxu0 %v7534_v5  ;;  %3093 = vmatpush1.bf16.msra.mxu1 %v7537_v8  ;;  %v7621_v5 = vld [vmem:[%s10962_s1 + $0x9e8] ss:$16 sps:$4 sm:$0xff]   ;;  %v7626_v8 = vld [vmem:[%s10962_s1 + $0xa04] ss:$16 sps:$4 sm:$0xff]  }
 0x10c   : > { %2836 = vmatprep.subr.bf16.mxu0 %v7542_v9  ;;  %3094 = vmatprep.subr.bf16.mxu1 %v7545_v10  ;;  %v7629_v9 = vld [vmem:[%s10962_s1 + $0xa0c] ss:$16 sps:$4 sm:$0xff]  }
 0x10d   : > { %v8300_v10 = vld [vmem:[%s8503_s19 + $0x18] sm:$0xff] }
 0x10f   : > { %2837 = vmatpush1.bf16.msra.mxu0 %v7540_v11  ;;  %3095 = vmatpush1.bf16.msra.mxu1 %v7543_v12  ;;  %v300_v11 = vrot.slane %v8300_v10, 1  ;;  %v8301_v12 = vld [vmem:[%s8503_s19 + $0x38] sm:$0xff] }
 0x110   : > { %2838 = vmatprep.subr.bf16.mxu0 %v7548_v13  ;;  %3096 = vmatprep.subr.bf16.mxu1 %v7551_v14  ;;  %v304_v13 = vrot.slane %v8301_v12, 1  ;;  %v306_v14 = vsel %vm305_vm4, %v297_v2, %v301_v27  ;;  %v7707_v10 = vld [vmem:[%s10962_s1 + $0xbac] ss:$16 sps:$4 sm:$0xff]   ;;  %v7705_v12 = vld [vmem:[%s10962_s1 + $0xba8] ss:$16 sps:$4 sm:$0xff]  }
 0x113   : > { %2839 = vmatpush1.bf16.msra.mxu0 %v7546_v15  ;;  %3097 = vmatpush1.bf16.msra.mxu1 %v7549_v16  ;;  %v310_v15 = vsel %vm305_vm4, %v301_v27, %v297_v2  ;;  %v7624_v16 = vld [vmem:[%s10962_s1 + $0xa00] ss:$16 sps:$4 sm:$0xff]   ;;  %v7698_v27 = vld [vmem:[%s10962_s1 + $0xb84] ss:$16 sps:$4 sm:$0xff]  }
 0x114   : > { %2840 = vmatprep.subr.bf16.mxu0 %v7554_v17  ;;  %3098 = vmatprep.subr.bf16.mxu1 %v7557_v18  ;;  %v7627_v17 = vld [vmem:[%s10962_s1 + $0xa08] ss:$16 sps:$4 sm:$0xff]   ;;  %v6571_v18 = vpack.c.bf16 %v310_v15, %v306_v14  ;;  %v7690_v2 = vld [vmem:[%s10962_s1 + $0xb60] ss:$16 sps:$4 sm:$0xff]   ;;  %v7713_v14 = vld [vmem:[%s10962_s1 + $0xbcc] ss:$16 sps:$4 sm:$0xff]  }
 0x115   : > { %v7708_v15 = vld [vmem:[%s10962_s1 + $0xbc0] ss:$16 sps:$4 sm:$0xff]  }
 0x117   : > { %2841 = vmatpush1.bf16.msra.mxu0 %v7552_v19  ;;  %3099 = vmatpush1.bf16.msra.mxu1 %v7555_v20  ;;  %v7632_v19 = vld [vmem:[%s10962_s1 + $0xa24] ss:$16 sps:$4 sm:$0xff]   ;;  %v7635_v20 = vld [vmem:[%s10962_s1 + $0xa2c] ss:$16 sps:$4 sm:$0xff]  }
 0x118   : > { %2842 = vmatprep.subr.bf16.mxu0 %v7560_v21  ;;  %3100 = vmatprep.subr.bf16.mxu1 %v7563_v22  ;;  %v309_v21 = vsel %vm305_vm4, %v300_v11, %v304_v13  ;;  %v313_v22 = vsel %vm305_vm4, %v304_v13, %v300_v11  ;;  %v7702_v11 = vld [vmem:[%s10962_s1 + $0xba0] ss:$16 sps:$4 sm:$0xff]   ;;  %v7710_v13 = vld [vmem:[%s10962_s1 + $0xbc4] ss:$16 sps:$4 sm:$0xff]  }
 0x11b   : > { %2843 = vmatpush1.bf16.msra.mxu0 %v7558_v23  ;;  %3101 = vmatpush1.bf16.msra.mxu1 %v7561_v24  ;;  %v7630_v23 = vld [vmem:[%s10962_s1 + $0xa20] ss:$16 sps:$4 sm:$0xff]   ;;  %v7633_v24 = vld [vmem:[%s10962_s1 + $0xa28] ss:$16 sps:$4 sm:$0xff]  }
 0x11c   : > { %2844 = vmatprep.subr.bf16.mxu0 %v7566_v25  ;;  %3102 = vmatprep.subr.bf16.mxu1 %v7569_v28  ;;  %v6574_v25 = vpack.c.bf16 %v313_v22, %v309_v21  ;;  %v7638_v28 = vld [vmem:[%s10962_s1 + $0xa44] ss:$16 sps:$4 sm:$0xff]  }
 0x11d   : > { %v8303_v21 = vld [vmem:[%s8503_s19 + $0x30] sm:$0xff] }
 0x11e   : > { %v303_v22 = vrot.slane %v8303_v21, 1  ;;  %v7798_v21 = vld [vmem:[%s10964_s3 + $0x1a0] ss:$16 sps:$4 sm:$0xff]  }
 0x11f   : > { %2845 = vmatpush1.bf16.msra.mxu0 %v7564_v29  ;;  %3103 = vmatpush1.bf16.msra.mxu1 %v7567_v30  ;;  %v7641_v29 = vld [vmem:[%s10962_s1 + $0xa4c] ss:$16 sps:$4 sm:$0xff]   ;;  %v7636_v30 = vld [vmem:[%s10962_s1 + $0xa40] ss:$16 sps:$4 sm:$0xff]  }
 0x120   : > { %2846 = vmatprep.subr.bf16.mxu0 %v7572_v31  ;;  %3104 = vmatprep.subr.bf16.mxu1 %v7575_v32  ;;  %v7639_v31 = vld [vmem:[%s10962_s1 + $0xa48] ss:$16 sps:$4 sm:$0xff]   ;;  %v7644_v32 = vld [vmem:[%s10962_s1 + $0xa64] ss:$16 sps:$4 sm:$0xff]  }
 0x123   : > { %2847 = vmatpush1.bf16.msra.mxu0 %v7570_v33  ;;  %3105 = vmatpush1.bf16.msra.mxu1 %v7573_v34  ;;  %v7647_v33 = vld [vmem:[%s10962_s1 + $0xa6c] ss:$16 sps:$4 sm:$0xff]   ;;  %v7642_v34 = vld [vmem:[%s10962_s1 + $0xa60] ss:$16 sps:$4 sm:$0xff]  }
 0x124   : > { %2848 = vmatprep.subr.bf16.mxu0 %v7578_v35  ;;  %3106 = vmatprep.subr.bf16.mxu1 %v7581_v36  ;;  %v7645_v35 = vld [vmem:[%s10962_s1 + $0xa68] ss:$16 sps:$4 sm:$0xff]   ;;  %v7650_v36 = vld [vmem:[%s10962_s1 + $0xa84] ss:$16 sps:$4 sm:$0xff]  }
 0x127   : > { %2849 = vmatpush1.bf16.msra.mxu0 %v7576_v37  ;;  %3107 = vmatpush1.bf16.msra.mxu1 %v7579_v38  ;;  %v7653_v37 = vld [vmem:[%s10962_s1 + $0xa8c] ss:$16 sps:$4 sm:$0xff]   ;;  %v7648_v38 = vld [vmem:[%s10962_s1 + $0xa80] ss:$16 sps:$4 sm:$0xff]  }
 0x128   : > { %2850 = vmatprep.subr.bf16.mxu0 %v7584_v39  ;;  %3108 = vmatprep.subr.bf16.mxu1 %v7587_v41  ;;  %v7651_v39 = vld [vmem:[%s10962_s1 + $0xa88] ss:$16 sps:$4 sm:$0xff]   ;;  %v7656_v41 = vld [vmem:[%s10962_s1 + $0xaa4] ss:$16 sps:$4 sm:$0xff]  }
 0x12b   : > { %2851 = vmatpush1.bf16.msra.mxu0 %v7582_v42  ;;  %3109 = vmatpush1.bf16.msra.mxu1 %v7585_v43  ;;  %v7659_v42 = vld [vmem:[%s10962_s1 + $0xaac] ss:$16 sps:$4 sm:$0xff]   ;;  %v7654_v43 = vld [vmem:[%s10962_s1 + $0xaa0] ss:$16 sps:$4 sm:$0xff]  }
 0x12c   : > { %2852 = vmatprep.subr.bf16.mxu0 %v7590_v44  ;;  %3110 = vmatprep.subr.bf16.mxu1 %v7593_v45  ;;  %v7657_v44 = vld [vmem:[%s10962_s1 + $0xaa8] ss:$16 sps:$4 sm:$0xff]   ;;  %v7662_v45 = vld [vmem:[%s10962_s1 + $0xac4] ss:$16 sps:$4 sm:$0xff]  }
 0x12f   : > { %2853 = vmatpush1.bf16.msra.mxu0 %v7588_v46  ;;  %3111 = vmatpush1.bf16.msra.mxu1 %v7591_v50  ;;  %v7665_v46 = vld [vmem:[%s10962_s1 + $0xacc] ss:$16 sps:$4 sm:$0xff]   ;;  %v7660_v50 = vld [vmem:[%s10962_s1 + $0xac0] ss:$16 sps:$4 sm:$0xff]  }
 0x130   : > { %2854 = vmatprep.subr.bf16.mxu0 %v7596_v51  ;;  %3112 = vmatprep.subr.bf16.mxu1 %v7599_v49  ;;  %v7663_v51 = vld [vmem:[%s10962_s1 + $0xac8] ss:$16 sps:$4 sm:$0xff]   ;;  %v7668_v49 = vld [vmem:[%s10962_s1 + $0xae4] ss:$16 sps:$4 sm:$0xff]  }
 0x133   : > { %2855 = vmatpush1.bf16.msra.mxu0 %v7594_v52  ;;  %3113 = vmatpush1.bf16.msra.mxu1 %v7597_v53  ;;  %v7671_v52 = vld [vmem:[%s10962_s1 + $0xaec] ss:$16 sps:$4 sm:$0xff]   ;;  %v7666_v53 = vld [vmem:[%s10962_s1 + $0xae0] ss:$16 sps:$4 sm:$0xff]  }
 0x134   : > { %2856 = vmatprep.subr.bf16.mxu0 %v7602_v54  ;;  %3114 = vmatprep.subr.bf16.mxu1 %v7605_v55  ;;  %v7669_v54 = vld [vmem:[%s10962_s1 + $0xae8] ss:$16 sps:$4 sm:$0xff]   ;;  %v7674_v55 = vld [vmem:[%s10962_s1 + $0xb04] ss:$16 sps:$4 sm:$0xff]  }
 0x137   : > { %2857 = vmatpush1.bf16.msra.mxu0 %v7600_v56  ;;  %3115 = vmatpush1.bf16.msra.mxu1 %v7603_v57  ;;  %v7677_v56 = vld [vmem:[%s10962_s1 + $0xb0c] ss:$16 sps:$4 sm:$0xff]   ;;  %v7672_v57 = vld [vmem:[%s10962_s1 + $0xb00] ss:$16 sps:$4 sm:$0xff]  }
 0x138   : > { %2858 = vmatprep.subr.bf16.mxu0 %v7608_v58  ;;  %3116 = vmatprep.subr.bf16.mxu1 %v7611_v6  ;;  %v7675_v58 = vld [vmem:[%s10962_s1 + $0xb08] ss:$16 sps:$4 sm:$0xff]   ;;  %v7680_v6 = vld [vmem:[%s10962_s1 + $0xb24] ss:$16 sps:$4 sm:$0xff]  }
 0x13b   : > { %2859 = vmatpush1.bf16.msra.mxu0 %v7606_v7  ;;  %3117 = vmatpush1.bf16.msra.mxu1 %v7609_v59  ;;  %v7683_v7 = vld [vmem:[%s10962_s1 + $0xb2c] ss:$16 sps:$4 sm:$0xff]   ;;  %v7678_v59 = vld [vmem:[%s10962_s1 + $0xb20] ss:$16 sps:$4 sm:$0xff]  }
 0x13c   : > { %2860 = vmatprep.subr.bf16.mxu0 %v7614_v47  ;;  %3118 = vmatprep.subr.bf16.mxu1 %v7617_v48  ;;  %v7681_v47 = vld [vmem:[%s10962_s1 + $0xb28] ss:$16 sps:$4 sm:$0xff]   ;;  %v7686_v48 = vld [vmem:[%s10962_s1 + $0xb44] ss:$16 sps:$4 sm:$0xff]  }
 0x13f   : > { %2861 = vmatpush1.bf16.msra.mxu0 %v7612_v60  ;;  %3119 = vmatpush1.bf16.msra.mxu1 %v7615_v62  ;;  %v7689_v60 = vld [vmem:[%s10962_s1 + $0xb4c] ss:$16 sps:$4 sm:$0xff]   ;;  %v7684_v62 = vld [vmem:[%s10962_s1 + $0xb40] ss:$16 sps:$4 sm:$0xff]  }
 0x140   : > { %2862 = vmatprep.subr.bf16.mxu0 %v7620_v63  ;;  %3120 = vmatprep.subr.bf16.mxu1 %v7623_v0  ;;  %v7687_v63 = vld [vmem:[%s10962_s1 + $0xb48] ss:$16 sps:$4 sm:$0xff]   ;;  %v7692_v0 = vld [vmem:[%s10962_s1 + $0xb64] ss:$16 sps:$4 sm:$0xff]  }
 0x143   : > { %2863 = vmatpush1.bf16.msra.mxu0 %v7618_v3  ;;  %3121 = vmatpush1.bf16.msra.mxu1 %v7621_v5  ;;  %v7701_v3 = vld [vmem:[%s10962_s1 + $0xb8c] ss:$16 sps:$4 sm:$0xff]   ;;  %v7696_v5 = vld [vmem:[%s10962_s1 + $0xb80] ss:$16 sps:$4 sm:$0xff]  }
 0x144   : > { %2875 = vmatprep.subr.bf16.mxu0 %v7626_v8  ;;  %3133 = vmatprep.subr.bf16.mxu1 %v7629_v9  ;;  %v7699_v8 = vld [vmem:[%s10962_s1 + $0xb88] ss:$16 sps:$4 sm:$0xff]   ;;  %v7704_v9 = vld [vmem:[%s10962_s1 + $0xba4] ss:$16 sps:$4 sm:$0xff]  }
 0x146   : > { %6572 = vmatmul.mubr.msk.bf16.vlgmr.msra.gmra.mrb[0].mxu0 %vm9253_vm6, %v6571_v18  ;;  %6596 = vmatmul.mubr.msk.bf16.vlgmr.msra.gmra.mrb[0].mxu1 %vm9253_vm6, %v6571_v18  ;;  %v7719_v18 = vld [vmem:[%s10962_s1 + $0xbec] ss:$16 sps:$4 sm:$0xff]  }
 0x147   : > { %2876 = vmatpush1.bf16.msra.mxu0 %v7624_v16  ;;  %3134 = vmatpush1.bf16.msra.mxu1 %v7627_v17  ;;  %v7711_v16 = vld [vmem:[%s10962_s1 + $0xbc8] ss:$16 sps:$4 sm:$0xff]   ;;  %v7716_v17 = vld [vmem:[%s10962_s1 + $0xbe4] ss:$16 sps:$4 sm:$0xff]  }
 0x148   : > { %2877 = vmatprep.subr.bf16.mxu0 %v7632_v19  ;;  %3135 = vmatprep.subr.bf16.mxu1 %v7635_v20  ;;  %v8302_v19 = vld [vmem:[%s8503_s19 + $0x10] sm:$0xff] }
 0x149   : > { %6575 = vmatprep.mubr.msk.bf16.mxu0 %vm9253_vm6, %v6574_v25  ;;  %6599 = vmatprep.mubr.msk.bf16.mxu1 %vm9253_vm6, %v6574_v25  ;;  %v299_v20 = vrot.slane %v8302_v19, 1  ;;  %v7722_v25 = vld [vmem:[%s10964_s3 + $0x4] ss:$16 sps:$4 sm:$0xff]  }
 0x14a   : > { %v7800_v19 = vld [vmem:[%s10964_s3 + $0x1a4] ss:$16 sps:$4 sm:$0xff]  }
 0x14b   : > { %2878 = vmatpush1.bf16.msra.mxu0 %v7630_v23  ;;  %3136 = vmatpush1.bf16.msra.mxu1 %v7633_v24  ;;  %v7714_v23 = vld [vmem:[%s10962_s1 + $0xbe0] ss:$16 sps:$4 sm:$0xff]   ;;  %v7717_v24 = vld [vmem:[%s10962_s1 + $0xbe8] ss:$16 sps:$4 sm:$0xff]  }
 0x14c   : > { %2879 = vmatprep.subr.bf16.mxu0 %v7638_v28  ;;  %3137 = vmatprep.subr.bf16.mxu1 %v7641_v29  ;;  %v7725_v28 = vld [vmem:[%s10964_s3 + $0xc] ss:$16 sps:$4 sm:$0xff]   ;;  %v308_v29 = vsel %vm305_vm4, %v299_v20, %v303_v22 }
 0x14f   : > { %2880 = vmatpush1.bf16.msra.mxu0 %v7636_v30  ;;  %3138 = vmatpush1.bf16.msra.mxu1 %v7639_v31  ;;  %v312_v30 = vsel %vm305_vm4, %v303_v22, %v299_v20  ;;  %v7720_v31 = vld [vmem:[%s10964_s3] ss:$16 sps:$4 sm:$0xff]   ;;  %v7803_v20 = vld [vmem:[%s10964_s3 + $0x1ac] ss:$16 sps:$4 sm:$0xff]   ;;  %v7801_v22 = vld [vmem:[%s10964_s3 + $0x1a8] ss:$16 sps:$4 sm:$0xff]  }
 0x150   : > { %2881 = vmatprep.subr.bf16.mxu0 %v7644_v32  ;;  %3139 = vmatprep.subr.bf16.mxu1 %v7647_v33  ;;  %v7723_v32 = vld [vmem:[%s10964_s3 + $0x8] ss:$16 sps:$4 sm:$0xff]   ;;  %v6577_v33 = vpack.c.bf16 %v312_v30, %v308_v29  ;;  %v7812_v29 = vld [vmem:[%s10964_s3 + $0x1e4] ss:$16 sps:$4 sm:$0xff]   ;;  %v7815_v30 = vld [vmem:[%s10964_s3 + $0x1ec] ss:$16 sps:$4 sm:$0xff]  }
 0x153   : > { %2882 = vmatpush1.bf16.msra.mxu0 %v7642_v34  ;;  %3140 = vmatpush1.bf16.msra.mxu1 %v7645_v35  ;;  %v7728_v34 = vld [vmem:[%s10964_s3 + $0x24] ss:$16 sps:$4 sm:$0xff]   ;;  %v7731_v35 = vld [vmem:[%s10964_s3 + $0x2c] ss:$16 sps:$4 sm:$0xff]  }
 0x154   : > { %2883 = vmatprep.subr.bf16.mxu0 %v7650_v36  ;;  %3141 = vmatprep.subr.bf16.mxu1 %v7653_v37  ;;  %v7726_v36 = vld [vmem:[%s10964_s3 + $0x20] ss:$16 sps:$4 sm:$0xff]   ;;  %v7729_v37 = vld [vmem:[%s10964_s3 + $0x28] ss:$16 sps:$4 sm:$0xff]  }
 0x157   : > { %2884 = vmatpush1.bf16.msra.mxu0 %v7648_v38  ;;  %3142 = vmatpush1.bf16.msra.mxu1 %v7651_v39  ;;  %v7734_v38 = vld [vmem:[%s10964_s3 + $0x44] ss:$16 sps:$4 sm:$0xff]   ;;  %v7737_v39 = vld [vmem:[%s10964_s3 + $0x4c] ss:$16 sps:$4 sm:$0xff]  }
 0x158   : > { %2885 = vmatprep.subr.bf16.mxu0 %v7656_v41  ;;  %3143 = vmatprep.subr.bf16.mxu1 %v7659_v42  ;;  %v7732_v41 = vld [vmem:[%s10964_s3 + $0x40] ss:$16 sps:$4 sm:$0xff]   ;;  %v7735_v42 = vld [vmem:[%s10964_s3 + $0x48] ss:$16 sps:$4 sm:$0xff]  }
 0x15b   : > { %2886 = vmatpush1.bf16.msra.mxu0 %v7654_v43  ;;  %3144 = vmatpush1.bf16.msra.mxu1 %v7657_v44  ;;  %v7740_v43 = vld [vmem:[%s10964_s3 + $0x64] ss:$16 sps:$4 sm:$0xff]   ;;  %v7743_v44 = vld [vmem:[%s10964_s3 + $0x6c] ss:$16 sps:$4 sm:$0xff]  }
 0x15c   : > { %2887 = vmatprep.subr.bf16.mxu0 %v7662_v45  ;;  %3145 = vmatprep.subr.bf16.mxu1 %v7665_v46  ;;  %v7738_v45 = vld [vmem:[%s10964_s3 + $0x60] ss:$16 sps:$4 sm:$0xff]   ;;  %v7741_v46 = vld [vmem:[%s10964_s3 + $0x68] ss:$16 sps:$4 sm:$0xff]  }
 0x15f   : > { %2888 = vmatpush1.bf16.msra.mxu0 %v7660_v50  ;;  %3146 = vmatpush1.bf16.msra.mxu1 %v7663_v51  ;;  %v7746_v50 = vld [vmem:[%s10964_s3 + $0x84] ss:$16 sps:$4 sm:$0xff]   ;;  %v7749_v51 = vld [vmem:[%s10964_s3 + $0x8c] ss:$16 sps:$4 sm:$0xff]  }
 0x160   : > { %2889 = vmatprep.subr.bf16.mxu0 %v7668_v49  ;;  %3147 = vmatprep.subr.bf16.mxu1 %v7671_v52  ;;  %v7744_v49 = vld [vmem:[%s10964_s3 + $0x80] ss:$16 sps:$4 sm:$0xff]   ;;  %v7747_v52 = vld [vmem:[%s10964_s3 + $0x88] ss:$16 sps:$4 sm:$0xff]  }
 0x163   : > { %2890 = vmatpush1.bf16.msra.mxu0 %v7666_v53  ;;  %3148 = vmatpush1.bf16.msra.mxu1 %v7669_v54  ;;  %v7752_v53 = vld [vmem:[%s10964_s3 + $0xa4] ss:$16 sps:$4 sm:$0xff]   ;;  %v7755_v54 = vld [vmem:[%s10964_s3 + $0xac] ss:$16 sps:$4 sm:$0xff]  }
 0x164   : > { %2891 = vmatprep.subr.bf16.mxu0 %v7674_v55  ;;  %3149 = vmatprep.subr.bf16.mxu1 %v7677_v56  ;;  %v7750_v55 = vld [vmem:[%s10964_s3 + $0xa0] ss:$16 sps:$4 sm:$0xff]   ;;  %v7753_v56 = vld [vmem:[%s10964_s3 + $0xa8] ss:$16 sps:$4 sm:$0xff]  }
 0x167   : > { %2892 = vmatpush1.bf16.msra.mxu0 %v7672_v57  ;;  %3150 = vmatpush1.bf16.msra.mxu1 %v7675_v58  ;;  %v7758_v57 = vld [vmem:[%s10964_s3 + $0xc4] ss:$16 sps:$4 sm:$0xff]   ;;  %v7761_v58 = vld [vmem:[%s10964_s3 + $0xcc] ss:$16 sps:$4 sm:$0xff]  }
 0x168   : > { %2893 = vmatprep.subr.bf16.mxu0 %v7680_v6  ;;  %3151 = vmatprep.subr.bf16.mxu1 %v7683_v7  ;;  %v7756_v6 = vld [vmem:[%s10964_s3 + $0xc0] ss:$16 sps:$4 sm:$0xff]   ;;  %v7759_v7 = vld [vmem:[%s10964_s3 + $0xc8] ss:$16 sps:$4 sm:$0xff]  }
 0x16b   : > { %2894 = vmatpush1.bf16.msra.mxu0 %v7678_v59  ;;  %3152 = vmatpush1.bf16.msra.mxu1 %v7681_v47  ;;  %v7764_v59 = vld [vmem:[%s10964_s3 + $0xe4] ss:$16 sps:$4 sm:$0xff]   ;;  %v7767_v47 = vld [vmem:[%s10964_s3 + $0xec] ss:$16 sps:$4 sm:$0xff]  }
 0x16c   : > { %2895 = vmatprep.subr.bf16.mxu0 %v7686_v48  ;;  %3153 = vmatprep.subr.bf16.mxu1 %v7689_v60  ;;  %v7762_v48 = vld [vmem:[%s10964_s3 + $0xe0] ss:$16 sps:$4 sm:$0xff]   ;;  %v7765_v60 = vld [vmem:[%s10964_s3 + $0xe8] ss:$16 sps:$4 sm:$0xff]  }
 0x16f   : > { %2896 = vmatpush1.bf16.msra.mxu0 %v7684_v62  ;;  %3154 = vmatpush1.bf16.msra.mxu1 %v7687_v63  ;;  %v7770_v62 = vld [vmem:[%s10964_s3 + $0x104] ss:$16 sps:$4 sm:$0xff]   ;;  %v7773_v63 = vld [vmem:[%s10964_s3 + $0x10c] ss:$16 sps:$4 sm:$0xff]  }
 0x170   : > { %2897 = vmatprep.subr.bf16.mxu0 %v7692_v0  ;;  %3155 = vmatprep.subr.bf16.mxu1 %v7695_v1  ;;  %v7768_v0 = vld [vmem:[%s10964_s3 + $0x100] ss:$16 sps:$4 sm:$0xff]   ;;  %v7771_v1 = vld [vmem:[%s10964_s3 + $0x108] ss:$16 sps:$4 sm:$0xff]  }
 0x173   : > { %2898 = vmatpush1.bf16.msra.mxu0 %v7690_v2  ;;  %3156 = vmatpush1.bf16.msra.mxu1 %v7693_v26  ;;  %v7776_v2 = vld [vmem:[%s10964_s3 + $0x124] ss:$16 sps:$4 sm:$0xff]   ;;  %v7779_v26 = vld [vmem:[%s10964_s3 + $0x12c] ss:$16 sps:$4 sm:$0xff]  }
 0x174   : > { %2899 = vmatprep.subr.bf16.mxu0 %v7698_v27  ;;  %3157 = vmatprep.subr.bf16.mxu1 %v7701_v3  ;;  %v7774_v27 = vld [vmem:[%s10964_s3 + $0x120] ss:$16 sps:$4 sm:$0xff]   ;;  %v7777_v3 = vld [vmem:[%s10964_s3 + $0x128] ss:$16 sps:$4 sm:$0xff]  }
 0x177   : > { %2900 = vmatpush1.bf16.msra.mxu0 %v7696_v5  ;;  %3158 = vmatpush1.bf16.msra.mxu1 %v7699_v8  ;;  %v7782_v5 = vld [vmem:[%s10964_s3 + $0x144] ss:$16 sps:$4 sm:$0xff]   ;;  %v7785_v8 = vld [vmem:[%s10964_s3 + $0x14c] ss:$16 sps:$4 sm:$0xff]  }
 0x178   : > { %2901 = vmatprep.subr.bf16.mxu0 %v7704_v9  ;;  %3159 = vmatprep.subr.bf16.mxu1 %v7707_v10  ;;  %v7780_v9 = vld [vmem:[%s10964_s3 + $0x140] ss:$16 sps:$4 sm:$0xff]   ;;  %v7783_v10 = vld [vmem:[%s10964_s3 + $0x148] ss:$16 sps:$4 sm:$0xff]  }
 0x17b   : > { %2902 = vmatpush1.bf16.msra.mxu0 %v7702_v11  ;;  %3160 = vmatpush1.bf16.msra.mxu1 %v7705_v12  ;;  %v7788_v11 = vld [vmem:[%s10964_s3 + $0x164] ss:$16 sps:$4 sm:$0xff]   ;;  %v7791_v12 = vld [vmem:[%s10964_s3 + $0x16c] ss:$16 sps:$4 sm:$0xff]  }
 0x17c   : > { %2903 = vmatprep.subr.bf16.mxu0 %v7710_v13  ;;  %3161 = vmatprep.subr.bf16.mxu1 %v7713_v14  ;;  %v7786_v13 = vld [vmem:[%s10964_s3 + $0x160] ss:$16 sps:$4 sm:$0xff]   ;;  %v7789_v14 = vld [vmem:[%s10964_s3 + $0x168] ss:$16 sps:$4 sm:$0xff]  }
 0x17f   : > { %2904 = vmatpush1.bf16.msra.mxu0 %v7708_v15  ;;  %3162 = vmatpush1.bf16.msra.mxu1 %v7711_v16  ;;  %v7794_v15 = vld [vmem:[%s10964_s3 + $0x184] ss:$16 sps:$4 sm:$0xff]   ;;  %v7797_v16 = vld [vmem:[%s10964_s3 + $0x18c] ss:$16 sps:$4 sm:$0xff]  }
 0x180   : > { %2905 = vmatprep.subr.bf16.mxu0 %v7716_v17  ;;  %3163 = vmatprep.subr.bf16.mxu1 %v7719_v18  ;;  %v7792_v17 = vld [vmem:[%s10964_s3 + $0x180] ss:$16 sps:$4 sm:$0xff]   ;;  %v7795_v18 = vld [vmem:[%s10964_s3 + $0x188] ss:$16 sps:$4 sm:$0xff]  }
 0x183   : > { %2906 = vmatpush1.bf16.msra.mxu0 %v7714_v23  ;;  %3164 = vmatpush1.bf16.msra.mxu1 %v7717_v24  ;;  %v7806_v23 = vld [vmem:[%s10964_s3 + $0x1c4] ss:$16 sps:$4 sm:$0xff]   ;;  %v7809_v24 = vld [vmem:[%s10964_s3 + $0x1cc] ss:$16 sps:$4 sm:$0xff]  }
 0x184   : > { %5570 = vmatprep.subr.bf16.mxu0 %v7722_v25  ;;  %5828 = vmatprep.subr.bf16.mxu1 %v7725_v28  ;;  %v7804_v25 = vld [vmem:[%s10964_s3 + $0x1c0] ss:$16 sps:$4 sm:$0xff]   ;;  %v7807_v28 = vld [vmem:[%s10964_s3 + $0x1c8] ss:$16 sps:$4 sm:$0xff]  }
 0x186   : > { %6578 = vmatmul.mubr.msk.bf16.vlgmr.msra.gmra.mrb[0].mxu0 %vm9253_vm6, %v6577_v33  ;;  %6602 = vmatmul.mubr.msk.bf16.vlgmr.msra.gmra.mrb[0].mxu1 %vm9253_vm6, %v6577_v33  ;;  %v7818_v33 = vld [vmem:[%s10964_s3 + $0x204] ss:$16 sps:$4 sm:$0xff]  }
 0x187   : > { %5571 = vmatpush1.bf16.msra.mxu0 %v7720_v31  ;;  %5829 = vmatpush1.bf16.msra.mxu1 %v7723_v32  ;;  %v7810_v31 = vld [vmem:[%s10964_s3 + $0x1e0] ss:$16 sps:$4 sm:$0xff]   ;;  %v7813_v32 = vld [vmem:[%s10964_s3 + $0x1e8] ss:$16 sps:$4 sm:$0xff]  }
 0x188   : > { %5572 = vmatprep.subr.bf16.mxu0 %v7728_v34  ;;  %5830 = vmatprep.subr.bf16.mxu1 %v7731_v35  ;;  %v7821_v34 = vld [vmem:[%s10964_s3 + $0x20c] ss:$16 sps:$4 sm:$0xff]   ;;  %v722_v35 = vsub.s32 0, %v8480_v40 }
 0x18b   : > { %5573 = vmatpush1.bf16.msra.mxu0 %v7726_v36  ;;  %5831 = vmatpush1.bf16.msra.mxu1 %v7729_v37  ;;  %v730_v36 = vsub.s32 2, %v8480_v40  ;;  %v718_v37 = vld [vmem:[%s10963_s2] sm:$0xf] }
 0x18c   : > { %5574 = vmatprep.subr.bf16.mxu0 %v7734_v38  ;;  %5832 = vmatprep.subr.bf16.mxu1 %v7737_v39  ;;  %v726_v38 = vsub.s32 1, %v8480_v40  ;;  %v734_v39 = vsub.s32 3, %v8480_v40  ;;  %v8304_v40 = vld [vmem:[%s8503_s19] sm:$0xff] }
 0x18f   : > { %5575 = vmatpush1.bf16.msra.mxu0 %v7732_v41  ;;  %5833 = vmatpush1.bf16.msra.mxu1 %v7735_v42  ;;  %v723_v41 = vrot.slane %v718_v37, %v722_v35  ;;  %v731_v42 = vrot.slane %v718_v37, %v730_v36 }
 0x190   : > { %5576 = vmatprep.subr.bf16.mxu0 %v7740_v43  ;;  %5834 = vmatprep.subr.bf16.mxu1 %v7743_v44  ;;  %v727_v43 = vrot.slane %v718_v37, %v726_v38  ;;  %v735_v44 = vrot.slane %v718_v37, %v734_v39 }
 0x193   : > { %5577 = vmatpush1.bf16.msra.mxu0 %v7738_v45  ;;  %5835 = vmatpush1.bf16.msra.mxu1 %v7741_v46 }
 0x194   : > { %5578 = vmatprep.subr.bf16.mxu0 %v7746_v50  ;;  %5836 = vmatprep.subr.bf16.mxu1 %v7749_v51 }
 0x197   : > { %5579 = vmatpush1.bf16.msra.mxu0 %v7744_v49  ;;  %5837 = vmatpush1.bf16.msra.mxu1 %v7747_v52 }
 0x198   : > { %5580 = vmatprep.subr.bf16.mxu0 %v7752_v53  ;;  %5838 = vmatprep.subr.bf16.mxu1 %v7755_v54 }
 0x19b   : > { %5581 = vmatpush1.bf16.msra.mxu0 %v7750_v55  ;;  %5839 = vmatpush1.bf16.msra.mxu1 %v7753_v56 }
 0x19c   : > { %5582 = vmatprep.subr.bf16.mxu0 %v7758_v57  ;;  %5840 = vmatprep.subr.bf16.mxu1 %v7761_v58 }
 0x19f   : > { %5583 = vmatpush1.bf16.msra.mxu0 %v7756_v6  ;;  %5841 = vmatpush1.bf16.msra.mxu1 %v7759_v7 }
 0x1a0   : > { %5584 = vmatprep.subr.bf16.mxu0 %v7764_v59  ;;  %5842 = vmatprep.subr.bf16.mxu1 %v7767_v47 }
 0x1a3   : > { %5585 = vmatpush1.bf16.msra.mxu0 %v7762_v48  ;;  %5843 = vmatpush1.bf16.msra.mxu1 %v7765_v60 }
 0x1a4   : > { %5586 = vmatprep.subr.bf16.mxu0 %v7770_v62  ;;  %5844 = vmatprep.subr.bf16.mxu1 %v7773_v63 }
 0x1a7   : > { %5587 = vmatpush1.bf16.msra.mxu0 %v7768_v0  ;;  %5845 = vmatpush1.bf16.msra.mxu1 %v7771_v1 }
 0x1a8   : > { %5588 = vmatprep.subr.bf16.mxu0 %v7776_v2  ;;  %5846 = vmatprep.subr.bf16.mxu1 %v7779_v26 }
 0x1ab   : > { %5589 = vmatpush1.bf16.msra.mxu0 %v7774_v27  ;;  %5847 = vmatpush1.bf16.msra.mxu1 %v7777_v3 }
 0x1ac   : > { %5590 = vmatprep.subr.bf16.mxu0 %v7782_v5  ;;  %5848 = vmatprep.subr.bf16.mxu1 %v7785_v8 }
 0x1af   : > { %5591 = vmatpush1.bf16.msra.mxu0 %v7780_v9  ;;  %5849 = vmatpush1.bf16.msra.mxu1 %v7783_v10 }
 0x1b0   : > { %5592 = vmatprep.subr.bf16.mxu0 %v7788_v11  ;;  %5850 = vmatprep.subr.bf16.mxu1 %v7791_v12 }
 0x1b3   : > { %5593 = vmatpush1.bf16.msra.mxu0 %v7786_v13  ;;  %5851 = vmatpush1.bf16.msra.mxu1 %v7789_v14 }
 0x1b4   : > { %5594 = vmatprep.subr.bf16.mxu0 %v7794_v15  ;;  %5852 = vmatprep.subr.bf16.mxu1 %v7797_v16 }
 0x1b7   : > { %5595 = vmatpush1.bf16.msra.mxu0 %v7792_v17  ;;  %5853 = vmatpush1.bf16.msra.mxu1 %v7795_v18 }
 0x1b8   : > { %5596 = vmatprep.subr.bf16.mxu0 %v7800_v19  ;;  %5854 = vmatprep.subr.bf16.mxu1 %v7803_v20 }
 0x1bb   : > { %5597 = vmatpush1.bf16.msra.mxu0 %v7798_v21  ;;  %5855 = vmatpush1.bf16.msra.mxu1 %v7801_v22 }
 0x1bc   : > { %5598 = vmatprep.subr.bf16.mxu0 %v7806_v23  ;;  %5856 = vmatprep.subr.bf16.mxu1 %v7809_v24 }
 0x1bf   : > { %5599 = vmatpush1.bf16.msra.mxu0 %v7804_v25  ;;  %5857 = vmatpush1.bf16.msra.mxu1 %v7807_v28 }
 0x1c0   : > { %5600 = vmatprep.subr.bf16.mxu0 %v7812_v29  ;;  %5858 = vmatprep.subr.bf16.mxu1 %v7815_v30 }
 0x1c3   : > { %5601 = vmatpush1.bf16.msra.mxu0 %v7810_v31  ;;  %5859 = vmatpush1.bf16.msra.mxu1 %v7813_v32 }
 0x1c4   : > { %5613 = vmatprep.subr.bf16.mxu0 %v7818_v33  ;;  %5871 = vmatprep.subr.bf16.mxu1 %v7821_v34 }
 0x259   : > { %v2909_v45 = vpop.f32.mrb[0].mxu0  ;;  %v3167_v46 = vpop.f32.mrb[0].mxu1 }
 0x25a   : > { %v7039_v50 = vadd.f32 %v2909_v45, %v723_v41  ;;  %v7043_v51 = vadd.f32 %v3167_v46, %v731_v42  ;;  %v2911_v49 = vpop.f32.mrb[1].mxu0  ;;  %v3169_v52 = vpop.f32.mrb[1].mxu1  ;;  %v7816_v45 = vld [vmem:[%s10964_s3 + $0x200] ss:$16 sps:$4 sm:$0xff]   ;;  %v7819_v46 = vld [vmem:[%s10964_s3 + $0x208] ss:$16 sps:$4 sm:$0xff]  }
 0x25b   : > { %v7040_v53 = vadd.f32 %v2911_v49, %v727_v43  ;;  %v7044_v54 = vadd.f32 %v3169_v52, %v735_v44  ;;  %v2913_v55 = vpop.f32.mrb[2].mxu0  ;;  %v3171_v56 = vpop.f32.mrb[2].mxu1 }
 0x25c   : > { %v3176_v57 = vmax.f32 %v7039_v50, 0.0  ;;  %v3178_v58 = vmax.f32 %v7043_v51, 0.0  ;;  %v7041_v6 = vadd.f32 %v2913_v55, %v723_v41  ;;  %v7045_v7 = vadd.f32 %v3171_v56, %v731_v42  ;;  %v2915_v59 = vpop.f32.mrb[3].mxu0  ;;  %v3173_v47 = vpop.f32.mrb[3].mxu1  ;;  %v7824_v56 = vld [vmem:[%s10964_s3 + $0x224] ss:$16 sps:$4 sm:$0xff]  }
 0x25d   : > { %v3177_v48 = vmax.f32 %v7040_v53, 0.0  ;;  %v3179_v60 = vmax.f32 %v7044_v54, 0.0  ;;  %v7042_v62 = vadd.f32 %v2915_v59, %v727_v43  ;;  %v7046_v63 = vadd.f32 %v3173_v47, %v735_v44  ;;  %v7822_v47 = vld [vmem:[%s10964_s3 + $0x220] ss:$16 sps:$4 sm:$0xff]  }
 0x25e   : > { %v3184_v0 = vrot.slane %v3176_v57, 7  ;;  %v3208_v1 = vrot.slane %v3176_v57, 1  ;;  %v3186_v2 = vrot.slane %v3178_v58, 7  ;;  %v3210_v26 = vrot.slane %v3178_v58, 1 }
 0x25f   : > { %v3185_v27 = vrot.slane %v3177_v48, 7  ;;  %v3180_v3 = vmax.f32 %v7041_v6, 0.0  ;;  %v3182_v5 = vmax.f32 %v7045_v7, 0.0  ;;  %v3181_v8 = vmax.f32 %v7042_v62, 0.0  ;;  %v7833_v62 = vld [vmem:[%s10964_s3 + $0x24c] ss:$16 sps:$4 sm:$0xff]  }
 0x260   : > { %v3209_v9 = vrot.slane %v3177_v48, 1  ;;  %v3187_v10 = vrot.slane %v3179_v60, 7  ;;  %v3211_v11 = vrot.slane %v3179_v60, 1  ;;  %v3183_v12 = vmax.f32 %v7046_v63, 0.0  ;;  %v7828_v63 = vld [vmem:[%s10964_s3 + $0x240] ss:$16 sps:$4 sm:$0xff]  }
 0x261   : > { %v3188_v13 = vrot.slane %v3180_v3, 7  ;;  %v3212_v14 = vrot.slane %v3180_v3, 1  ;;  %v9870_v15 = vpack.c.bf16 %v3180_v3, %v3176_v57  ;;  %v3190_v16 = vrot.slane %v3182_v5, 7  ;;  %v7827_v57 = vld [vmem:[%s10964_s3 + $0x22c] ss:$16 sps:$4 sm:$0xff]  }
 0x262   : > { %v3214_v17 = vrot.slane %v3182_v5, 1  ;;  %v9872_v18 = vpack.c.bf16 %v3182_v5, %v3178_v58  ;;  %v3189_v19 = vrot.slane %v3181_v8, 7  ;;  %v3213_v20 = vrot.slane %v3181_v8, 1  ;;  %v7842_v3 = vld [vmem:[%s10964_s3 + $0x284] ss:$16 sps:$4 sm:$0xff]  }
 0x263   : > { %v3192_v21 = vsel %vm280_vm0, %v3184_v0, %v3188_v13  ;;  %v3196_v22 = vsel %vm280_vm0, %v3188_v13, %v3184_v0  ;;  %v3216_v23 = vsel %vm305_vm4, %v3208_v1, %v3212_v14  ;;  %v3220_v24 = vsel %vm305_vm4, %v3212_v14, %v3208_v1  ;;  %v7831_v0 = vld [vmem:[%s10964_s3 + $0x248] ss:$16 sps:$4 sm:$0xff]   ;;  %v7836_v1 = vld [vmem:[%s10964_s3 + $0x264] ss:$16 sps:$4 sm:$0xff]   ;;  %v7845_v5 = vld [vmem:[%s10964_s3 + $0x28c] ss:$16 sps:$4 sm:$0xff]  }
 0x264   : > { %v6991_v25 = vpack.c.bf16 %v3192_v21, %v3196_v22  ;;  %v9882_v28 = vpack.c.bf16 %v3220_v24, %v3216_v23  ;;  %v3194_v29 = vsel %vm280_vm0, %v3186_v2, %v3190_v16  ;;  %v3198_v30 = vsel %vm280_vm0, %v3190_v16, %v3186_v2  ;;  %v7839_v2 = vld [vmem:[%s10964_s3 + $0x26c] ss:$16 sps:$4 sm:$0xff]   ;;  %v7849_v13 = vld [vmem:[%s10964_s3 + $0x2a8] ss:$16 sps:$4 sm:$0xff]   ;;  %v7854_v14 = vld [vmem:[%s10964_s3 + $0x2c4] ss:$16 sps:$4 sm:$0xff]  }
 0x265   : > { %v3218_v31 = vsel %vm305_vm4, %v3210_v26, %v3214_v17  ;;  %v3222_v32 = vsel %vm305_vm4, %v3214_v17, %v3210_v26  ;;  %v9892_v33 = vpack.c.bf16 %v3194_v29, %v3198_v30  ;;  %v3191_v34 = vrot.slane %v3183_v12, 7  ;;  %v7834_v26 = vld [vmem:[%s10964_s3 + $0x260] ss:$16 sps:$4 sm:$0xff]   ;;  %v7857_v16 = vld [vmem:[%s10964_s3 + $0x2cc] ss:$16 sps:$4 sm:$0xff]  }
 0x266   : > { %v9894_v37 = vpack.c.bf16 %v3222_v32, %v3218_v31  ;;  %v3215_v41 = vrot.slane %v3183_v12, 1  ;;  %v3193_v42 = vsel %vm280_vm0, %v3185_v27, %v3189_v19  ;;  %v3197_v43 = vsel %vm280_vm0, %v3189_v19, %v3185_v27  ;;  %v7837_v27 = vld [vmem:[%s10964_s3 + $0x268] ss:$16 sps:$4 sm:$0xff]   ;;  %v7852_v17 = vld [vmem:[%s10964_s3 + $0x2c0] ss:$16 sps:$4 sm:$0xff]  }
 0x267   : > { %v6988_v44 = vpack.c.bf16 %v3193_v42, %v3197_v43  ;;  %v3195_v50 = vsel %vm280_vm0, %v3187_v10, %v3191_v34  ;;  %v3199_v51 = vsel %vm280_vm0, %v3191_v34, %v3187_v10  ;;  %v9910_v49 = vpack.c.bf16 %v3181_v8, %v3177_v48  ;;  %v7825_v48 = vld [vmem:[%s10964_s3 + $0x228] ss:$16 sps:$4 sm:$0xff]   ;;  %v7840_v8 = vld [vmem:[%s10964_s3 + $0x280] ss:$16 sps:$4 sm:$0xff]   ;;  %v7848_v10 = vld [vmem:[%s10964_s3 + $0x2a4] ss:$16 sps:$4 sm:$0xff]  }
 0x268   : > { %v6994_v52 = vpack.c.bf16 %v3195_v50, %v3199_v51  ;;  %v9912_v53 = vpack.c.bf16 %v3183_v12, %v3179_v60  ;;  %v3217_v54 = vsel %vm305_vm4, %v3209_v9, %v3213_v20  ;;  %v3221_v55 = vsel %vm305_vm4, %v3213_v20, %v3209_v9  ;;  %v7830_v60 = vld [vmem:[%s10964_s3 + $0x244] ss:$16 sps:$4 sm:$0xff]   ;;  %v7843_v9 = vld [vmem:[%s10964_s3 + $0x288] ss:$16 sps:$4 sm:$0xff]   ;;  %v7846_v12 = vld [vmem:[%s10964_s3 + $0x2a0] ss:$16 sps:$4 sm:$0xff]  }
 0x269   : > { %6989 = vmatprep.mubr.msk.bf16.mxu0 %vm8547_vm3, %v6988_v44  ;;  %7013 = vmatprep.mubr.msk.bf16.mxu1 %vm8547_vm3, %v6988_v44  ;;  %v9928_v58 = vpack.c.bf16 %v3221_v55, %v3217_v54  ;;  %v3219_v6 = vsel %vm305_vm4, %v3211_v11, %v3215_v41  ;;  %v3223_v7 = vsel %vm305_vm4, %v3215_v41, %v3211_v11  ;;  %v7851_v11 = vld [vmem:[%s10964_s3 + $0x2ac] ss:$16 sps:$4 sm:$0xff]   ;;  %v7855_v19 = vld [vmem:[%s10964_s3 + $0x2c8] ss:$16 sps:$4 sm:$0xff]   ;;  %v7860_v20 = vld [vmem:[%s10964_s3 + $0x2e4] ss:$16 sps:$4 sm:$0xff]  }
 0x26a   : > { %6992 = vmatmul.mubr.msk.bf16.vlgmr.msra.gmra.mrb[4].mxu0 %vm8547_vm3, %v6991_v25  ;;  %7016 = vmatmul.mubr.msk.bf16.vlgmr.msra.gmra.mrb[4].mxu1 %vm8547_vm3, %v6991_v25  ;;  %v9938_v59 = vpack.c.bf16 %v3223_v7, %v3219_v6  ;;  %v7863_v21 = vld [vmem:[%s10964_s3 + $0x2ec] ss:$16 sps:$4 sm:$0xff]   ;;  %v7858_v22 = vld [vmem:[%s10964_s3 + $0x2e0] ss:$16 sps:$4 sm:$0xff]   ;;  %v7861_v23 = vld [vmem:[%s10964_s3 + $0x2e8] ss:$16 sps:$4 sm:$0xff]  }
 0x26b   : > { %5614 = vmatpush1.bf16.msra.mxu0 %v7816_v45  ;;  %5872 = vmatpush1.bf16.msra.mxu1 %v7819_v46  ;;  %v7866_v24 = vld [vmem:[%s10964_s3 + $0x304] ss:$16 sps:$4 sm:$0xff]   ;;  %v7869_v25 = vld [vmem:[%s10964_s3 + $0x30c] ss:$16 sps:$4 sm:$0xff]   ;;  %v7864_v29 = vld [vmem:[%s10964_s3 + $0x300] ss:$16 sps:$4 sm:$0xff]  }
 0x26c   : > { %6995 = vmatprep.mubr.msk.bf16.mxu0 %vm8547_vm3, %v6994_v52  ;;  %7019 = vmatprep.mubr.msk.bf16.mxu1 %vm8547_vm3, %v6994_v52  ;;  %v7867_v30 = vld [vmem:[%s10964_s3 + $0x308] ss:$16 sps:$4 sm:$0xff]   ;;  %v7872_v31 = vld [vmem:[%s10964_s3 + $0x324] ss:$16 sps:$4 sm:$0xff]   ;;  %v7875_v32 = vld [vmem:[%s10964_s3 + $0x32c] ss:$16 sps:$4 sm:$0xff]  }
 0x26d   : > { %5615 = vmatprep.subr.bf16.mxu0 %v7824_v56  ;;  %5873 = vmatprep.subr.bf16.mxu1 %v7827_v57  ;;  %v7870_v34 = vld [vmem:[%s10964_s3 + $0x320] ss:$16 sps:$4 sm:$0xff]   ;;  %v7873_v41 = vld [vmem:[%s10964_s3 + $0x328] ss:$16 sps:$4 sm:$0xff]   ;;  %v7878_v42 = vld [vmem:[%s10964_s3 + $0x344] ss:$16 sps:$4 sm:$0xff]  }
 0x26e   : > { %v7881_v43 = vld [vmem:[%s10964_s3 + $0x34c] ss:$16 sps:$4 sm:$0xff]   ;;  %v7876_v44 = vld [vmem:[%s10964_s3 + $0x340] ss:$16 sps:$4 sm:$0xff]   ;;  %v7879_v45 = vld [vmem:[%s10964_s3 + $0x348] ss:$16 sps:$4 sm:$0xff]  }
 0x26f   : > { %5616 = vmatpush1.bf16.msra.mxu0 %v7822_v47  ;;  %5874 = vmatpush1.bf16.msra.mxu1 %v7825_v48  ;;  %v7884_v46 = vld [vmem:[%s10964_s3 + $0x364] ss:$16 sps:$4 sm:$0xff]   ;;  %v7887_v50 = vld [vmem:[%s10964_s3 + $0x36c] ss:$16 sps:$4 sm:$0xff]   ;;  %v7882_v51 = vld [vmem:[%s10964_s3 + $0x360] ss:$16 sps:$4 sm:$0xff]  }
 0x270   : > { %5617 = vmatprep.subr.bf16.mxu0 %v7830_v60  ;;  %5875 = vmatprep.subr.bf16.mxu1 %v7833_v62  ;;  %v7885_v52 = vld [vmem:[%s10964_s3 + $0x368] ss:$16 sps:$4 sm:$0xff]   ;;  %v7890_v54 = vld [vmem:[%s10964_s3 + $0x384] ss:$16 sps:$4 sm:$0xff]   ;;  %v7893_v55 = vld [vmem:[%s10964_s3 + $0x38c] ss:$16 sps:$4 sm:$0xff]  }
 0x271   : > { %v7888_v56 = vld [vmem:[%s10964_s3 + $0x380] ss:$16 sps:$4 sm:$0xff]   ;;  %v7891_v57 = vld [vmem:[%s10964_s3 + $0x388] ss:$16 sps:$4 sm:$0xff]   ;;  %v7896_v6 = vld [vmem:[%s10964_s3 + $0x3a4] ss:$16 sps:$4 sm:$0xff]  }
 0x272   : > { %v7899_v7 = vld [vmem:[%s10964_s3 + $0x3ac] ss:$16 sps:$4 sm:$0xff]   ;;  %v7894_v47 = vld [vmem:[%s10964_s3 + $0x3a0] ss:$16 sps:$4 sm:$0xff]   ;;  %v7897_v48 = vld [vmem:[%s10964_s3 + $0x3a8] ss:$16 sps:$4 sm:$0xff]  }
 0x273   : > { %5618 = vmatpush1.bf16.msra.mxu0 %v7828_v63  ;;  %5876 = vmatpush1.bf16.msra.mxu1 %v7831_v0  ;;  %v7902_v60 = vld [vmem:[%s10964_s3 + $0x3c4] ss:$16 sps:$4 sm:$0xff]   ;;  %v7905_v62 = vld [vmem:[%s10964_s3 + $0x3cc] ss:$16 sps:$4 sm:$0xff]   ;;  %v7900_v63 = vld [vmem:[%s10964_s3 + $0x3c0] ss:$16 sps:$4 sm:$0xff]  }
 0x274   : > { %5619 = vmatprep.subr.bf16.mxu0 %v7836_v1  ;;  %5877 = vmatprep.subr.bf16.mxu1 %v7839_v2  ;;  %v7903_v0 = vld [vmem:[%s10964_s3 + $0x3c8] ss:$16 sps:$4 sm:$0xff]   ;;  %v7908_v1 = vld [vmem:[%s10964_s3 + $0x3e4] ss:$16 sps:$4 sm:$0xff]   ;;  %v7911_v2 = vld [vmem:[%s10964_s3 + $0x3ec] ss:$16 sps:$4 sm:$0xff]  }
 0x277   : > { %5620 = vmatpush1.bf16.msra.mxu0 %v7834_v26  ;;  %5878 = vmatpush1.bf16.msra.mxu1 %v7837_v27  ;;  %v7906_v26 = vld [vmem:[%s10964_s3 + $0x3e0] ss:$16 sps:$4 sm:$0xff]   ;;  %v7909_v27 = vld [vmem:[%s10964_s3 + $0x3e8] ss:$16 sps:$4 sm:$0xff]  }
 0x278   : > { %5621 = vmatprep.subr.bf16.mxu0 %v7842_v3  ;;  %5879 = vmatprep.subr.bf16.mxu1 %v7845_v5  ;;  %v7914_v3 = vld [vmem:[%s10964_s3 + $0x404] ss:$16 sps:$4 sm:$0xff]   ;;  %v7917_v5 = vld [vmem:[%s10964_s3 + $0x40c] ss:$16 sps:$4 sm:$0xff]  }
 0x27b   : > { %5622 = vmatpush1.bf16.msra.mxu0 %v7840_v8  ;;  %5880 = vmatpush1.bf16.msra.mxu1 %v7843_v9  ;;  %v7912_v8 = vld [vmem:[%s10964_s3 + $0x400] ss:$16 sps:$4 sm:$0xff]   ;;  %v7915_v9 = vld [vmem:[%s10964_s3 + $0x408] ss:$16 sps:$4 sm:$0xff]  }
 0x27c   : > { %5623 = vmatprep.subr.bf16.mxu0 %v7848_v10  ;;  %5881 = vmatprep.subr.bf16.mxu1 %v7851_v11  ;;  %v7920_v10 = vld [vmem:[%s10964_s3 + $0x424] ss:$16 sps:$4 sm:$0xff]   ;;  %v7923_v11 = vld [vmem:[%s10964_s3 + $0x42c] ss:$16 sps:$4 sm:$0xff]  }
 0x27f   : > { %5624 = vmatpush1.bf16.msra.mxu0 %v7846_v12  ;;  %5882 = vmatpush1.bf16.msra.mxu1 %v7849_v13  ;;  %v7918_v12 = vld [vmem:[%s10964_s3 + $0x420] ss:$16 sps:$4 sm:$0xff]   ;;  %v7921_v13 = vld [vmem:[%s10964_s3 + $0x428] ss:$16 sps:$4 sm:$0xff]  }
 0x280   : > { %5625 = vmatprep.subr.bf16.mxu0 %v7854_v14  ;;  %5883 = vmatprep.subr.bf16.mxu1 %v7857_v16  ;;  %v7926_v14 = vld [vmem:[%s10964_s3 + $0x444] ss:$16 sps:$4 sm:$0xff]  }
 0x281   : > { %v7932_v16 = vld [vmem:[%s10964_s3 + $0x464] ss:$16 sps:$4 sm:$0xff]  }
 0x283   : > { %5626 = vmatpush1.bf16.msra.mxu0 %v7852_v17  ;;  %5884 = vmatpush1.bf16.msra.mxu1 %v7855_v19  ;;  %v7935_v17 = vld [vmem:[%s10964_s3 + $0x46c] ss:$16 sps:$4 sm:$0xff]   ;;  %v7930_v19 = vld [vmem:[%s10964_s3 + $0x460] ss:$16 sps:$4 sm:$0xff]  }
 0x284   : > { %5627 = vmatprep.subr.bf16.mxu0 %v7860_v20  ;;  %5885 = vmatprep.subr.bf16.mxu1 %v7863_v21  ;;  %v7933_v20 = vld [vmem:[%s10964_s3 + $0x468] ss:$16 sps:$4 sm:$0xff]   ;;  %v7938_v21 = vld [vmem:[%s10964_s3 + $0x484] ss:$16 sps:$4 sm:$0xff]  }
 0x287   : > { %5628 = vmatpush1.bf16.msra.mxu0 %v7858_v22  ;;  %5886 = vmatpush1.bf16.msra.mxu1 %v7861_v23  ;;  %v7941_v22 = vld [vmem:[%s10964_s3 + $0x48c] ss:$16 sps:$4 sm:$0xff]   ;;  %v7936_v23 = vld [vmem:[%s10964_s3 + $0x480] ss:$16 sps:$4 sm:$0xff]  }
 0x288   : > { %5629 = vmatprep.subr.bf16.mxu0 %v7866_v24  ;;  %5887 = vmatprep.subr.bf16.mxu1 %v7869_v25  ;;  %v7939_v24 = vld [vmem:[%s10964_s3 + $0x488] ss:$16 sps:$4 sm:$0xff]   ;;  %v7944_v25 = vld [vmem:[%s10964_s3 + $0x4a4] ss:$16 sps:$4 sm:$0xff]  }
 0x28b   : > { %5630 = vmatpush1.bf16.msra.mxu0 %v7864_v29  ;;  %5888 = vmatpush1.bf16.msra.mxu1 %v7867_v30  ;;  %v7947_v29 = vld [vmem:[%s10964_s3 + $0x4ac] ss:$16 sps:$4 sm:$0xff]   ;;  %v7942_v30 = vld [vmem:[%s10964_s3 + $0x4a0] ss:$16 sps:$4 sm:$0xff]  }
 0x28c   : > { %5631 = vmatprep.subr.bf16.mxu0 %v7872_v31  ;;  %5889 = vmatprep.subr.bf16.mxu1 %v7875_v32  ;;  %v7945_v31 = vld [vmem:[%s10964_s3 + $0x4a8] ss:$16 sps:$4 sm:$0xff]   ;;  %v7950_v32 = vld [vmem:[%s10964_s3 + $0x4c4] ss:$16 sps:$4 sm:$0xff]  }
 0x28f   : > { %5632 = vmatpush1.bf16.msra.mxu0 %v7870_v34  ;;  %5890 = vmatpush1.bf16.msra.mxu1 %v7873_v41  ;;  %v7953_v34 = vld [vmem:[%s10964_s3 + $0x4cc] ss:$16 sps:$4 sm:$0xff]   ;;  %v7948_v41 = vld [vmem:[%s10964_s3 + $0x4c0] ss:$16 sps:$4 sm:$0xff]  }
 0x290   : > { %5633 = vmatprep.subr.bf16.mxu0 %v7878_v42  ;;  %5891 = vmatprep.subr.bf16.mxu1 %v7881_v43  ;;  %v7951_v42 = vld [vmem:[%s10964_s3 + $0x4c8] ss:$16 sps:$4 sm:$0xff]   ;;  %v7956_v43 = vld [vmem:[%s10964_s3 + $0x4e4] ss:$16 sps:$4 sm:$0xff]  }
 0x293   : > { %5634 = vmatpush1.bf16.msra.mxu0 %v7876_v44  ;;  %5892 = vmatpush1.bf16.msra.mxu1 %v7879_v45  ;;  %v7959_v44 = vld [vmem:[%s10964_s3 + $0x4ec] ss:$16 sps:$4 sm:$0xff]   ;;  %v7954_v45 = vld [vmem:[%s10964_s3 + $0x4e0] ss:$16 sps:$4 sm:$0xff]  }
 0x294   : > { %5635 = vmatprep.subr.bf16.mxu0 %v7884_v46  ;;  %5893 = vmatprep.subr.bf16.mxu1 %v7887_v50  ;;  %v7957_v46 = vld [vmem:[%s10964_s3 + $0x4e8] ss:$16 sps:$4 sm:$0xff]   ;;  %v7962_v50 = vld [vmem:[%s10964_s3 + $0x504] ss:$16 sps:$4 sm:$0xff]  }
 0x297   : > { %5636 = vmatpush1.bf16.msra.mxu0 %v7882_v51  ;;  %5894 = vmatpush1.bf16.msra.mxu1 %v7885_v52  ;;  %v7965_v51 = vld [vmem:[%s10964_s3 + $0x50c] ss:$16 sps:$4 sm:$0xff]   ;;  %v7960_v52 = vld [vmem:[%s10964_s3 + $0x500] ss:$16 sps:$4 sm:$0xff]  }
 0x298   : > { %5637 = vmatprep.subr.bf16.mxu0 %v7890_v54  ;;  %5895 = vmatprep.subr.bf16.mxu1 %v7893_v55  ;;  %v7963_v54 = vld [vmem:[%s10964_s3 + $0x508] ss:$16 sps:$4 sm:$0xff]   ;;  %v7968_v55 = vld [vmem:[%s10964_s3 + $0x524] ss:$16 sps:$4 sm:$0xff]  }
 0x29b   : > { %5638 = vmatpush1.bf16.msra.mxu0 %v7888_v56  ;;  %5896 = vmatpush1.bf16.msra.mxu1 %v7891_v57  ;;  %v7971_v56 = vld [vmem:[%s10964_s3 + $0x52c] ss:$16 sps:$4 sm:$0xff]   ;;  %v7966_v57 = vld [vmem:[%s10964_s3 + $0x520] ss:$16 sps:$4 sm:$0xff]  }
 0x29c   : > { %5639 = vmatprep.subr.bf16.mxu0 %v7896_v6  ;;  %5897 = vmatprep.subr.bf16.mxu1 %v7899_v7  ;;  %v7969_v6 = vld [vmem:[%s10964_s3 + $0x528] ss:$16 sps:$4 sm:$0xff]   ;;  %v7974_v7 = vld [vmem:[%s10964_s3 + $0x544] ss:$16 sps:$4 sm:$0xff]  }
 0x29f   : > { %5640 = vmatpush1.bf16.msra.mxu0 %v7894_v47  ;;  %5898 = vmatpush1.bf16.msra.mxu1 %v7897_v48  ;;  %v7977_v47 = vld [vmem:[%s10964_s3 + $0x54c] ss:$16 sps:$4 sm:$0xff]   ;;  %v7972_v48 = vld [vmem:[%s10964_s3 + $0x540] ss:$16 sps:$4 sm:$0xff]  }
 0x2a0   : > { %5641 = vmatprep.subr.bf16.mxu0 %v7902_v60  ;;  %5899 = vmatprep.subr.bf16.mxu1 %v7905_v62  ;;  %v7975_v60 = vld [vmem:[%s10964_s3 + $0x548] ss:$16 sps:$4 sm:$0xff]   ;;  %v7980_v62 = vld [vmem:[%s10964_s3 + $0x564] ss:$16 sps:$4 sm:$0xff]  }
 0x2a3   : > { %5642 = vmatpush1.bf16.msra.mxu0 %v7900_v63  ;;  %5900 = vmatpush1.bf16.msra.mxu1 %v7903_v0  ;;  %v7983_v63 = vld [vmem:[%s10964_s3 + $0x56c] ss:$16 sps:$4 sm:$0xff]   ;;  %v7978_v0 = vld [vmem:[%s10964_s3 + $0x560] ss:$16 sps:$4 sm:$0xff]  }
 0x2a4   : > { %5643 = vmatprep.subr.bf16.mxu0 %v7908_v1  ;;  %5901 = vmatprep.subr.bf16.mxu1 %v7911_v2  ;;  %v7981_v1 = vld [vmem:[%s10964_s3 + $0x568] ss:$16 sps:$4 sm:$0xff]   ;;  %v7986_v2 = vld [vmem:[%s10964_s3 + $0x584] ss:$16 sps:$4 sm:$0xff]  }
 0x2a7   : > { %5644 = vmatpush1.bf16.msra.mxu0 %v7906_v26  ;;  %5902 = vmatpush1.bf16.msra.mxu1 %v7909_v27  ;;  %v7989_v26 = vld [vmem:[%s10964_s3 + $0x58c] ss:$16 sps:$4 sm:$0xff]   ;;  %v7984_v27 = vld [vmem:[%s10964_s3 + $0x580] ss:$16 sps:$4 sm:$0xff]  }
 0x2a8   : > { %5656 = vmatprep.subr.bf16.mxu0 %v7914_v3  ;;  %5914 = vmatprep.subr.bf16.mxu1 %v7917_v5  ;;  %v7987_v3 = vld [vmem:[%s10964_s3 + $0x588] ss:$16 sps:$4 sm:$0xff]   ;;  %v7992_v5 = vld [vmem:[%s10964_s3 + $0x5a4] ss:$16 sps:$4 sm:$0xff]  }
 0x2aa   : > { %6998 = vmatmul.mubr.msk.bf16.vlgmr.msra.gmra.mrb[4].mxu0 %vm8547_vm3, %v9892_v33  ;;  %7022 = vmatmul.mubr.msk.bf16.vlgmr.msra.gmra.mrb[4].mxu1 %vm8547_vm3, %v9892_v33  ;;  %v7924_v33 = vld [vmem:[%s10964_s3 + $0x440] ss:$16 sps:$4 sm:$0xff]  }
 0x2ab   : > { %5657 = vmatpush1.bf16.msra.mxu0 %v7912_v8  ;;  %5688 = vmatprep.mubr.bf16.mxu0 %v9910_v49  ;;  %v7995_v8 = vld [vmem:[%s10964_s3 + $0x5ac] ss:$16 sps:$4 sm:$0xff]  }
 0x2ac   : > { %5915 = vmatpush1.bf16.msra.mxu1 %v7915_v9  ;;  %5946 = vmatprep.mubr.bf16.mxu1 %v9910_v49  ;;  %v7927_v49 = vld [vmem:[%s10964_s3 + $0x448] ss:$16 sps:$4 sm:$0xff]   ;;  %v7990_v9 = vld [vmem:[%s10964_s3 + $0x5a0] ss:$16 sps:$4 sm:$0xff]  }
 0x2ad   : > { %5658 = vmatprep.subr.bf16.mxu0 %v7920_v10  ;;  %5916 = vmatprep.subr.bf16.mxu1 %v7923_v11  ;;  %v7993_v10 = vld [vmem:[%s10964_s3 + $0x5a8] ss:$16 sps:$4 sm:$0xff]   ;;  %v7998_v11 = vld [vmem:[%s10964_s3 + $0x5c4] ss:$16 sps:$4 sm:$0xff]  }
 0x2af   : > { %5659 = vmatpush1.bf16.msra.mxu0 %v7918_v12  ;;  %v8001_v12 = vld [vmem:[%s10964_s3 + $0x5cc] ss:$16 sps:$4 sm:$0xff]  }
 0x2b0   : > { %5917 = vmatpush1.bf16.msra.mxu1 %v7921_v13  ;;  %5660 = vmatprep.subr.bf16.mxu0 %v7926_v14  ;;  %v7996_v13 = vld [vmem:[%s10964_s3 + $0x5c0] ss:$16 sps:$4 sm:$0xff]   ;;  %v7999_v14 = vld [vmem:[%s10964_s3 + $0x5c8] ss:$16 sps:$4 sm:$0xff]  }
 0x2b1   : > { %5918 = vmatprep.subr.bf16.mxu1 %v7929_v61  ;;  %v8004_v61 = vld [vmem:[%s10964_s3 + $0x5e4] ss:$16 sps:$4 sm:$0xff]  }
 0x2b3   : > { %5661 = vmatpush1.bf16.msra.mxu0 %v7924_v33  ;;  %v8007_v33 = vld [vmem:[%s10964_s3 + $0x5ec] ss:$16 sps:$4 sm:$0xff]  }
 0x2b4   : > { %5919 = vmatpush1.bf16.msra.mxu1 %v7927_v49  ;;  %5662 = vmatprep.subr.bf16.mxu0 %v7932_v16  ;;  %v8002_v49 = vld [vmem:[%s10964_s3 + $0x5e0] ss:$16 sps:$4 sm:$0xff]   ;;  %v8005_v16 = vld [vmem:[%s10964_s3 + $0x5e8] ss:$16 sps:$4 sm:$0xff]  }
 0x2b5   : > { %5920 = vmatprep.subr.bf16.mxu1 %v7935_v17  ;;  %v8010_v17 = vld [vmem:[%s10964_s3 + $0x604] ss:$16 sps:$4 sm:$0xff]  }
 0x2b7   : > { %5663 = vmatpush1.bf16.msra.mxu0 %v7930_v19  ;;  %v8013_v19 = vld [vmem:[%s10964_s3 + $0x60c] ss:$16 sps:$4 sm:$0xff]  }
 0x2b8   : > { %5921 = vmatpush1.bf16.msra.mxu1 %v7933_v20  ;;  %5664 = vmatprep.subr.bf16.mxu0 %v7938_v21  ;;  %v8008_v20 = vld [vmem:[%s10964_s3 + $0x600] ss:$16 sps:$4 sm:$0xff]   ;;  %v8011_v21 = vld [vmem:[%s10964_s3 + $0x608] ss:$16 sps:$4 sm:$0xff]  }
 0x2b9   : > { %5922 = vmatprep.subr.bf16.mxu1 %v7941_v22  ;;  %v8016_v22 = vld [vmem:[%s10964_s3 + $0x624] ss:$16 sps:$4 sm:$0xff]  }
 0x2bb   : > { %5665 = vmatpush1.bf16.msra.mxu0 %v7936_v23  ;;  %v8019_v23 = vld [vmem:[%s10964_s3 + $0x62c] ss:$16 sps:$4 sm:$0xff]  }
 0x2bc   : > { %5923 = vmatpush1.bf16.msra.mxu1 %v7939_v24  ;;  %5666 = vmatprep.subr.bf16.mxu0 %v7944_v25  ;;  %v8014_v24 = vld [vmem:[%s10964_s3 + $0x620] ss:$16 sps:$4 sm:$0xff]   ;;  %v8017_v25 = vld [vmem:[%s10964_s3 + $0x628] ss:$16 sps:$4 sm:$0xff]  }
 0x2bd   : > { %5924 = vmatprep.subr.bf16.mxu1 %v7947_v29  ;;  %v8022_v29 = vld [vmem:[%s10964_s3 + $0x644] ss:$16 sps:$4 sm:$0xff]  }
 0x2bf   : > { %5667 = vmatpush1.bf16.msra.mxu0 %v7942_v30  ;;  %v8020_v30 = vld [vmem:[%s10964_s3 + $0x640] ss:$16 sps:$4 sm:$0xff]  }
 0x2c0   : > { %5925 = vmatpush1.bf16.msra.mxu1 %v7945_v31  ;;  %5668 = vmatprep.subr.bf16.mxu0 %v7950_v32  ;;  %v8023_v31 = vld [vmem:[%s10964_s3 + $0x648] ss:$16 sps:$4 sm:$0xff]   ;;  %v8031_v32 = vld [vmem:[%s10964_s3 + $0x66c] ss:$16 sps:$4 sm:$0xff]  }
 0x2c1   : > { %5926 = vmatprep.subr.bf16.mxu1 %v7953_v34  ;;  %v8026_v34 = vld [vmem:[%s10964_s3 + $0x660] ss:$16 sps:$4 sm:$0xff]  }
 0x2c3   : > { %5669 = vmatpush1.bf16.msra.mxu0 %v7948_v41  ;;  %v8029_v41 = vld [vmem:[%s10964_s3 + $0x668] ss:$16 sps:$4 sm:$0xff]  }
 0x2c4   : > { %5927 = vmatpush1.bf16.msra.mxu1 %v7951_v42  ;;  %5670 = vmatprep.subr.bf16.mxu0 %v7956_v43  ;;  %v8034_v42 = vld [vmem:[%s10964_s3 + $0x684] ss:$16 sps:$4 sm:$0xff]   ;;  %v8037_v43 = vld [vmem:[%s10964_s3 + $0x68c] ss:$16 sps:$4 sm:$0xff]  }
 0x2c5   : > { %5928 = vmatprep.subr.bf16.mxu1 %v7959_v44  ;;  %v8032_v44 = vld [vmem:[%s10964_s3 + $0x680] ss:$16 sps:$4 sm:$0xff]  }
 0x2c7   : > { %5671 = vmatpush1.bf16.msra.mxu0 %v7954_v45  ;;  %v8035_v45 = vld [vmem:[%s10964_s3 + $0x688] ss:$16 sps:$4 sm:$0xff]  }
 0x2c8   : > { %5929 = vmatpush1.bf16.msra.mxu1 %v7957_v46  ;;  %5672 = vmatprep.subr.bf16.mxu0 %v7962_v50  ;;  %v8040_v46 = vld [vmem:[%s10964_s3 + $0x6a4] ss:$16 sps:$4 sm:$0xff]   ;;  %v8043_v50 = vld [vmem:[%s10964_s3 + $0x6ac] ss:$16 sps:$4 sm:$0xff]  }
 0x2c9   : > { %5930 = vmatprep.subr.bf16.mxu1 %v7965_v51  ;;  %v8038_v51 = vld [vmem:[%s10964_s3 + $0x6a0] ss:$16 sps:$4 sm:$0xff]  }
 0x2cb   : > { %5673 = vmatpush1.bf16.msra.mxu0 %v7960_v52  ;;  %v8041_v52 = vld [vmem:[%s10964_s3 + $0x6a8] ss:$16 sps:$4 sm:$0xff]  }
 0x2cc   : > { %5931 = vmatpush1.bf16.msra.mxu1 %v7963_v54  ;;  %5674 = vmatprep.subr.bf16.mxu0 %v7968_v55  ;;  %v8046_v54 = vld [vmem:[%s10964_s3 + $0x6c4] ss:$16 sps:$4 sm:$0xff]   ;;  %v8049_v55 = vld [vmem:[%s10964_s3 + $0x6cc] ss:$16 sps:$4 sm:$0xff]  }
 0x2cd   : > { %5932 = vmatprep.subr.bf16.mxu1 %v7971_v56  ;;  %v8044_v56 = vld [vmem:[%s10964_s3 + $0x6c0] ss:$16 sps:$4 sm:$0xff]  }
 0x2cf   : > { %5675 = vmatpush1.bf16.msra.mxu0 %v7966_v57  ;;  %v8047_v57 = vld [vmem:[%s10964_s3 + $0x6c8] ss:$16 sps:$4 sm:$0xff]  }
 0x2d0   : > { %5933 = vmatpush1.bf16.msra.mxu1 %v7969_v6  ;;  %5676 = vmatprep.subr.bf16.mxu0 %v7974_v7  ;;  %v8052_v6 = vld [vmem:[%s10964_s3 + $0x6e4] ss:$16 sps:$4 sm:$0xff]   ;;  %v8055_v7 = vld [vmem:[%s10964_s3 + $0x6ec] ss:$16 sps:$4 sm:$0xff]  }
 0x2d1   : > { %5934 = vmatprep.subr.bf16.mxu1 %v7977_v47  ;;  %v8050_v47 = vld [vmem:[%s10964_s3 + $0x6e0] ss:$16 sps:$4 sm:$0xff]  }
 0x2d3   : > { %5677 = vmatpush1.bf16.msra.mxu0 %v7972_v48  ;;  %v8053_v48 = vld [vmem:[%s10964_s3 + $0x6e8] ss:$16 sps:$4 sm:$0xff]  }
 0x2d4   : > { %5935 = vmatpush1.bf16.msra.mxu1 %v7975_v60  ;;  %5678 = vmatprep.subr.bf16.mxu0 %v7980_v62  ;;  %v8058_v60 = vld [vmem:[%s10964_s3 + $0x704] ss:$16 sps:$4 sm:$0xff]   ;;  %v8061_v62 = vld [vmem:[%s10964_s3 + $0x70c] ss:$16 sps:$4 sm:$0xff]  }
 0x2d5   : > { %5936 = vmatprep.subr.bf16.mxu1 %v7983_v63  ;;  %v8056_v63 = vld [vmem:[%s10964_s3 + $0x700] ss:$16 sps:$4 sm:$0xff]  }
 0x2d7   : > { %5679 = vmatpush1.bf16.msra.mxu0 %v7978_v0  ;;  %v8059_v0 = vld [vmem:[%s10964_s3 + $0x708] ss:$16 sps:$4 sm:$0xff]  }
 0x2d8   : > { %5937 = vmatpush1.bf16.msra.mxu1 %v7981_v1  ;;  %5680 = vmatprep.subr.bf16.mxu0 %v7986_v2  ;;  %v8064_v1 = vld [vmem:[%s10964_s3 + $0x724] ss:$16 sps:$4 sm:$0xff]   ;;  %v8067_v2 = vld [vmem:[%s10964_s3 + $0x72c] ss:$16 sps:$4 sm:$0xff]  }
 0x2d9   : > { %5938 = vmatprep.subr.bf16.mxu1 %v7989_v26  ;;  %v8062_v26 = vld [vmem:[%s10964_s3 + $0x720] ss:$16 sps:$4 sm:$0xff]  }
 0x2db   : > { %5681 = vmatpush1.bf16.msra.mxu0 %v7984_v27  ;;  %v8065_v27 = vld [vmem:[%s10964_s3 + $0x728] ss:$16 sps:$4 sm:$0xff]  }
 0x2dc   : > { %5939 = vmatpush1.bf16.msra.mxu1 %v7987_v3  ;;  %5682 = vmatprep.subr.bf16.mxu0 %v7992_v5  ;;  %v8070_v3 = vld [vmem:[%s10964_s3 + $0x744] ss:$16 sps:$4 sm:$0xff]   ;;  %v8073_v5 = vld [vmem:[%s10964_s3 + $0x74c] ss:$16 sps:$4 sm:$0xff]  }
 0x2dd   : > { %5940 = vmatprep.subr.bf16.mxu1 %v7995_v8  ;;  %v8068_v8 = vld [vmem:[%s10964_s3 + $0x740] ss:$16 sps:$4 sm:$0xff]  }
 0x2df   : > { %5683 = vmatpush1.bf16.msra.mxu0 %v7990_v9  ;;  %v8071_v9 = vld [vmem:[%s10964_s3 + $0x748] ss:$16 sps:$4 sm:$0xff]  }
 0x2e0   : > { %5941 = vmatpush1.bf16.msra.mxu1 %v7993_v10  ;;  %5684 = vmatprep.subr.bf16.mxu0 %v7998_v11  ;;  %v8076_v10 = vld [vmem:[%s10964_s3 + $0x764] ss:$16 sps:$4 sm:$0xff]   ;;  %v8079_v11 = vld [vmem:[%s10964_s3 + $0x76c] ss:$16 sps:$4 sm:$0xff]  }
 0x2e1   : > { %5942 = vmatprep.subr.bf16.mxu1 %v8001_v12  ;;  %v8074_v12 = vld [vmem:[%s10964_s3 + $0x760] ss:$16 sps:$4 sm:$0xff]  }
 0x2e3   : > { %5685 = vmatpush1.bf16.msra.mxu0 %v7996_v13  ;;  %v8077_v13 = vld [vmem:[%s10964_s3 + $0x768] ss:$16 sps:$4 sm:$0xff]  }
 0x2e4   : > { %5943 = vmatpush1.bf16.msra.mxu1 %v7999_v14  ;;  %5686 = vmatprep.subr.bf16.mxu0 %v8004_v61  ;;  %v8082_v14 = vld [vmem:[%s10964_s3 + $0x784] ss:$16 sps:$4 sm:$0xff]   ;;  %v8085_v61 = vld [vmem:[%s10964_s3 + $0x78c] ss:$16 sps:$4 sm:$0xff]  }
 0x2e5   : > { %5944 = vmatprep.subr.bf16.mxu1 %v8007_v33  ;;  %v8080_v33 = vld [vmem:[%s10964_s3 + $0x780] ss:$16 sps:$4 sm:$0xff]  }
 0x2e7   : > { %5687 = vmatpush1.bf16.msra.mxu0 %v8002_v49  ;;  %v8083_v49 = vld [vmem:[%s10964_s3 + $0x788] ss:$16 sps:$4 sm:$0xff]  }
 0x2e8   : > { %5945 = vmatpush1.bf16.msra.mxu1 %v8005_v16  ;;  %5699 = vmatprep.subr.bf16.mxu0 %v8010_v17  ;;  %v8088_v16 = vld [vmem:[%s10964_s3 + $0x7a4] ss:$16 sps:$4 sm:$0xff]   ;;  %v8091_v17 = vld [vmem:[%s10964_s3 + $0x7ac] ss:$16 sps:$4 sm:$0xff]  }
 0x2e9   : > { %5957 = vmatprep.subr.bf16.mxu1 %v8013_v19  ;;  %v8086_v19 = vld [vmem:[%s10964_s3 + $0x7a0] ss:$16 sps:$4 sm:$0xff]  }
 0x2ea   : > { %5689 = vmatmul.mubr.bf16.vlgmr.msra.gmra.mrb[4].mxu0 %v9870_v15 }
 0x2eb   : > { %5947 = vmatmul.mubr.bf16.vlgmr.msra.gmra.mrb[4].mxu1 %v9870_v15  ;;  %5700 = vmatpush1.bf16.msra.mxu0 %v8008_v20  ;;  %v8025_v15 = vld [vmem:[%s10964_s3 + $0x64c] ss:$16 sps:$4 sm:$0xff]   ;;  %v8089_v20 = vld [vmem:[%s10964_s3 + $0x7a8] ss:$16 sps:$4 sm:$0xff]  }
 0x2ec   : > { %5731 = vmatprep.mubr.bf16.mxu0 %v9912_v53  ;;  %5958 = vmatpush1.bf16.msra.mxu1 %v8011_v21  ;;  %v8094_v21 = vld [vmem:[%s10964_s3 + $0x7c4] ss:$16 sps:$4 sm:$0xff]  }
 0x2ed   : > { %5989 = vmatprep.mubr.bf16.mxu1 %v9912_v53  ;;  %5701 = vmatprep.subr.bf16.mxu0 %v8016_v22  ;;  %v8028_v53 = vld [vmem:[%s10964_s3 + $0x664] ss:$16 sps:$4 sm:$0xff]   ;;  %v8097_v22 = vld [vmem:[%s10964_s3 + $0x7cc] ss:$16 sps:$4 sm:$0xff]  }
 0x2ee   : > { %5959 = vmatprep.subr.bf16.mxu1 %v8019_v23  ;;  %v8092_v23 = vld [vmem:[%s10964_s3 + $0x7c0] ss:$16 sps:$4 sm:$0xff]  }
 0x2ef   : > { %5702 = vmatpush1.bf16.msra.mxu0 %v8014_v24  ;;  %v8095_v24 = vld [vmem:[%s10964_s3 + $0x7c8] ss:$16 sps:$4 sm:$0xff]  }
 0x2f0   : > { %5960 = vmatpush1.bf16.msra.mxu1 %v8017_v25  ;;  %5703 = vmatprep.subr.bf16.mxu0 %v8022_v29  ;;  %v8100_v25 = vld [vmem:[%s10964_s3 + $0x7e4] ss:$16 sps:$4 sm:$0xff]   ;;  %v8103_v29 = vld [vmem:[%s10964_s3 + $0x7ec] ss:$16 sps:$4 sm:$0xff]  }
 0x2f1   : > { %5961 = vmatprep.subr.bf16.mxu1 %v8025_v15  ;;  %v8098_v15 = vld [vmem:[%s10964_s3 + $0x7e0] ss:$16 sps:$4 sm:$0xff]  }
 0x2f3   : > { %5704 = vmatpush1.bf16.msra.mxu0 %v8020_v30  ;;  %v8101_v30 = vld [vmem:[%s10964_s3 + $0x7e8] ss:$16 sps:$4 sm:$0xff]  }
 0x2f4   : > { %5962 = vmatpush1.bf16.msra.mxu1 %v8023_v31  ;;  %5705 = vmatprep.subr.bf16.mxu0 %v8028_v53  ;;  %v8106_v31 = vld [vmem:[%s10964_s3 + $0x804] ss:$16 sps:$4 sm:$0xff]   ;;  %v8109_v53 = vld [vmem:[%s10964_s3 + $0x80c] ss:$16 sps:$4 sm:$0xff]  }
 0x2f5   : > { %5963 = vmatprep.subr.bf16.mxu1 %v8031_v32  ;;  %v8104_v32 = vld [vmem:[%s10964_s3 + $0x800] ss:$16 sps:$4 sm:$0xff]  }
 0x2f7   : > { %5706 = vmatpush1.bf16.msra.mxu0 %v8026_v34  ;;  %v8107_v34 = vld [vmem:[%s10964_s3 + $0x808] ss:$16 sps:$4 sm:$0xff]  }
 0x2f8   : > { %5964 = vmatpush1.bf16.msra.mxu1 %v8029_v41  ;;  %5707 = vmatprep.subr.bf16.mxu0 %v8034_v42  ;;  %v8112_v41 = vld [vmem:[%s10964_s3 + $0x824] ss:$16 sps:$4 sm:$0xff]   ;;  %v8115_v42 = vld [vmem:[%s10964_s3 + $0x82c] ss:$16 sps:$4 sm:$0xff]  }
 0x2f9   : > { %5965 = vmatprep.subr.bf16.mxu1 %v8037_v43  ;;  %v8110_v43 = vld [vmem:[%s10964_s3 + $0x820] ss:$16 sps:$4 sm:$0xff]  }
 0x2fb   : > { %5708 = vmatpush1.bf16.msra.mxu0 %v8032_v44  ;;  %v8113_v44 = vld [vmem:[%s10964_s3 + $0x828] ss:$16 sps:$4 sm:$0xff]  }
 0x2fc   : > { %5966 = vmatpush1.bf16.msra.mxu1 %v8035_v45  ;;  %5709 = vmatprep.subr.bf16.mxu0 %v8040_v46  ;;  %v8118_v45 = vld [vmem:[%s10964_s3 + $0x844] ss:$16 sps:$4 sm:$0xff]   ;;  %v8116_v46 = vld [vmem:[%s10964_s3 + $0x840] ss:$16 sps:$4 sm:$0xff]  }
 0x2fd   : > { %5967 = vmatprep.subr.bf16.mxu1 %v8043_v50  ;;  %v8119_v50 = vld [vmem:[%s10964_s3 + $0x848] ss:$16 sps:$4 sm:$0xff]  }
 0x2ff   : > { %5710 = vmatpush1.bf16.msra.mxu0 %v8038_v51  ;;  %v8127_v51 = vld [vmem:[%s10964_s3 + $0x86c] ss:$16 sps:$4 sm:$0xff]  }
 0x300   : > { %5968 = vmatpush1.bf16.msra.mxu1 %v8041_v52  ;;  %5711 = vmatprep.subr.bf16.mxu0 %v8046_v54  ;;  %v8122_v52 = vld [vmem:[%s10964_s3 + $0x860] ss:$16 sps:$4 sm:$0xff]   ;;  %v8125_v54 = vld [vmem:[%s10964_s3 + $0x868] ss:$16 sps:$4 sm:$0xff]  }
 0x301   : > { %5969 = vmatprep.subr.bf16.mxu1 %v8049_v55  ;;  %v8130_v55 = vld [vmem:[%s10964_s3 + $0x884] ss:$16 sps:$4 sm:$0xff]  }
 0x303   : > { %5712 = vmatpush1.bf16.msra.mxu0 %v8044_v56  ;;  %v8133_v56 = vld [vmem:[%s10964_s3 + $0x88c] ss:$16 sps:$4 sm:$0xff]  }
 0x304   : > { %5970 = vmatpush1.bf16.msra.mxu1 %v8047_v57  ;;  %5713 = vmatprep.subr.bf16.mxu0 %v8052_v6  ;;  %v8128_v57 = vld [vmem:[%s10964_s3 + $0x880] ss:$16 sps:$4 sm:$0xff]   ;;  %v8131_v6 = vld [vmem:[%s10964_s3 + $0x888] ss:$16 sps:$4 sm:$0xff]  }
 0x305   : > { %5971 = vmatprep.subr.bf16.mxu1 %v8055_v7  ;;  %v8136_v7 = vld [vmem:[%s10964_s3 + $0x8a4] ss:$16 sps:$4 sm:$0xff]  }
 0x307   : > { %5714 = vmatpush1.bf16.msra.mxu0 %v8050_v47  ;;  %v8139_v47 = vld [vmem:[%s10964_s3 + $0x8ac] ss:$16 sps:$4 sm:$0xff]  }
 0x308   : > { %5972 = vmatpush1.bf16.msra.mxu1 %v8053_v48  ;;  %5715 = vmatprep.subr.bf16.mxu0 %v8058_v60  ;;  %v8134_v48 = vld [vmem:[%s10964_s3 + $0x8a0] ss:$16 sps:$4 sm:$0xff]   ;;  %v8137_v60 = vld [vmem:[%s10964_s3 + $0x8a8] ss:$16 sps:$4 sm:$0xff]  }
 0x309   : > { %5973 = vmatprep.subr.bf16.mxu1 %v8061_v62  ;;  %v8142_v62 = vld [vmem:[%s10964_s3 + $0x8c4] ss:$16 sps:$4 sm:$0xff]  }
 0x30b   : > { %5716 = vmatpush1.bf16.msra.mxu0 %v8056_v63  ;;  %v8145_v63 = vld [vmem:[%s10964_s3 + $0x8cc] ss:$16 sps:$4 sm:$0xff]  }
 0x30c   : > { %5974 = vmatpush1.bf16.msra.mxu1 %v8059_v0  ;;  %5717 = vmatprep.subr.bf16.mxu0 %v8064_v1  ;;  %v8140_v0 = vld [vmem:[%s10964_s3 + $0x8c0] ss:$16 sps:$4 sm:$0xff]   ;;  %v8143_v1 = vld [vmem:[%s10964_s3 + $0x8c8] ss:$16 sps:$4 sm:$0xff]  }
 0x30d   : > { %5975 = vmatprep.subr.bf16.mxu1 %v8067_v2  ;;  %v8148_v2 = vld [vmem:[%s10964_s3 + $0x8e4] ss:$16 sps:$4 sm:$0xff]  }
 0x30f   : > { %5718 = vmatpush1.bf16.msra.mxu0 %v8062_v26  ;;  %v8151_v26 = vld [vmem:[%s10964_s3 + $0x8ec] ss:$16 sps:$4 sm:$0xff]  }
 0x310   : > { %5976 = vmatpush1.bf16.msra.mxu1 %v8065_v27  ;;  %5719 = vmatprep.subr.bf16.mxu0 %v8070_v3  ;;  %v8146_v27 = vld [vmem:[%s10964_s3 + $0x8e0] ss:$16 sps:$4 sm:$0xff]   ;;  %v8149_v3 = vld [vmem:[%s10964_s3 + $0x8e8] ss:$16 sps:$4 sm:$0xff]  }
 0x311   : > { %5977 = vmatprep.subr.bf16.mxu1 %v8073_v5  ;;  %v8154_v5 = vld [vmem:[%s10964_s3 + $0x904] ss:$16 sps:$4 sm:$0xff]  }
 0x313   : > { %5720 = vmatpush1.bf16.msra.mxu0 %v8068_v8  ;;  %v8157_v8 = vld [vmem:[%s10964_s3 + $0x90c] ss:$16 sps:$4 sm:$0xff]  }
 0x314   : > { %5978 = vmatpush1.bf16.msra.mxu1 %v8071_v9  ;;  %5721 = vmatprep.subr.bf16.mxu0 %v8076_v10  ;;  %v8152_v9 = vld [vmem:[%s10964_s3 + $0x900] ss:$16 sps:$4 sm:$0xff]   ;;  %v8155_v10 = vld [vmem:[%s10964_s3 + $0x908] ss:$16 sps:$4 sm:$0xff]  }
 0x315   : > { %5979 = vmatprep.subr.bf16.mxu1 %v8079_v11  ;;  %v8160_v11 = vld [vmem:[%s10964_s3 + $0x924] ss:$16 sps:$4 sm:$0xff]  }
 0x317   : > { %5722 = vmatpush1.bf16.msra.mxu0 %v8074_v12  ;;  %v8163_v12 = vld [vmem:[%s10964_s3 + $0x92c] ss:$16 sps:$4 sm:$0xff]  }
 0x318   : > { %5980 = vmatpush1.bf16.msra.mxu1 %v8077_v13  ;;  %5723 = vmatprep.subr.bf16.mxu0 %v8082_v14  ;;  %v8158_v13 = vld [vmem:[%s10964_s3 + $0x920] ss:$16 sps:$4 sm:$0xff]   ;;  %v8161_v14 = vld [vmem:[%s10964_s3 + $0x928] ss:$16 sps:$4 sm:$0xff]  }
 0x319   : > { %5981 = vmatprep.subr.bf16.mxu1 %v8085_v61  ;;  %v8166_v61 = vld [vmem:[%s10964_s3 + $0x944] ss:$16 sps:$4 sm:$0xff]  }
 0x31b   : > { %5724 = vmatpush1.bf16.msra.mxu0 %v8080_v33  ;;  %v8169_v33 = vld [vmem:[%s10964_s3 + $0x94c] ss:$16 sps:$4 sm:$0xff]  }
 0x31c   : > { %5982 = vmatpush1.bf16.msra.mxu1 %v8083_v49  ;;  %5725 = vmatprep.subr.bf16.mxu0 %v8088_v16  ;;  %v8164_v49 = vld [vmem:[%s10964_s3 + $0x940] ss:$16 sps:$4 sm:$0xff]   ;;  %v8167_v16 = vld [vmem:[%s10964_s3 + $0x948] ss:$16 sps:$4 sm:$0xff]  }
 0x31d   : > { %5983 = vmatprep.subr.bf16.mxu1 %v8091_v17  ;;  %v8172_v17 = vld [vmem:[%s10964_s3 + $0x964] ss:$16 sps:$4 sm:$0xff]  }
 0x31f   : > { %5726 = vmatpush1.bf16.msra.mxu0 %v8086_v19  ;;  %v8175_v19 = vld [vmem:[%s10964_s3 + $0x96c] ss:$16 sps:$4 sm:$0xff]  }
 0x320   : > { %5984 = vmatpush1.bf16.msra.mxu1 %v8089_v20  ;;  %5727 = vmatprep.subr.bf16.mxu0 %v8094_v21  ;;  %v8170_v20 = vld [vmem:[%s10964_s3 + $0x960] ss:$16 sps:$4 sm:$0xff]   ;;  %v8173_v21 = vld [vmem:[%s10964_s3 + $0x968] ss:$16 sps:$4 sm:$0xff]  }
 0x321   : > { %5985 = vmatprep.subr.bf16.mxu1 %v8097_v22  ;;  %v8178_v22 = vld [vmem:[%s10964_s3 + $0x984] ss:$16 sps:$4 sm:$0xff]  }
 0x323   : > { %5728 = vmatpush1.bf16.msra.mxu0 %v8092_v23  ;;  %v8181_v23 = vld [vmem:[%s10964_s3 + $0x98c] ss:$16 sps:$4 sm:$0xff]  }
 0x324   : > { %5986 = vmatpush1.bf16.msra.mxu1 %v8095_v24  ;;  %5729 = vmatprep.subr.bf16.mxu0 %v8100_v25  ;;  %v8176_v24 = vld [vmem:[%s10964_s3 + $0x980] ss:$16 sps:$4 sm:$0xff]   ;;  %v8179_v25 = vld [vmem:[%s10964_s3 + $0x988] ss:$16 sps:$4 sm:$0xff]  }
 0x325   : > { %5987 = vmatprep.subr.bf16.mxu1 %v8103_v29  ;;  %v8184_v29 = vld [vmem:[%s10964_s3 + $0x9a4] ss:$16 sps:$4 sm:$0xff]  }
 0x327   : > { %5730 = vmatpush1.bf16.msra.mxu0 %v8098_v15  ;;  %v8187_v15 = vld [vmem:[%s10964_s3 + $0x9ac] ss:$16 sps:$4 sm:$0xff]  }
 0x328   : > { %5988 = vmatpush1.bf16.msra.mxu1 %v8101_v30  ;;  %5742 = vmatprep.subr.bf16.mxu0 %v8106_v31  ;;  %v8182_v30 = vld [vmem:[%s10964_s3 + $0x9a0] ss:$16 sps:$4 sm:$0xff]   ;;  %v8185_v31 = vld [vmem:[%s10964_s3 + $0x9a8] ss:$16 sps:$4 sm:$0xff]  }
 0x329   : > { %6000 = vmatprep.subr.bf16.mxu1 %v8109_v53  ;;  %v8190_v53 = vld [vmem:[%s10964_s3 + $0x9c4] ss:$16 sps:$4 sm:$0xff]  }
 0x32a   : > { %5732 = vmatmul.mubr.bf16.vlgmr.msra.gmra.mrb[4].mxu0 %v9872_v18 }
 0x32b   : > { %5990 = vmatmul.mubr.bf16.vlgmr.msra.gmra.mrb[4].mxu1 %v9872_v18  ;;  %5743 = vmatpush1.bf16.msra.mxu0 %v8104_v32  ;;  %v8121_v18 = vld [vmem:[%s10964_s3 + $0x84c] ss:$16 sps:$4 sm:$0xff]  }
 0x32c   : > { %7001 = vmatprep.mubr.msk.bf16.mxu0 %vm9253_vm6, %v9928_v58  ;;  %6001 = vmatpush1.bf16.msra.mxu1 %v8107_v34  ;;  %v8193_v32 = vld [vmem:[%s10964_s3 + $0x9cc] ss:$16 sps:$4 sm:$0xff]   ;;  %v8188_v34 = vld [vmem:[%s10964_s3 + $0x9c0] ss:$16 sps:$4 sm:$0xff]  }
 0x32d   : > { %7025 = vmatprep.mubr.msk.bf16.mxu1 %vm9253_vm6, %v9928_v58  ;;  %5744 = vmatprep.subr.bf16.mxu0 %v8112_v41  ;;  %v8124_v58 = vld [vmem:[%s10964_s3 + $0x864] ss:$16 sps:$4 sm:$0xff]   ;;  %v8191_v41 = vld [vmem:[%s10964_s3 + $0x9c8] ss:$16 sps:$4 sm:$0xff]  }
 0x32e   : > { %6002 = vmatprep.subr.bf16.mxu1 %v8115_v42  ;;  %v8196_v42 = vld [vmem:[%s10964_s3 + $0x9e4] ss:$16 sps:$4 sm:$0xff]  }
 0x32f   : > { %5745 = vmatpush1.bf16.msra.mxu0 %v8110_v43  ;;  %v8199_v43 = vld [vmem:[%s10964_s3 + $0x9ec] ss:$16 sps:$4 sm:$0xff]  }
 0x330   : > { %6003 = vmatpush1.bf16.msra.mxu1 %v8113_v44  ;;  %5746 = vmatprep.subr.bf16.mxu0 %v8118_v45  ;;  %v8194_v44 = vld [vmem:[%s10964_s3 + $0x9e0] ss:$16 sps:$4 sm:$0xff]   ;;  %v8197_v45 = vld [vmem:[%s10964_s3 + $0x9e8] ss:$16 sps:$4 sm:$0xff]  }
 0x331   : > { %6004 = vmatprep.subr.bf16.mxu1 %v8121_v18  ;;  %v8202_v18 = vld [vmem:[%s10964_s3 + $0xa04] ss:$16 sps:$4 sm:$0xff]  }
 0x333   : > { %5747 = vmatpush1.bf16.msra.mxu0 %v8116_v46  ;;  %v8205_v46 = vld [vmem:[%s10964_s3 + $0xa0c] ss:$16 sps:$4 sm:$0xff]  }
 0x334   : > { %6005 = vmatpush1.bf16.msra.mxu1 %v8119_v50  ;;  %5748 = vmatprep.subr.bf16.mxu0 %v8124_v58  ;;  %v8200_v50 = vld [vmem:[%s10964_s3 + $0xa00] ss:$16 sps:$4 sm:$0xff]   ;;  %v8203_v58 = vld [vmem:[%s10964_s3 + $0xa08] ss:$16 sps:$4 sm:$0xff]  }
 0x335   : > { %6006 = vmatprep.subr.bf16.mxu1 %v8127_v51  ;;  %v8208_v51 = vld [vmem:[%s10964_s3 + $0xa24] ss:$16 sps:$4 sm:$0xff]  }
 0x337   : > { %5749 = vmatpush1.bf16.msra.mxu0 %v8122_v52  ;;  %v8211_v52 = vld [vmem:[%s10964_s3 + $0xa2c] ss:$16 sps:$4 sm:$0xff]  }
 0x338   : > { %6007 = vmatpush1.bf16.msra.mxu1 %v8125_v54  ;;  %5750 = vmatprep.subr.bf16.mxu0 %v8130_v55  ;;  %v8206_v54 = vld [vmem:[%s10964_s3 + $0xa20] ss:$16 sps:$4 sm:$0xff]   ;;  %v8209_v55 = vld [vmem:[%s10964_s3 + $0xa28] ss:$16 sps:$4 sm:$0xff]  }
 0x339   : > { %6008 = vmatprep.subr.bf16.mxu1 %v8133_v56  ;;  %v8214_v56 = vld [vmem:[%s10964_s3 + $0xa44] ss:$16 sps:$4 sm:$0xff]  }
 0x33b   : > { %5751 = vmatpush1.bf16.msra.mxu0 %v8128_v57  ;;  %v8212_v57 = vld [vmem:[%s10964_s3 + $0xa40] ss:$16 sps:$4 sm:$0xff]  }
 0x33c   : > { %6009 = vmatpush1.bf16.msra.mxu1 %v8131_v6  ;;  %5752 = vmatprep.subr.bf16.mxu0 %v8136_v7  ;;  %v8215_v6 = vld [vmem:[%s10964_s3 + $0xa48] ss:$16 sps:$4 sm:$0xff]   ;;  %v8223_v7 = vld [vmem:[%s10964_s3 + $0xa6c] ss:$16 sps:$4 sm:$0xff]  }
 0x33d   : > { %6010 = vmatprep.subr.bf16.mxu1 %v8139_v47  ;;  %v8218_v47 = vld [vmem:[%s10964_s3 + $0xa60] ss:$16 sps:$4 sm:$0xff]  }
 0x33f   : > { %5753 = vmatpush1.bf16.msra.mxu0 %v8134_v48  ;;  %v8221_v48 = vld [vmem:[%s10964_s3 + $0xa68] ss:$16 sps:$4 sm:$0xff]  }
 0x340   : > { %6011 = vmatpush1.bf16.msra.mxu1 %v8137_v60  ;;  %5754 = vmatprep.subr.bf16.mxu0 %v8142_v62  ;;  %v8226_v60 = vld [vmem:[%s10964_s3 + $0xa84] ss:$16 sps:$4 sm:$0xff]   ;;  %v8229_v62 = vld [vmem:[%s10964_s3 + $0xa8c] ss:$16 sps:$4 sm:$0xff]  }
 0x341   : > { %6012 = vmatprep.subr.bf16.mxu1 %v8145_v63  ;;  %v8224_v63 = vld [vmem:[%s10964_s3 + $0xa80] ss:$16 sps:$4 sm:$0xff]  }
 0x343   : > { %5755 = vmatpush1.bf16.msra.mxu0 %v8140_v0  ;;  %v8227_v0 = vld [vmem:[%s10964_s3 + $0xa88] ss:$16 sps:$4 sm:$0xff]  }
 0x344   : > { %6013 = vmatpush1.bf16.msra.mxu1 %v8143_v1  ;;  %5756 = vmatprep.subr.bf16.mxu0 %v8148_v2  ;;  %v8232_v1 = vld [vmem:[%s10964_s3 + $0xaa4] ss:$16 sps:$4 sm:$0xff]   ;;  %v8235_v2 = vld [vmem:[%s10964_s3 + $0xaac] ss:$16 sps:$4 sm:$0xff]  }
 0x345   : > { %6014 = vmatprep.subr.bf16.mxu1 %v8151_v26  ;;  %v8230_v26 = vld [vmem:[%s10964_s3 + $0xaa0] ss:$16 sps:$4 sm:$0xff]  }
 0x347   : > { %5757 = vmatpush1.bf16.msra.mxu0 %v8146_v27  ;;  %v8233_v27 = vld [vmem:[%s10964_s3 + $0xaa8] ss:$16 sps:$4 sm:$0xff]  }
 0x348   : > { %6015 = vmatpush1.bf16.msra.mxu1 %v8149_v3  ;;  %5758 = vmatprep.subr.bf16.mxu0 %v8154_v5  ;;  %v8238_v3 = vld [vmem:[%s10964_s3 + $0xac4] ss:$16 sps:$4 sm:$0xff]   ;;  %v8241_v5 = vld [vmem:[%s10964_s3 + $0xacc] ss:$16 sps:$4 sm:$0xff]  }
 0x349   : > { %6016 = vmatprep.subr.bf16.mxu1 %v8157_v8  ;;  %v8236_v8 = vld [vmem:[%s10964_s3 + $0xac0] ss:$16 sps:$4 sm:$0xff]  }
 0x34b   : > { %5759 = vmatpush1.bf16.msra.mxu0 %v8152_v9  ;;  %v8239_v9 = vld [vmem:[%s10964_s3 + $0xac8] ss:$16 sps:$4 sm:$0xff]  }
 0x34c   : > { %6017 = vmatpush1.bf16.msra.mxu1 %v8155_v10  ;;  %5760 = vmatprep.subr.bf16.mxu0 %v8160_v11  ;;  %v8244_v10 = vld [vmem:[%s10964_s3 + $0xae4] ss:$16 sps:$4 sm:$0xff]   ;;  %v8247_v11 = vld [vmem:[%s10964_s3 + $0xaec] ss:$16 sps:$4 sm:$0xff]  }
 0x34d   : > { %6018 = vmatprep.subr.bf16.mxu1 %v8163_v12  ;;  %v8242_v12 = vld [vmem:[%s10964_s3 + $0xae0] ss:$16 sps:$4 sm:$0xff]  }
 0x34f   : > { %5761 = vmatpush1.bf16.msra.mxu0 %v8158_v13  ;;  %v8245_v13 = vld [vmem:[%s10964_s3 + $0xae8] ss:$16 sps:$4 sm:$0xff]  }
 0x350   : > { %6019 = vmatpush1.bf16.msra.mxu1 %v8161_v14  ;;  %5762 = vmatprep.subr.bf16.mxu0 %v8166_v61  ;;  %v8250_v14 = vld [vmem:[%s10964_s3 + $0xb04] ss:$16 sps:$4 sm:$0xff]   ;;  %v8253_v61 = vld [vmem:[%s10964_s3 + $0xb0c] ss:$16 sps:$4 sm:$0xff]  }
 0x351   : > { %6020 = vmatprep.subr.bf16.mxu1 %v8169_v33  ;;  %v8248_v33 = vld [vmem:[%s10964_s3 + $0xb00] ss:$16 sps:$4 sm:$0xff]  }
 0x353   : > { %5763 = vmatpush1.bf16.msra.mxu0 %v8164_v49  ;;  %v8251_v49 = vld [vmem:[%s10964_s3 + $0xb08] ss:$16 sps:$4 sm:$0xff]  }
 0x354   : > { %6021 = vmatpush1.bf16.msra.mxu1 %v8167_v16  ;;  %5764 = vmatprep.subr.bf16.mxu0 %v8172_v17  ;;  %v8256_v16 = vld [vmem:[%s10964_s3 + $0xb24] ss:$16 sps:$4 sm:$0xff]   ;;  %v8259_v17 = vld [vmem:[%s10964_s3 + $0xb2c] ss:$16 sps:$4 sm:$0xff]  }
 0x355   : > { %6022 = vmatprep.subr.bf16.mxu1 %v8175_v19  ;;  %v8254_v19 = vld [vmem:[%s10964_s3 + $0xb20] ss:$16 sps:$4 sm:$0xff]  }
 0x357   : > { %5765 = vmatpush1.bf16.msra.mxu0 %v8170_v20  ;;  %v8257_v20 = vld [vmem:[%s10964_s3 + $0xb28] ss:$16 sps:$4 sm:$0xff]  }
 0x358   : > { %6023 = vmatpush1.bf16.msra.mxu1 %v8173_v21  ;;  %5766 = vmatprep.subr.bf16.mxu0 %v8178_v22  ;;  %v8262_v21 = vld [vmem:[%s10964_s3 + $0xb44] ss:$16 sps:$4 sm:$0xff]   ;;  %v8265_v22 = vld [vmem:[%s10964_s3 + $0xb4c] ss:$16 sps:$4 sm:$0xff]  }
 0x359   : > { %6024 = vmatprep.subr.bf16.mxu1 %v8181_v23  ;;  %v8260_v23 = vld [vmem:[%s10964_s3 + $0xb40] ss:$16 sps:$4 sm:$0xff]  }
 0x35b   : > { %5767 = vmatpush1.bf16.msra.mxu0 %v8176_v24  ;;  %v8263_v24 = vld [vmem:[%s10964_s3 + $0xb48] ss:$16 sps:$4 sm:$0xff]  }
 0x35c   : > { %6025 = vmatpush1.bf16.msra.mxu1 %v8179_v25  ;;  %5768 = vmatprep.subr.bf16.mxu0 %v8184_v29  ;;  %v8268_v25 = vld [vmem:[%s10964_s3 + $0xb64] ss:$16 sps:$4 sm:$0xff]   ;;  %v8271_v29 = vld [vmem:[%s10964_s3 + $0xb6c] ss:$16 sps:$4 sm:$0xff]  }
 0x35d   : > { %6026 = vmatprep.subr.bf16.mxu1 %v8187_v15  ;;  %v8266_v15 = vld [vmem:[%s10964_s3 + $0xb60] ss:$16 sps:$4 sm:$0xff]  }
 0x35f   : > { %5769 = vmatpush1.bf16.msra.mxu0 %v8182_v30  ;;  %v8269_v30 = vld [vmem:[%s10964_s3 + $0xb68] ss:$16 sps:$4 sm:$0xff]  }
 0x360   : > { %6027 = vmatpush1.bf16.msra.mxu1 %v8185_v31  ;;  %5770 = vmatprep.subr.bf16.mxu0 %v8190_v53  ;;  %v8274_v31 = vld [vmem:[%s10964_s3 + $0xb84] ss:$16 sps:$4 sm:$0xff]   ;;  %v8277_v53 = vld [vmem:[%s10964_s3 + $0xb8c] ss:$16 sps:$4 sm:$0xff]  }
 0x361   : > { %6028 = vmatprep.subr.bf16.mxu1 %v8193_v32  ;;  %v8272_v32 = vld [vmem:[%s10964_s3 + $0xb80] ss:$16 sps:$4 sm:$0xff]  }
 0x363   : > { %5771 = vmatpush1.bf16.msra.mxu0 %v8188_v34  ;;  %v8275_v34 = vld [vmem:[%s10964_s3 + $0xb88] ss:$16 sps:$4 sm:$0xff]  }
 0x364   : > { %6029 = vmatpush1.bf16.msra.mxu1 %v8191_v41  ;;  %5772 = vmatprep.subr.bf16.mxu0 %v8196_v42  ;;  %v8280_v41 = vld [vmem:[%s10964_s3 + $0xba4] ss:$16 sps:$4 sm:$0xff]   ;;  %v8283_v42 = vld [vmem:[%s10964_s3 + $0xbac] ss:$16 sps:$4 sm:$0xff]  }
 0x365   : > { %6030 = vmatprep.subr.bf16.mxu1 %v8199_v43  ;;  %v8278_v43 = vld [vmem:[%s10964_s3 + $0xba0] ss:$16 sps:$4 sm:$0xff]  }
 0x367   : > { %5773 = vmatpush1.bf16.msra.mxu0 %v8194_v44  ;;  %v8281_v44 = vld [vmem:[%s10964_s3 + $0xba8] ss:$16 sps:$4 sm:$0xff]  }
 0x368   : > { %6031 = vmatpush1.bf16.msra.mxu1 %v8197_v45  ;;  %5785 = vmatprep.subr.bf16.mxu0 %v8202_v18  ;;  %v8286_v45 = vld [vmem:[%s10964_s3 + $0xbc4] ss:$16 sps:$4 sm:$0xff]   ;;  %v8289_v18 = vld [vmem:[%s10964_s3 + $0xbcc] ss:$16 sps:$4 sm:$0xff]  }
 0x369   : > { %6043 = vmatprep.subr.bf16.mxu1 %v8205_v46  ;;  %v8284_v46 = vld [vmem:[%s10964_s3 + $0xbc0] ss:$16 sps:$4 sm:$0xff]  }
 0x36a   : > { %7004 = vmatmul.mubr.msk.bf16.vlgmr.msra.gmra.mrb[4].mxu0 %vm9253_vm6, %v9882_v28 }
 0x36b   : > { %7028 = vmatmul.mubr.msk.bf16.vlgmr.msra.gmra.mrb[4].mxu1 %vm9253_vm6, %v9882_v28  ;;  %5786 = vmatpush1.bf16.msra.mxu0 %v8200_v50  ;;  %v8217_v28 = vld [vmem:[%s10964_s3 + $0xa4c] ss:$16 sps:$4 sm:$0xff]   ;;  %v8287_v50 = vld [vmem:[%s10964_s3 + $0xbc8] ss:$16 sps:$4 sm:$0xff]  }
 0x36c   : > { %7007 = vmatprep.mubr.msk.bf16.mxu0 %vm9253_vm6, %v9938_v59  ;;  %6044 = vmatpush1.bf16.msra.mxu1 %v8203_v58  ;;  %v8292_v58 = vld [vmem:[%s10964_s3 + $0xbe4] ss:$16 sps:$4 sm:$0xff]  }
 0x36d   : > { %7031 = vmatprep.mubr.msk.bf16.mxu1 %vm9253_vm6, %v9938_v59  ;;  %5787 = vmatprep.subr.bf16.mxu0 %v8208_v51  ;;  %v8220_v59 = vld [vmem:[%s10964_s3 + $0xa64] ss:$16 sps:$4 sm:$0xff]   ;;  %v8295_v51 = vld [vmem:[%s10964_s3 + $0xbec] ss:$16 sps:$4 sm:$0xff]  }
 0x36e   : > { %6045 = vmatprep.subr.bf16.mxu1 %v8211_v52  ;;  %v8290_v52 = vld [vmem:[%s10964_s3 + $0xbe0] ss:$16 sps:$4 sm:$0xff]  }
 0x36f   : > { %5788 = vmatpush1.bf16.msra.mxu0 %v8206_v54  ;;  %v8293_v54 = vld [vmem:[%s10964_s3 + $0xbe8] ss:$16 sps:$4 sm:$0xff]  }
 0x370   : > { %6046 = vmatpush1.bf16.msra.mxu1 %v8209_v55  ;;  %5789 = vmatprep.subr.bf16.mxu0 %v8214_v56  ;;  %v3628_v55 = vld [vmem:[%s10965_s4] sm:$0xf] }
 0x371   : > { %6047 = vmatprep.subr.bf16.mxu1 %v8217_v28  ;;  %v3633_v56 = vrot.slane %v3628_v55, %v722_v35  ;;  %v3641_v28 = vrot.slane %v3628_v55, %v730_v36 }
 0x373   : > { %5790 = vmatpush1.bf16.msra.mxu0 %v8212_v57  ;;  %v3637_v57 = vrot.slane %v3628_v55, %v726_v38 }
 0x374   : > { %6048 = vmatpush1.bf16.msra.mxu1 %v8215_v6  ;;  %5791 = vmatprep.subr.bf16.mxu0 %v8220_v59  ;;  %v3645_v6 = vrot.slane %v3628_v55, %v734_v39 }
 0x375   : > { %6049 = vmatprep.subr.bf16.mxu1 %v8223_v7 }
 0x377   : > { %5792 = vmatpush1.bf16.msra.mxu0 %v8218_v47 }
 0x378   : > { %6050 = vmatpush1.bf16.msra.mxu1 %v8221_v48  ;;  %5793 = vmatprep.subr.bf16.mxu0 %v8226_v60 }
 0x379   : > { %6051 = vmatprep.subr.bf16.mxu1 %v8229_v62 }
 0x37b   : > { %5794 = vmatpush1.bf16.msra.mxu0 %v8224_v63 }
 0x37c   : > { %6052 = vmatpush1.bf16.msra.mxu1 %v8227_v0  ;;  %5795 = vmatprep.subr.bf16.mxu0 %v8232_v1  ;;  %v8305_v0 = vld [vmem:[%s8503_s19 + $0x10] sm:$0xff] }
 0x37d   : > { %6053 = vmatprep.subr.bf16.mxu1 %v8235_v2  ;;  %v8306_v2 = vld [vmem:[%s8503_s19 + $0x8] sm:$0xff] }
 0x37f   : > { %5796 = vmatpush1.bf16.msra.mxu0 %v8230_v26 }
 0x380   : > { %6054 = vmatpush1.bf16.msra.mxu1 %v8233_v27  ;;  %5797 = vmatprep.subr.bf16.mxu0 %v8238_v3 }
 0x381   : > { %6055 = vmatprep.subr.bf16.mxu1 %v8241_v5 }
 0x383   : > { %5798 = vmatpush1.bf16.msra.mxu0 %v8236_v8  ;;  %v8307_v8 = vld [vmem:[%s8503_s19 + $0x18] sm:$0xff] }
 0x384   : > { %6056 = vmatpush1.bf16.msra.mxu1 %v8239_v9  ;;  %5799 = vmatprep.subr.bf16.mxu0 %v8244_v10  ;;  %v8308_v10 = vld [vmem:[%s8503_s19 + $0x20] sm:$0xff] }
 0x385   : > { %6057 = vmatprep.subr.bf16.mxu1 %v8247_v11 }
 0x387   : > { %5800 = vmatpush1.bf16.msra.mxu0 %v8242_v12 }
 0x388   : > { %6058 = vmatpush1.bf16.msra.mxu1 %v8245_v13  ;;  %5801 = vmatprep.subr.bf16.mxu0 %v8250_v14  ;;  %v8309_v13 = vld [vmem:[%s8503_s19 + $0x30] sm:$0xff] }
 0x389   : > { %6059 = vmatprep.subr.bf16.mxu1 %v8253_v61  ;;  %v8310_v61 = vld [vmem:[%s8503_s19 + $0x28] sm:$0xff] }
 0x38b   : > { %5802 = vmatpush1.bf16.msra.mxu0 %v8248_v33 }
 0x38c   : > { %6060 = vmatpush1.bf16.msra.mxu1 %v8251_v49  ;;  %5803 = vmatprep.subr.bf16.mxu0 %v8256_v16  ;;  %v8311_v49 = vld [vmem:[%s8503_s19 + $0x38] sm:$0xff] }
 0x38d   : > { %6061 = vmatprep.subr.bf16.mxu1 %v8259_v17 }
 0x38f   : > { %5804 = vmatpush1.bf16.msra.mxu0 %v8254_v19 }
 0x390   : > { %6062 = vmatpush1.bf16.msra.mxu1 %v8257_v20  ;;  %5805 = vmatprep.subr.bf16.mxu0 %v8262_v21 }
 0x391   : > { %6063 = vmatprep.subr.bf16.mxu1 %v8265_v22 }
 0x393   : > { %5806 = vmatpush1.bf16.msra.mxu0 %v8260_v23 }
 0x394   : > { %6064 = vmatpush1.bf16.msra.mxu1 %v8263_v24  ;;  %5807 = vmatprep.subr.bf16.mxu0 %v8268_v25 }
 0x395   : > { %6065 = vmatprep.subr.bf16.mxu1 %v8271_v29 }
 0x397   : > { %5808 = vmatpush1.bf16.msra.mxu0 %v8266_v15 }
 0x398   : > { %6066 = vmatpush1.bf16.msra.mxu1 %v8269_v30  ;;  %5809 = vmatprep.subr.bf16.mxu0 %v8274_v31 }
 0x399   : > { %6067 = vmatprep.subr.bf16.mxu1 %v8277_v53 }
 0x39b   : > { %5810 = vmatpush1.bf16.msra.mxu0 %v8272_v32 }
 0x39c   : > { %6068 = vmatpush1.bf16.msra.mxu1 %v8275_v34  ;;  %5811 = vmatprep.subr.bf16.mxu0 %v8280_v41 }
 0x39d   : > { %6069 = vmatprep.subr.bf16.mxu1 %v8283_v42 }
 0x39f   : > { %5812 = vmatpush1.bf16.msra.mxu0 %v8278_v43 }
 0x3a0   : > { %6070 = vmatpush1.bf16.msra.mxu1 %v8281_v44  ;;  %5813 = vmatprep.subr.bf16.mxu0 %v8286_v45 }
 0x3a1   : > { %6071 = vmatprep.subr.bf16.mxu1 %v8289_v18 }
 0x3a3   : > { %5814 = vmatpush1.bf16.msra.mxu0 %v8284_v46 }
 0x3a4   : > { %6072 = vmatpush1.bf16.msra.mxu1 %v8287_v50  ;;  %5815 = vmatprep.subr.bf16.mxu0 %v8292_v58 }
 0x3a5   : > { %6073 = vmatprep.subr.bf16.mxu1 %v8295_v51 }
 0x3a7   : > { %5816 = vmatpush1.bf16.msra.mxu0 %v8290_v52 }
 0x3a8   : > { %6074 = vmatpush1.bf16.msra.mxu1 %v8293_v54 }
 0x3aa   : > { %7010 = vmatmul.mubr.msk.bf16.vlgmr.msra.gmra.mrb[4].mxu0 %vm9253_vm6, %v9894_v37 }
 0x3ab   : > { %7034 = vmatmul.mubr.msk.bf16.vlgmr.msra.gmra.mrb[4].mxu1 %vm9253_vm6, %v9894_v37 }
 0x47d   : > { %v5819_v4 = vpop.f32.mrb[4].mxu0 }
 0x47e   : > { %v7047_v59 = vadd.f32 %v5819_v4, %v3633_v56  ;;  %v6077_v37 = vpop.f32.mrb[4].mxu1  ;;  %v5821_v7 = vpop.f32.mrb[5].mxu0 }
 0x47f   : > { %v7051_v35 = vadd.f32 %v6077_v37, %v3641_v28  ;;  %v7048_v36 = vadd.f32 %v5821_v7, %v3637_v57  ;;  %v6079_v47 = vpop.f32.mrb[5].mxu1  ;;  %v5823_v38 = vpop.f32.mrb[6].mxu0 }
 0x480   : > { %v6086_v39 = vadd.f32 %v8304_v40, %v7047_v59  ;;  %v7052_v48 = vadd.f32 %v6079_v47, %v3645_v6  ;;  %v7049_v60 = vadd.f32 %v5823_v38, %v3633_v56  ;;  %v6081_v62 = vpop.f32.mrb[6].mxu1  ;;  %v5825_v63 = vpop.f32.mrb[7].mxu0 }
 0x481   : > { %v6088_v1 = vadd.f32 %v8305_v0, %v7051_v35  ;;  %v6087_v26 = vadd.f32 %v8306_v2, %v7048_v36  ;;  %v7053_v27 = vadd.f32 %v6081_v62, %v3641_v28  ;;  %v7050_v3 = vadd.f32 %v5825_v63, %v3637_v57  ;;  %v6083_v5 = vpop.f32.mrb[7].mxu1 }
 0x482   : > { %6094 = vst [vmem:[%s10940_s25] sm:$0xff] %v6086_v39  ;;  %v6089_v9 = vadd.f32 %v8307_v8, %v7052_v48  ;;  %v6090_v11 = vadd.f32 %v8308_v10, %v7049_v60  ;;  %v7054_v12 = vadd.f32 %v6083_v5, %v3645_v6 }
 0x483   : > { %6096 = vst [vmem:[%s10940_s25 + $0x10] sm:$0xff] %v6088_v1  ;;  %6095 = vst [vmem:[%s10940_s25 + $0x8] sm:$0xff] %v6087_v26  ;;  %v6092_v14 = vadd.f32 %v8309_v13, %v7053_v27  ;;  %v6091_v33 = vadd.f32 %v8310_v61, %v7050_v3 }
 0x484   : > { %6097 = vst [vmem:[%s10940_s25 + $0x18] sm:$0xff] %v6089_v9  ;;  %6098 = vst [vmem:[%s10940_s25 + $0x20] sm:$0xff] %v6090_v11  ;;  %v6093_v16 = vadd.f32 %v8311_v49, %v7054_v12 }
 0x485   : > { %6100 = vst [vmem:[%s10940_s25 + $0x30] sm:$0xff] %v6092_v14  ;;  %6099 = vst [vmem:[%s10940_s25 + $0x28] sm:$0xff] %v6091_v33 }
 0x486   : > { %6101 = vst [vmem:[%s10940_s25 + $0x38] sm:$0xff] %v6093_v16 }
 0x487 PF: > { %s15_s18 = sadd.s32 1, %s8318_s18  }
 0x488   : > { %p12_p4 = scmp.ge.s32.totalorder %s15_s18, 4  }
 0x48a   :  { %14 = sbr.rel (!%p12_p4) target bundleno = 1 (0x1), region = 70 }

</bundles_post_ra>
